<compile_context>
chip_gen: v6e
topology: v6e:2x2x1
jax: 0.10.0
libtpu: 0.0.40
codegen_flags: <defaults>
</compile_context>

<pallas_src>
import functools

import jax
import jax.numpy as jnp
from jax import lax
from jax.experimental import pallas as pl
from jax.experimental.pallas import tpu as pltpu


def _knn_kernel(x_ref, dist_ref, idx_ref, *, n, k, idx_bits):
    """KNN for a block of F frames.

    x_ref:    (F, N, 3)  float32 point coordinates.
    dist_ref: (F, K, N)  float32 squared distances (ascending), lane-dense.
    idx_ref:  (F, K, N)  int32 neighbor indices, lane-dense.
    """
    f_frames = x_ref.shape[0]
    n_chunks = n // 8
    idx_mask = (1 << idx_bits) - 1          # low bits hold the database index
    keep_mask = jnp.int32(~idx_mask)        # clears the low idx_bits bits
    big = jnp.float32(3.0e38)
    dims = (((1,), (1,)), ((), ()))         # contract the augmented coord dim

    # Frame-invariant constants, hoisted out of the frame loop (iota/broadcast
    # are not CSE'd by JAX).
    row_ids = lax.broadcasted_iota(jnp.int32, (n, n), 0)   # database index i
    ones_col = jnp.ones((n, 1), jnp.float32)

    def emit(rows, slot, f):
        """Decode packed key rows (r, N) and store slots [slot, slot+r)."""
        r = rows.shape[0]
        bits = pltpu.bitcast(rows, jnp.int32)
        sel_idx = bits & idx_mask
        sel_d = pltpu.bitcast(bits & keep_mask, jnp.float32) - 1.0
        dist_ref[f, slot:slot + r, :] = jnp.maximum(sel_d, 0.0)
        idx_ref[f, slot:slot + r, :] = sel_idx

    @pl.loop(0, f_frames)                   # bounds live ranges to one frame
    def _frame(f):
        x = x_ref[f].astype(jnp.float32)                               # (N, 3)
        rsq = jnp.sum(x * x, axis=1, keepdims=True)                    # (N, 1) VPU

        # Single augmented MXU matmul: key[i, j] = |x_i - x_j|^2 + 1 >= ~1.
        a_mat = jnp.concatenate([x, rsq, ones_col], axis=1)            # (N, 5)
        b_mat = jnp.concatenate([-2.0 * x, ones_col, rsq + 1.0], axis=1)
        key = lax.dot_general(a_mat, b_mat, dims,
                              preferred_element_type=jnp.float32)      # (N, N)

        # key >= ~1 is a positive float, so its bit pattern is monotone in
        # value; clear the low mantissa bits and pack the database index there
        # -> fused min/argmin, ties broken toward the lowest index.
        kbits = pltpu.bitcast(key, jnp.int32)
        packed = pltpu.bitcast((kbits & keep_mask) | row_ids, jnp.float32)
        chunks = [packed[8 * c:8 * (c + 1), :] for c in range(n_chunks)]

        # Strict ">" threshold against the last selected key replaces row
        # masking; packed keys per column are unique, so the threshold excludes
        # exactly the already-selected entries.
        prev = jnp.zeros((1, n), jnp.float32)   # below every packed key
        for p in range(k // 2):                 # two neighbors per sweep
            pb = jnp.broadcast_to(prev, (8, n))
            m1 = jnp.full((8, n), big)
            m2 = jnp.full((8, n), big)
            for c in range(n_chunks):
                xm = jnp.where(chunks[c] > pb, chunks[c], big)
                m2 = jnp.minimum(jnp.maximum(m1, xm), m2)
                m1 = jnp.minimum(m1, xm)
            g1 = jnp.min(m1, axis=0, keepdims=True)                    # 1st min
            hit = m1 == jnp.broadcast_to(g1, (8, n))                   # unique
            g2 = jnp.min(jnp.where(hit, m2, m1), axis=0, keepdims=True)  # 2nd
            emit(jnp.concatenate([g1, g2], axis=0), 2 * p, f)
            prev = g2
        if k % 2:                               # odd k: one single-min sweep
            pb = jnp.broadcast_to(prev, (8, n))
            m1 = jnp.full((8, n), big)
            for c in range(n_chunks):
                m1 = jnp.minimum(m1, jnp.where(chunks[c] > pb, chunks[c], big))
            emit(jnp.min(m1, axis=0, keepdims=True), k - 1, f)


def _frames_per_step(num_frames, max_frames=8):
    """Frames per grid step F (a divisor of num_frames).

    Prefer the largest F <= max_frames whose grid (num_frames // F) is even so
    the two v7x TensorCores split evenly; otherwise the largest divisor.  On
    single-core chips (v5e/v6e) a large F simply amortizes the ~0.35us/step
    pipeline overhead."""
    cap = max(1, min(max_frames, num_frames))
    best, best_even = 1, 0
    for f in range(1, cap + 1):
        if num_frames % f == 0:
            best = f
            if (num_frames // f) % 2 == 0:
                best_even = f
    return best_even or best


@functools.partial(jax.jit, static_argnames=("k",))
def knn_pallas(xyz, k):
    """xyz: (B, N, 3) -> (distances, idxs), each (B, k, N) lane-dense,
    ascending along the k axis."""
    B, N, D3 = xyz.shape
    if k > N:
        raise ValueError(f"k={k} must be <= N={N}")
    if N % 8:
        raise ValueError(f"N={N} must be a multiple of 8")
    F = _frames_per_step(B)
    idx_bits = max(1, (N - 1).bit_length())
    # TODO(synk): for N large enough that idx_bits eats noticeable mantissa
    # (N >> 2048) or the (N, N) key no longer fits on-chip (v7x: 64 MiB VMEM,
    # set vmem_limit_bytes explicitly), tile over query rows with a streaming
    # top-k merge instead of one full distance matrix.

    kernel = functools.partial(_knn_kernel, n=N, k=k, idx_bits=idx_bits)
    # Cost reflects the real work: matmul (2*5*N^2) plus the per-element
    # selection sweeps (~3*k ops per element), per frame.
    cost = pl.CostEstimate(
        flops=int(B * N * N * (2 * 5 + 3 * k)),
        transcendentals=0,
        bytes_accessed=int(xyz.size * 4 + 2 * B * k * N * 4),
    )

    dist_t, idx_t = pl.pallas_call(
        kernel,
        out_shape=(
            jax.ShapeDtypeStruct((B, k, N), jnp.float32),
            jax.ShapeDtypeStruct((B, k, N), jnp.int32),
        ),
        grid_spec=pltpu.PrefetchScalarGridSpec(
            num_scalar_prefetch=0,
            grid=(B // F,),
            in_specs=[pl.BlockSpec((F, N, D3), lambda g: (g, 0, 0))],
            out_specs=(
                pl.BlockSpec((F, k, N), lambda g: (g, 0, 0)),
                pl.BlockSpec((F, k, N), lambda g: (g, 0, 0)),
            ),
        ),
        compiler_params=pltpu.CompilerParams(dimension_semantics=("parallel",)),
        cost_estimate=cost,
    )(xyz)
    return dist_t, idx_t


def tpatch_extractor_mod_strided_forward(point_seq, k=16, radius=None):
    """Pallas/JAX equivalent of TPatchExtractorModStrided.forward.

    point_seq: (b, t, n, d) float32.  KNN is computed per frame on the xyz
    slice point_seq[..., :3], against itself (query == database)."""
    b, t, n, d = point_seq.shape
    xyz = point_seq[..., :3].reshape(b * t, n, 3)

    dist_t, idx_t = knn_pallas(xyz, k)       # (B, k, N) lane-dense

    if radius is not None:
        # get_knn radius clipping, applied on the lane-dense layout the kernel
        # produced (out-of-radius neighbors -> nearest idx, dist 0).
        clipped = jnp.broadcast_to(idx_t[:, :1, :], idx_t.shape)
        mask = dist_t > radius ** 2
        idx_t = jnp.where(mask, clipped, idx_t)
        dist_t = jnp.where(mask, jnp.float32(0.0), dist_t)

    distances = jnp.transpose(dist_t, (0, 2, 1)).reshape(b, t, n, k)
    idxs = jnp.transpose(idx_t, (0, 2, 1)).reshape(b, t, n, k)

    # utils.index_points(point_seq, idxs)[:, :, 0, :]: only query point 0's
    # patch is kept, so gather just those k neighbors instead of (b,t,n,k,d).
    idx0 = idxs[:, :, 0, :]                                    # (b, t, k)
    point_patches = jnp.take_along_axis(point_seq, idx0[..., None], axis=2)

    # TODO(synk): `patchlets`, `patchlet_feats`, `normalized_patchlet_points`,
    # `fps_idx` and `out_x` are undefined in the provided reference forward;
    # they cannot be reproduced faithfully and are omitted / substituted.
    return {
        "idx": idxs,
        "distances": distances,
        "patchlet_points": point_patches,
        "x_current": point_seq.reshape(b, t, n, d),
    }


if __name__ == "__main__":
    key = jax.random.PRNGKey(0)
    b, t, n, d, k = 2, 4, 128, 6, 16
    point_seq = jax.random.normal(key, (b, t, n, d), dtype=jnp.float32)

    out = tpatch_extractor_mod_strided_forward(point_seq, k=k, radius=None)
    jax.block_until_ready(out)

    # --- sanity checks against a pure-JAX reference ---
    xyz = point_seq[..., :3].reshape(b * t, n, 3)
    diff = xyz[:, :, None, :] - xyz[:, None, :, :]
    ref_d = jnp.sum(diff * diff, axis=-1)                       # (B, N, N)
    ref_topk = jnp.sort(ref_d, axis=-1)[..., :k].reshape(b, t, n, k)
    assert jnp.allclose(out["distances"], ref_topk, atol=2e-3), "distance mismatch"

    # returned indices must be consistent with the returned distances
    d_at_idx = jnp.take_along_axis(
        ref_d.reshape(b, t, n, n), out["idx"], axis=-1)
    assert jnp.allclose(out["distances"], d_at_idx, atol=2e-3), "idx/dist mismatch"

    # first neighbor of each point is itself
    self_idx = jnp.broadcast_to(jnp.arange(n), (b, t, n))
    assert jnp.array_equal(out["idx"][..., 0], self_idx), "self-neighbor mismatch"
    assert out["idx"].shape == (b, t, n, k)
    assert out["patchlet_points"].shape == (b, t, k, d)

    print("KERNEL_OK")
</pallas_src>

<mosaic_0001>
module attributes {stable_mosaic.version = 11 : i64} {
  func.func @_knn_kernel(%arg0: i32, %arg1: memref<4x128x3xf32, #tpu.memory_space<vmem>>, %arg2: memref<4x16x128xf32, #tpu.memory_space<vmem>>, %arg3: memref<4x16x128xi32, #tpu.memory_space<vmem>>) attributes {dimension_semantics = [#tpu.dimension_semantics<parallel>], iteration_bounds = array<i64: 2>, scalar_prefetch = 0 : i64, scratch_operands = 0 : i64, tpu.core_type = #tpu.core_type<tc>, window_params = [{transform_indices = @transform_0, window_bounds = array<i64: 4, 128, 3>}, {transform_indices = @transform_1, window_bounds = array<i64: 4, 16, 128>}, {transform_indices = @transform_2, window_bounds = array<i64: 4, 16, 128>}]} {
    %0 = tpu.iota {dimensions = array<i32: 0>} : vector<128x128xi32>
    %cst = arith.constant 1.000000e+00 : f32
    %1 = vector.broadcast %cst : f32 to vector<128x1xf32>
    %c-128_i32 = arith.constant -128 : i32
    %cst_0 = arith.constant 3.000000e+38 : f32
    %c0_i32 = arith.constant 0 : i32
    %c4_i32 = arith.constant 4 : i32
    %2 = arith.addi %c0_i32, %c4_i32 : i32
    %c1_i32 = arith.constant 1 : i32
    scf.for %arg4 = %c0_i32 to %2 step %c1_i32  : i32 {
      %c1_i32_2 = arith.constant 1 : i32
      %3 = arith.muli %arg4, %c1_i32_2 : i32
      %c0_i32_3 = arith.constant 0 : i32
      %4 = arith.addi %c0_i32_3, %3 : i32
      %5 = arith.index_cast %4 : i32 to index
      %c0 = arith.constant 0 : index
      %c0_4 = arith.constant 0 : index
      %6 = vector.load %arg1[%5, %c0, %c0_4] : memref<4x128x3xf32, #tpu.memory_space<vmem>>, vector<1x128x3xf32>
      %7 = vector.shape_cast %6 : vector<1x128x3xf32> to vector<128x3xf32>
      %8 = arith.mulf %7, %7 : vector<128x3xf32>
      %cst_5 = arith.constant dense<0.000000e+00> : vector<128xf32>
      %9 = vector.multi_reduction <add>, %8, %cst_5 [1] : vector<128x3xf32> to vector<128xf32>
      %10 = vector.shape_cast %9 : vector<128xf32> to vector<128x1xf32>
      %11 = tpu.concatenate %7, %10, %1 in 1 : vector<128x3xf32>, vector<128x1xf32>, vector<128x1xf32> -> vector<128x5xf32>
      %cst_6 = arith.constant -2.000000e+00 : f32
      %12 = vector.broadcast %cst_6 : f32 to vector<128x3xf32>
      %13 = arith.mulf %12, %7 : vector<128x3xf32>
      %cst_7 = arith.constant 1.000000e+00 : f32
      %14 = vector.broadcast %cst_7 : f32 to vector<128x1xf32>
      %15 = arith.addf %10, %14 : vector<128x1xf32>
      %16 = tpu.concatenate %13, %1, %15 in 1 : vector<128x3xf32>, vector<128x1xf32>, vector<128x1xf32> -> vector<128x5xf32>
      %cst_8 = arith.constant dense<0.000000e+00> : vector<128x128xf32>
      %17 = tpu.matmul %11, %16, %cst_8 {dimension_numbers = #tpu.dot_dimension_numbers<[1], [1], [0], [0], [0, 0, 1, 0], [], []>} : vector<128x5xf32>, vector<128x5xf32>, vector<128x128xf32> -> vector<128x128xf32>
      %18 = tpu.bitcast %17 : vector<128x128xf32> -> vector<128x128xi32>
      %19 = vector.broadcast %c-128_i32 : i32 to vector<128x128xi32>
      %20 = arith.andi %18, %19 : vector<128x128xi32>
      %21 = arith.ori %20, %0 : vector<128x128xi32>
      %22 = tpu.bitcast %21 : vector<128x128xi32> -> vector<128x128xf32>
      %23 = vector.extract_strided_slice %22 {offsets = [0, 0], sizes = [8, 128], strides = [1, 1]} : vector<128x128xf32> to vector<8x128xf32>
      %24 = vector.extract_strided_slice %22 {offsets = [8, 0], sizes = [8, 128], strides = [1, 1]} : vector<128x128xf32> to vector<8x128xf32>
      %25 = vector.extract_strided_slice %22 {offsets = [16, 0], sizes = [8, 128], strides = [1, 1]} : vector<128x128xf32> to vector<8x128xf32>
      %26 = vector.extract_strided_slice %22 {offsets = [24, 0], sizes = [8, 128], strides = [1, 1]} : vector<128x128xf32> to vector<8x128xf32>
      %27 = vector.extract_strided_slice %22 {offsets = [32, 0], sizes = [8, 128], strides = [1, 1]} : vector<128x128xf32> to vector<8x128xf32>
      %28 = vector.extract_strided_slice %22 {offsets = [40, 0], sizes = [8, 128], strides = [1, 1]} : vector<128x128xf32> to vector<8x128xf32>
      %29 = vector.extract_strided_slice %22 {offsets = [48, 0], sizes = [8, 128], strides = [1, 1]} : vector<128x128xf32> to vector<8x128xf32>
      %30 = vector.extract_strided_slice %22 {offsets = [56, 0], sizes = [8, 128], strides = [1, 1]} : vector<128x128xf32> to vector<8x128xf32>
      %31 = vector.extract_strided_slice %22 {offsets = [64, 0], sizes = [8, 128], strides = [1, 1]} : vector<128x128xf32> to vector<8x128xf32>
      %32 = vector.extract_strided_slice %22 {offsets = [72, 0], sizes = [8, 128], strides = [1, 1]} : vector<128x128xf32> to vector<8x128xf32>
      %33 = vector.extract_strided_slice %22 {offsets = [80, 0], sizes = [8, 128], strides = [1, 1]} : vector<128x128xf32> to vector<8x128xf32>
      %34 = vector.extract_strided_slice %22 {offsets = [88, 0], sizes = [8, 128], strides = [1, 1]} : vector<128x128xf32> to vector<8x128xf32>
      %35 = vector.extract_strided_slice %22 {offsets = [96, 0], sizes = [8, 128], strides = [1, 1]} : vector<128x128xf32> to vector<8x128xf32>
      %36 = vector.extract_strided_slice %22 {offsets = [104, 0], sizes = [8, 128], strides = [1, 1]} : vector<128x128xf32> to vector<8x128xf32>
      %37 = vector.extract_strided_slice %22 {offsets = [112, 0], sizes = [8, 128], strides = [1, 1]} : vector<128x128xf32> to vector<8x128xf32>
      %38 = vector.extract_strided_slice %22 {offsets = [120, 0], sizes = [8, 128], strides = [1, 1]} : vector<128x128xf32> to vector<8x128xf32>
      %cst_9 = arith.constant 0.000000e+00 : f32
      %39 = vector.broadcast %cst_9 : f32 to vector<1x128xf32>
      %40 = vector.shape_cast %39 : vector<1x128xf32> to vector<1x128xf32>
      %41 = vector.broadcast %40 : vector<1x128xf32> to vector<8x128xf32>
      %42 = vector.broadcast %cst_0 : f32 to vector<8x128xf32>
      %43 = vector.broadcast %cst_0 : f32 to vector<8x128xf32>
      %44 = arith.cmpf ogt, %23, %41 : vector<8x128xf32>
      %45 = vector.broadcast %cst_0 : f32 to vector<8x128xf32>
      %46 = arith.select %44, %23, %45 : vector<8x128xi1>, vector<8x128xf32>
      %47 = arith.maximumf %42, %46 : vector<8x128xf32>
      %48 = arith.minimumf %47, %43 : vector<8x128xf32>
      %49 = arith.minimumf %42, %46 : vector<8x128xf32>
      %50 = arith.cmpf ogt, %24, %41 : vector<8x128xf32>
      %51 = vector.broadcast %cst_0 : f32 to vector<8x128xf32>
      %52 = arith.select %50, %24, %51 : vector<8x128xi1>, vector<8x128xf32>
      %53 = arith.maximumf %49, %52 : vector<8x128xf32>
      %54 = arith.minimumf %53, %48 : vector<8x128xf32>
      %55 = arith.minimumf %49, %52 : vector<8x128xf32>
      %56 = arith.cmpf ogt, %25, %41 : vector<8x128xf32>
      %57 = vector.broadcast %cst_0 : f32 to vector<8x128xf32>
      %58 = arith.select %56, %25, %57 : vector<8x128xi1>, vector<8x128xf32>
      %59 = arith.maximumf %55, %58 : vector<8x128xf32>
      %60 = arith.minimumf %59, %54 : vector<8x128xf32>
      %61 = arith.minimumf %55, %58 : vector<8x128xf32>
      %62 = arith.cmpf ogt, %26, %41 : vector<8x128xf32>
      %63 = vector.broadcast %cst_0 : f32 to vector<8x128xf32>
      %64 = arith.select %62, %26, %63 : vector<8x128xi1>, vector<8x128xf32>
      %65 = arith.maximumf %61, %64 : vector<8x128xf32>
      %66 = arith.minimumf %65, %60 : vector<8x128xf32>
      %67 = arith.minimumf %61, %64 : vector<8x128xf32>
      %68 = arith.cmpf ogt, %27, %41 : vector<8x128xf32>
      %69 = vector.broadcast %cst_0 : f32 to vector<8x128xf32>
      %70 = arith.select %68, %27, %69 : vector<8x128xi1>, vector<8x128xf32>
      %71 = arith.maximumf %67, %70 : vector<8x128xf32>
      %72 = arith.minimumf %71, %66 : vector<8x128xf32>
      %73 = arith.minimumf %67, %70 : vector<8x128xf32>
      %74 = arith.cmpf ogt, %28, %41 : vector<8x128xf32>
      %75 = vector.broadcast %cst_0 : f32 to vector<8x128xf32>
      %76 = arith.select %74, %28, %75 : vector<8x128xi1>, vector<8x128xf32>
      %77 = arith.maximumf %73, %76 : vector<8x128xf32>
      %78 = arith.minimumf %77, %72 : vector<8x128xf32>
      %79 = arith.minimumf %73, %76 : vector<8x128xf32>
      %80 = arith.cmpf ogt, %29, %41 : vector<8x128xf32>
      %81 = vector.broadcast %cst_0 : f32 to vector<8x128xf32>
      %82 = arith.select %80, %29, %81 : vector<8x128xi1>, vector<8x128xf32>
      %83 = arith.maximumf %79, %82 : vector<8x128xf32>
      %84 = arith.minimumf %83, %78 : vector<8x128xf32>
      %85 = arith.minimumf %79, %82 : vector<8x128xf32>
      %86 = arith.cmpf ogt, %30, %41 : vector<8x128xf32>
      %87 = vector.broadcast %cst_0 : f32 to vector<8x128xf32>
      %88 = arith.select %86, %30, %87 : vector<8x128xi1>, vector<8x128xf32>
      %89 = arith.maximumf %85, %88 : vector<8x128xf32>
      %90 = arith.minimumf %89, %84 : vector<8x128xf32>
      %91 = arith.minimumf %85, %88 : vector<8x128xf32>
      %92 = arith.cmpf ogt, %31, %41 : vector<8x128xf32>
      %93 = vector.broadcast %cst_0 : f32 to vector<8x128xf32>
      %94 = arith.select %92, %31, %93 : vector<8x128xi1>, vector<8x128xf32>
      %95 = arith.maximumf %91, %94 : vector<8x128xf32>
      %96 = arith.minimumf %95, %90 : vector<8x128xf32>
      %97 = arith.minimumf %91, %94 : vector<8x128xf32>
      %98 = arith.cmpf ogt, %32, %41 : vector<8x128xf32>
      %99 = vector.broadcast %cst_0 : f32 to vector<8x128xf32>
      %100 = arith.select %98, %32, %99 : vector<8x128xi1>, vector<8x128xf32>
      %101 = arith.maximumf %97, %100 : vector<8x128xf32>
      %102 = arith.minimumf %101, %96 : vector<8x128xf32>
      %103 = arith.minimumf %97, %100 : vector<8x128xf32>
      %104 = arith.cmpf ogt, %33, %41 : vector<8x128xf32>
      %105 = vector.broadcast %cst_0 : f32 to vector<8x128xf32>
      %106 = arith.select %104, %33, %105 : vector<8x128xi1>, vector<8x128xf32>
      %107 = arith.maximumf %103, %106 : vector<8x128xf32>
      %108 = arith.minimumf %107, %102 : vector<8x128xf32>
      %109 = arith.minimumf %103, %106 : vector<8x128xf32>
      %110 = arith.cmpf ogt, %34, %41 : vector<8x128xf32>
      %111 = vector.broadcast %cst_0 : f32 to vector<8x128xf32>
      %112 = arith.select %110, %34, %111 : vector<8x128xi1>, vector<8x128xf32>
      %113 = arith.maximumf %109, %112 : vector<8x128xf32>
      %114 = arith.minimumf %113, %108 : vector<8x128xf32>
      %115 = arith.minimumf %109, %112 : vector<8x128xf32>
      %116 = arith.cmpf ogt, %35, %41 : vector<8x128xf32>
      %117 = vector.broadcast %cst_0 : f32 to vector<8x128xf32>
      %118 = arith.select %116, %35, %117 : vector<8x128xi1>, vector<8x128xf32>
      %119 = arith.maximumf %115, %118 : vector<8x128xf32>
      %120 = arith.minimumf %119, %114 : vector<8x128xf32>
      %121 = arith.minimumf %115, %118 : vector<8x128xf32>
      %122 = arith.cmpf ogt, %36, %41 : vector<8x128xf32>
      %123 = vector.broadcast %cst_0 : f32 to vector<8x128xf32>
      %124 = arith.select %122, %36, %123 : vector<8x128xi1>, vector<8x128xf32>
      %125 = arith.maximumf %121, %124 : vector<8x128xf32>
      %126 = arith.minimumf %125, %120 : vector<8x128xf32>
      %127 = arith.minimumf %121, %124 : vector<8x128xf32>
      %128 = arith.cmpf ogt, %37, %41 : vector<8x128xf32>
      %129 = vector.broadcast %cst_0 : f32 to vector<8x128xf32>
      %130 = arith.select %128, %37, %129 : vector<8x128xi1>, vector<8x128xf32>
      %131 = arith.maximumf %127, %130 : vector<8x128xf32>
      %132 = arith.minimumf %131, %126 : vector<8x128xf32>
      %133 = arith.minimumf %127, %130 : vector<8x128xf32>
      %134 = arith.cmpf ogt, %38, %41 : vector<8x128xf32>
      %135 = vector.broadcast %cst_0 : f32 to vector<8x128xf32>
      %136 = arith.select %134, %38, %135 : vector<8x128xi1>, vector<8x128xf32>
      %137 = arith.maximumf %133, %136 : vector<8x128xf32>
      %138 = arith.minimumf %137, %132 : vector<8x128xf32>
      %139 = arith.minimumf %133, %136 : vector<8x128xf32>
      %cst_10 = arith.constant dense<0x7F800000> : vector<128xf32>
      %140 = vector.multi_reduction <minimumf>, %139, %cst_10 [0] : vector<8x128xf32> to vector<128xf32>
      %141 = vector.shape_cast %140 : vector<128xf32> to vector<1x128xf32>
      %142 = vector.shape_cast %141 : vector<1x128xf32> to vector<1x128xf32>
      %143 = vector.broadcast %142 : vector<1x128xf32> to vector<8x128xf32>
      %144 = arith.cmpf oeq, %139, %143 : vector<8x128xf32>
      %145 = arith.select %144, %138, %139 : vector<8x128xi1>, vector<8x128xf32>
      %cst_11 = arith.constant dense<0x7F800000> : vector<128xf32>
      %146 = vector.multi_reduction <minimumf>, %145, %cst_11 [0] : vector<8x128xf32> to vector<128xf32>
      %147 = vector.shape_cast %146 : vector<128xf32> to vector<1x128xf32>
      %148 = tpu.concatenate %141, %147 in 0 : vector<1x128xf32>, vector<1x128xf32> -> vector<2x128xf32>
      %149 = tpu.bitcast %148 : vector<2x128xf32> -> vector<2x128xi32>
      %c127_i32 = arith.constant 127 : i32
      %150 = vector.broadcast %c127_i32 : i32 to vector<2x128xi32>
      %151 = arith.andi %149, %150 : vector<2x128xi32>
      %152 = vector.broadcast %c-128_i32 : i32 to vector<2x128xi32>
      %153 = arith.andi %149, %152 : vector<2x128xi32>
      %154 = tpu.bitcast %153 : vector<2x128xi32> -> vector<2x128xf32>
      %cst_12 = arith.constant 1.000000e+00 : f32
      %155 = vector.broadcast %cst_12 : f32 to vector<2x128xf32>
      %156 = arith.subf %154, %155 : vector<2x128xf32>
      %cst_13 = arith.constant 0.000000e+00 : f32
      %157 = vector.broadcast %cst_13 : f32 to vector<2x128xf32>
      %158 = arith.maximumf %156, %157 : vector<2x128xf32>
      %159 = arith.index_cast %4 : i32 to index
      %c0_14 = arith.constant 0 : index
      %c0_15 = arith.constant 0 : index
      %160 = vector.load %arg2[%159, %c0_14, %c0_15] : memref<4x16x128xf32, #tpu.memory_space<vmem>>, vector<1x2x128xf32>
      %161 = vector.shape_cast %160 : vector<1x2x128xf32> to vector<2x128xf32>
      %162 = vector.shape_cast %158 : vector<2x128xf32> to vector<1x2x128xf32>
      tpu.vector_store %arg2[%159, %c0_14, %c0_15], %162 {strides = array<i32>} : memref<4x16x128xf32, #tpu.memory_space<vmem>>, vector<1x2x128xf32>,
      %163 = arith.index_cast %4 : i32 to index
      %c0_16 = arith.constant 0 : index
      %c0_17 = arith.constant 0 : index
      %164 = vector.load %arg3[%163, %c0_16, %c0_17] : memref<4x16x128xi32, #tpu.memory_space<vmem>>, vector<1x2x128xi32>
      %165 = vector.shape_cast %164 : vector<1x2x128xi32> to vector<2x128xi32>
      %166 = vector.shape_cast %151 : vector<2x128xi32> to vector<1x2x128xi32>
      tpu.vector_store %arg3[%163, %c0_16, %c0_17], %166 {strides = array<i32>} : memref<4x16x128xi32, #tpu.memory_space<vmem>>, vector<1x2x128xi32>,
      %167 = vector.shape_cast %147 : vector<1x128xf32> to vector<1x128xf32>
      %168 = vector.broadcast %167 : vector<1x128xf32> to vector<8x128xf32>
      %169 = vector.broadcast %cst_0 : f32 to vector<8x128xf32>
      %170 = vector.broadcast %cst_0 : f32 to vector<8x128xf32>
      %171 = arith.cmpf ogt, %23, %168 : vector<8x128xf32>
      %172 = vector.broadcast %cst_0 : f32 to vector<8x128xf32>
      %173 = arith.select %171, %23, %172 : vector<8x128xi1>, vector<8x128xf32>
      %174 = arith.maximumf %169, %173 : vector<8x128xf32>
      %175 = arith.minimumf %174, %170 : vector<8x128xf32>
      %176 = arith.minimumf %169, %173 : vector<8x128xf32>
      %177 = arith.cmpf ogt, %24, %168 : vector<8x128xf32>
      %178 = vector.broadcast %cst_0 : f32 to vector<8x128xf32>
      %179 = arith.select %177, %24, %178 : vector<8x128xi1>, vector<8x128xf32>
      %180 = arith.maximumf %176, %179 : vector<8x128xf32>
      %181 = arith.minimumf %180, %175 : vector<8x128xf32>
      %182 = arith.minimumf %176, %179 : vector<8x128xf32>
      %183 = arith.cmpf ogt, %25, %168 : vector<8x128xf32>
      %184 = vector.broadcast %cst_0 : f32 to vector<8x128xf32>
      %185 = arith.select %183, %25, %184 : vector<8x128xi1>, vector<8x128xf32>
      %186 = arith.maximumf %182, %185 : vector<8x128xf32>
      %187 = arith.minimumf %186, %181 : vector<8x128xf32>
      %188 = arith.minimumf %182, %185 : vector<8x128xf32>
      %189 = arith.cmpf ogt, %26, %168 : vector<8x128xf32>
      %190 = vector.broadcast %cst_0 : f32 to vector<8x128xf32>
      %191 = arith.select %189, %26, %190 : vector<8x128xi1>, vector<8x128xf32>
      %192 = arith.maximumf %188, %191 : vector<8x128xf32>
      %193 = arith.minimumf %192, %187 : vector<8x128xf32>
      %194 = arith.minimumf %188, %191 : vector<8x128xf32>
      %195 = arith.cmpf ogt, %27, %168 : vector<8x128xf32>
      %196 = vector.broadcast %cst_0 : f32 to vector<8x128xf32>
      %197 = arith.select %195, %27, %196 : vector<8x128xi1>, vector<8x128xf32>
      %198 = arith.maximumf %194, %197 : vector<8x128xf32>
      %199 = arith.minimumf %198, %193 : vector<8x128xf32>
      %200 = arith.minimumf %194, %197 : vector<8x128xf32>
      %201 = arith.cmpf ogt, %28, %168 : vector<8x128xf32>
      %202 = vector.broadcast %cst_0 : f32 to vector<8x128xf32>
      %203 = arith.select %201, %28, %202 : vector<8x128xi1>, vector<8x128xf32>
      %204 = arith.maximumf %200, %203 : vector<8x128xf32>
      %205 = arith.minimumf %204, %199 : vector<8x128xf32>
      %206 = arith.minimumf %200, %203 : vector<8x128xf32>
      %207 = arith.cmpf ogt, %29, %168 : vector<8x128xf32>
      %208 = vector.broadcast %cst_0 : f32 to vector<8x128xf32>
      %209 = arith.select %207, %29, %208 : vector<8x128xi1>, vector<8x128xf32>
      %210 = arith.maximumf %206, %209 : vector<8x128xf32>
      %211 = arith.minimumf %210, %205 : vector<8x128xf32>
      %212 = arith.minimumf %206, %209 : vector<8x128xf32>
      %213 = arith.cmpf ogt, %30, %168 : vector<8x128xf32>
      %214 = vector.broadcast %cst_0 : f32 to vector<8x128xf32>
      %215 = arith.select %213, %30, %214 : vector<8x128xi1>, vector<8x128xf32>
      %216 = arith.maximumf %212, %215 : vector<8x128xf32>
      %217 = arith.minimumf %216, %211 : vector<8x128xf32>
      %218 = arith.minimumf %212, %215 : vector<8x128xf32>
      %219 = arith.cmpf ogt, %31, %168 : vector<8x128xf32>
      %220 = vector.broadcast %cst_0 : f32 to vector<8x128xf32>
      %221 = arith.select %219, %31, %220 : vector<8x128xi1>, vector<8x128xf32>
      %222 = arith.maximumf %218, %221 : vector<8x128xf32>
      %223 = arith.minimumf %222, %217 : vector<8x128xf32>
      %224 = arith.minimumf %218, %221 : vector<8x128xf32>
      %225 = arith.cmpf ogt, %32, %168 : vector<8x128xf32>
      %226 = vector.broadcast %cst_0 : f32 to vector<8x128xf32>
      %227 = arith.select %225, %32, %226 : vector<8x128xi1>, vector<8x128xf32>
      %228 = arith.maximumf %224, %227 : vector<8x128xf32>
      %229 = arith.minimumf %228, %223 : vector<8x128xf32>
      %230 = arith.minimumf %224, %227 : vector<8x128xf32>
      %231 = arith.cmpf ogt, %33, %168 : vector<8x128xf32>
      %232 = vector.broadcast %cst_0 : f32 to vector<8x128xf32>
      %233 = arith.select %231, %33, %232 : vector<8x128xi1>, vector<8x128xf32>
      %234 = arith.maximumf %230, %233 : vector<8x128xf32>
      %235 = arith.minimumf %234, %229 : vector<8x128xf32>
      %236 = arith.minimumf %230, %233 : vector<8x128xf32>
      %237 = arith.cmpf ogt, %34, %168 : vector<8x128xf32>
      %238 = vector.broadcast %cst_0 : f32 to vector<8x128xf32>
      %239 = arith.select %237, %34, %238 : vector<8x128xi1>, vector<8x128xf32>
      %240 = arith.maximumf %236, %239 : vector<8x128xf32>
      %241 = arith.minimumf %240, %235 : vector<8x128xf32>
      %242 = arith.minimumf %236, %239 : vector<8x128xf32>
      %243 = arith.cmpf ogt, %35, %168 : vector<8x128xf32>
      %244 = vector.broadcast %cst_0 : f32 to vector<8x128xf32>
      %245 = arith.select %243, %35, %244 : vector<8x128xi1>, vector<8x128xf32>
      %246 = arith.maximumf %242, %245 : vector<8x128xf32>
      %247 = arith.minimumf %246, %241 : vector<8x128xf32>
      %248 = arith.minimumf %242, %245 : vector<8x128xf32>
      %249 = arith.cmpf ogt, %36, %168 : vector<8x128xf32>
      %250 = vector.broadcast %cst_0 : f32 to vector<8x128xf32>
      %251 = arith.select %249, %36, %250 : vector<8x128xi1>, vector<8x128xf32>
      %252 = arith.maximumf %248, %251 : vector<8x128xf32>
      %253 = arith.minimumf %252, %247 : vector<8x128xf32>
      %254 = arith.minimumf %248, %251 : vector<8x128xf32>
      %255 = arith.cmpf ogt, %37, %168 : vector<8x128xf32>
      %256 = vector.broadcast %cst_0 : f32 to vector<8x128xf32>
      %257 = arith.select %255, %37, %256 : vector<8x128xi1>, vector<8x128xf32>
      %258 = arith.maximumf %254, %257 : vector<8x128xf32>
      %259 = arith.minimumf %258, %253 : vector<8x128xf32>
      %260 = arith.minimumf %254, %257 : vector<8x128xf32>
      %261 = arith.cmpf ogt, %38, %168 : vector<8x128xf32>
      %262 = vector.broadcast %cst_0 : f32 to vector<8x128xf32>
      %263 = arith.select %261, %38, %262 : vector<8x128xi1>, vector<8x128xf32>
      %264 = arith.maximumf %260, %263 : vector<8x128xf32>
      %265 = arith.minimumf %264, %259 : vector<8x128xf32>
      %266 = arith.minimumf %260, %263 : vector<8x128xf32>
      %cst_18 = arith.constant dense<0x7F800000> : vector<128xf32>
      %267 = vector.multi_reduction <minimumf>, %266, %cst_18 [0] : vector<8x128xf32> to vector<128xf32>
      %268 = vector.shape_cast %267 : vector<128xf32> to vector<1x128xf32>
      %269 = vector.shape_cast %268 : vector<1x128xf32> to vector<1x128xf32>
      %270 = vector.broadcast %269 : vector<1x128xf32> to vector<8x128xf32>
      %271 = arith.cmpf oeq, %266, %270 : vector<8x128xf32>
      %272 = arith.select %271, %265, %266 : vector<8x128xi1>, vector<8x128xf32>
      %cst_19 = arith.constant dense<0x7F800000> : vector<128xf32>
      %273 = vector.multi_reduction <minimumf>, %272, %cst_19 [0] : vector<8x128xf32> to vector<128xf32>
      %274 = vector.shape_cast %273 : vector<128xf32> to vector<1x128xf32>
      %275 = tpu.concatenate %268, %274 in 0 : vector<1x128xf32>, vector<1x128xf32> -> vector<2x128xf32>
      %276 = tpu.bitcast %275 : vector<2x128xf32> -> vector<2x128xi32>
      %c127_i32_20 = arith.constant 127 : i32
      %277 = vector.broadcast %c127_i32_20 : i32 to vector<2x128xi32>
      %278 = arith.andi %276, %277 : vector<2x128xi32>
      %279 = vector.broadcast %c-128_i32 : i32 to vector<2x128xi32>
      %280 = arith.andi %276, %279 : vector<2x128xi32>
      %281 = tpu.bitcast %280 : vector<2x128xi32> -> vector<2x128xf32>
      %cst_21 = arith.constant 1.000000e+00 : f32
      %282 = vector.broadcast %cst_21 : f32 to vector<2x128xf32>
      %283 = arith.subf %281, %282 : vector<2x128xf32>
      %cst_22 = arith.constant 0.000000e+00 : f32
      %284 = vector.broadcast %cst_22 : f32 to vector<2x128xf32>
      %285 = arith.maximumf %283, %284 : vector<2x128xf32>
      %286 = arith.index_cast %4 : i32 to index
      %c2 = arith.constant 2 : index
      %c0_23 = arith.constant 0 : index
      %287 = vector.load %arg2[%286, %c2, %c0_23] : memref<4x16x128xf32, #tpu.memory_space<vmem>>, vector<1x2x128xf32>
      %288 = vector.shape_cast %287 : vector<1x2x128xf32> to vector<2x128xf32>
      %289 = vector.shape_cast %285 : vector<2x128xf32> to vector<1x2x128xf32>
      tpu.vector_store %arg2[%286, %c2, %c0_23], %289 {strides = array<i32>} : memref<4x16x128xf32, #tpu.memory_space<vmem>>, vector<1x2x128xf32>,
      %290 = arith.index_cast %4 : i32 to index
      %c2_24 = arith.constant 2 : index
      %c0_25 = arith.constant 0 : index
      %291 = vector.load %arg3[%290, %c2_24, %c0_25] : memref<4x16x128xi32, #tpu.memory_space<vmem>>, vector<1x2x128xi32>
      %292 = vector.shape_cast %291 : vector<1x2x128xi32> to vector<2x128xi32>
      %293 = vector.shape_cast %278 : vector<2x128xi32> to vector<1x2x128xi32>
      tpu.vector_store %arg3[%290, %c2_24, %c0_25], %293 {strides = array<i32>} : memref<4x16x128xi32, #tpu.memory_space<vmem>>, vector<1x2x128xi32>,
      %294 = vector.shape_cast %274 : vector<1x128xf32> to vector<1x128xf32>
      %295 = vector.broadcast %294 : vector<1x128xf32> to vector<8x128xf32>
      %296 = vector.broadcast %cst_0 : f32 to vector<8x128xf32>
      %297 = vector.broadcast %cst_0 : f32 to vector<8x128xf32>
      %298 = arith.cmpf ogt, %23, %295 : vector<8x128xf32>
      %299 = vector.broadcast %cst_0 : f32 to vector<8x128xf32>
      %300 = arith.select %298, %23, %299 : vector<8x128xi1>, vector<8x128xf32>
      %301 = arith.maximumf %296, %300 : vector<8x128xf32>
      %302 = arith.minimumf %301, %297 : vector<8x128xf32>
      %303 = arith.minimumf %296, %300 : vector<8x128xf32>
      %304 = arith.cmpf ogt, %24, %295 : vector<8x128xf32>
      %305 = vector.broadcast %cst_0 : f32 to vector<8x128xf32>
      %306 = arith.select %304, %24, %305 : vector<8x128xi1>, vector<8x128xf32>
      %307 = arith.maximumf %303, %306 : vector<8x128xf32>
      %308 = arith.minimumf %307, %302 : vector<8x128xf32>
      %309 = arith.minimumf %303, %306 : vector<8x128xf32>
      %310 = arith.cmpf ogt, %25, %295 : vector<8x128xf32>
      %311 = vector.broadcast %cst_0 : f32 to vector<8x128xf32>
      %312 = arith.select %310, %25, %311 : vector<8x128xi1>, vector<8x128xf32>
      %313 = arith.maximumf %309, %312 : vector<8x128xf32>
      %314 = arith.minimumf %313, %308 : vector<8x128xf32>
      %315 = arith.minimumf %309, %312 : vector<8x128xf32>
      %316 = arith.cmpf ogt, %26, %295 : vector<8x128xf32>
      %317 = vector.broadcast %cst_0 : f32 to vector<8x128xf32>
      %318 = arith.select %316, %26, %317 : vector<8x128xi1>, vector<8x128xf32>
      %319 = arith.maximumf %315, %318 : vector<8x128xf32>
      %320 = arith.minimumf %319, %314 : vector<8x128xf32>
      %321 = arith.minimumf %315, %318 : vector<8x128xf32>
      %322 = arith.cmpf ogt, %27, %295 : vector<8x128xf32>
      %323 = vector.broadcast %cst_0 : f32 to vector<8x128xf32>
      %324 = arith.select %322, %27, %323 : vector<8x128xi1>, vector<8x128xf32>
      %325 = arith.maximumf %321, %324 : vector<8x128xf32>
      %326 = arith.minimumf %325, %320 : vector<8x128xf32>
      %327 = arith.minimumf %321, %324 : vector<8x128xf32>
      %328 = arith.cmpf ogt, %28, %295 : vector<8x128xf32>
      %329 = vector.broadcast %cst_0 : f32 to vector<8x128xf32>
      %330 = arith.select %328, %28, %329 : vector<8x128xi1>, vector<8x128xf32>
      %331 = arith.maximumf %327, %330 : vector<8x128xf32>
      %332 = arith.minimumf %331, %326 : vector<8x128xf32>
      %333 = arith.minimumf %327, %330 : vector<8x128xf32>
      %334 = arith.cmpf ogt, %29, %295 : vector<8x128xf32>
      %335 = vector.broadcast %cst_0 : f32 to vector<8x128xf32>
      %336 = arith.select %334, %29, %335 : vector<8x128xi1>, vector<8x128xf32>
      %337 = arith.maximumf %333, %336 : vector<8x128xf32>
      %338 = arith.minimumf %337, %332 : vector<8x128xf32>
      %339 = arith.minimumf %333, %336 : vector<8x128xf32>
      %340 = arith.cmpf ogt, %30, %295 : vector<8x128xf32>
      %341 = vector.broadcast %cst_0 : f32 to vector<8x128xf32>
      %342 = arith.select %340, %30, %341 : vector<8x128xi1>, vector<8x128xf32>
      %343 = arith.maximumf %339, %342 : vector<8x128xf32>
      %344 = arith.minimumf %343, %338 : vector<8x128xf32>
      %345 = arith.minimumf %339, %342 : vector<8x128xf32>
      %346 = arith.cmpf ogt, %31, %295 : vector<8x128xf32>
      %347 = vector.broadcast %cst_0 : f32 to vector<8x128xf32>
      %348 = arith.select %346, %31, %347 : vector<8x128xi1>, vector<8x128xf32>
      %349 = arith.maximumf %345, %348 : vector<8x128xf32>
      %350 = arith.minimumf %349, %344 : vector<8x128xf32>
      %351 = arith.minimumf %345, %348 : vector<8x128xf32>
      %352 = arith.cmpf ogt, %32, %295 : vector<8x128xf32>
      %353 = vector.broadcast %cst_0 : f32 to vector<8x128xf32>
      %354 = arith.select %352, %32, %353 : vector<8x128xi1>, vector<8x128xf32>
      %355 = arith.maximumf %351, %354 : vector<8x128xf32>
      %356 = arith.minimumf %355, %350 : vector<8x128xf32>
      %357 = arith.minimumf %351, %354 : vector<8x128xf32>
      %358 = arith.cmpf ogt, %33, %295 : vector<8x128xf32>
      %359 = vector.broadcast %cst_0 : f32 to vector<8x128xf32>
      %360 = arith.select %358, %33, %359 : vector<8x128xi1>, vector<8x128xf32>
      %361 = arith.maximumf %357, %360 : vector<8x128xf32>
      %362 = arith.minimumf %361, %356 : vector<8x128xf32>
      %363 = arith.minimumf %357, %360 : vector<8x128xf32>
      %364 = arith.cmpf ogt, %34, %295 : vector<8x128xf32>
      %365 = vector.broadcast %cst_0 : f32 to vector<8x128xf32>
      %366 = arith.select %364, %34, %365 : vector<8x128xi1>, vector<8x128xf32>
      %367 = arith.maximumf %363, %366 : vector<8x128xf32>
      %368 = arith.minimumf %367, %362 : vector<8x128xf32>
      %369 = arith.minimumf %363, %366 : vector<8x128xf32>
      %370 = arith.cmpf ogt, %35, %295 : vector<8x128xf32>
      %371 = vector.broadcast %cst_0 : f32 to vector<8x128xf32>
      %372 = arith.select %370, %35, %371 : vector<8x128xi1>, vector<8x128xf32>
      %373 = arith.maximumf %369, %372 : vector<8x128xf32>
      %374 = arith.minimumf %373, %368 : vector<8x128xf32>
      %375 = arith.minimumf %369, %372 : vector<8x128xf32>
      %376 = arith.cmpf ogt, %36, %295 : vector<8x128xf32>
      %377 = vector.broadcast %cst_0 : f32 to vector<8x128xf32>
      %378 = arith.select %376, %36, %377 : vector<8x128xi1>, vector<8x128xf32>
      %379 = arith.maximumf %375, %378 : vector<8x128xf32>
      %380 = arith.minimumf %379, %374 : vector<8x128xf32>
      %381 = arith.minimumf %375, %378 : vector<8x128xf32>
      %382 = arith.cmpf ogt, %37, %295 : vector<8x128xf32>
      %383 = vector.broadcast %cst_0 : f32 to vector<8x128xf32>
      %384 = arith.select %382, %37, %383 : vector<8x128xi1>, vector<8x128xf32>
      %385 = arith.maximumf %381, %384 : vector<8x128xf32>
      %386 = arith.minimumf %385, %380 : vector<8x128xf32>
      %387 = arith.minimumf %381, %384 : vector<8x128xf32>
      %388 = arith.cmpf ogt, %38, %295 : vector<8x128xf32>
      %389 = vector.broadcast %cst_0 : f32 to vector<8x128xf32>
      %390 = arith.select %388, %38, %389 : vector<8x128xi1>, vector<8x128xf32>
      %391 = arith.maximumf %387, %390 : vector<8x128xf32>
      %392 = arith.minimumf %391, %386 : vector<8x128xf32>
      %393 = arith.minimumf %387, %390 : vector<8x128xf32>
      %cst_26 = arith.constant dense<0x7F800000> : vector<128xf32>
      %394 = vector.multi_reduction <minimumf>, %393, %cst_26 [0] : vector<8x128xf32> to vector<128xf32>
      %395 = vector.shape_cast %394 : vector<128xf32> to vector<1x128xf32>
      %396 = vector.shape_cast %395 : vector<1x128xf32> to vector<1x128xf32>
      %397 = vector.broadcast %396 : vector<1x128xf32> to vector<8x128xf32>
      %398 = arith.cmpf oeq, %393, %397 : vector<8x128xf32>
      %399 = arith.select %398, %392, %393 : vector<8x128xi1>, vector<8x128xf32>
      %cst_27 = arith.constant dense<0x7F800000> : vector<128xf32>
      %400 = vector.multi_reduction <minimumf>, %399, %cst_27 [0] : vector<8x128xf32> to vector<128xf32>
      %401 = vector.shape_cast %400 : vector<128xf32> to vector<1x128xf32>
      %402 = tpu.concatenate %395, %401 in 0 : vector<1x128xf32>, vector<1x128xf32> -> vector<2x128xf32>
      %403 = tpu.bitcast %402 : vector<2x128xf32> -> vector<2x128xi32>
      %c127_i32_28 = arith.constant 127 : i32
      %404 = vector.broadcast %c127_i32_28 : i32 to vector<2x128xi32>
      %405 = arith.andi %403, %404 : vector<2x128xi32>
      %406 = vector.broadcast %c-128_i32 : i32 to vector<2x128xi32>
      %407 = arith.andi %403, %406 : vector<2x128xi32>
      %408 = tpu.bitcast %407 : vector<2x128xi32> -> vector<2x128xf32>
      %cst_29 = arith.constant 1.000000e+00 : f32
      %409 = vector.broadcast %cst_29 : f32 to vector<2x128xf32>
      %410 = arith.subf %408, %409 : vector<2x128xf32>
      %cst_30 = arith.constant 0.000000e+00 : f32
      %411 = vector.broadcast %cst_30 : f32 to vector<2x128xf32>
      %412 = arith.maximumf %410, %411 : vector<2x128xf32>
      %413 = arith.index_cast %4 : i32 to index
      %c4 = arith.constant 4 : index
      %c0_31 = arith.constant 0 : index
      %414 = vector.load %arg2[%413, %c4, %c0_31] : memref<4x16x128xf32, #tpu.memory_space<vmem>>, vector<1x2x128xf32>
      %415 = vector.shape_cast %414 : vector<1x2x128xf32> to vector<2x128xf32>
      %416 = vector.shape_cast %412 : vector<2x128xf32> to vector<1x2x128xf32>
      tpu.vector_store %arg2[%413, %c4, %c0_31], %416 {strides = array<i32>} : memref<4x16x128xf32, #tpu.memory_space<vmem>>, vector<1x2x128xf32>,
      %417 = arith.index_cast %4 : i32 to index
      %c4_32 = arith.constant 4 : index
      %c0_33 = arith.constant 0 : index
      %418 = vector.load %arg3[%417, %c4_32, %c0_33] : memref<4x16x128xi32, #tpu.memory_space<vmem>>, vector<1x2x128xi32>
      %419 = vector.shape_cast %418 : vector<1x2x128xi32> to vector<2x128xi32>
      %420 = vector.shape_cast %405 : vector<2x128xi32> to vector<1x2x128xi32>
      tpu.vector_store %arg3[%417, %c4_32, %c0_33], %420 {strides = array<i32>} : memref<4x16x128xi32, #tpu.memory_space<vmem>>, vector<1x2x128xi32>,
      %421 = vector.shape_cast %401 : vector<1x128xf32> to vector<1x128xf32>
      %422 = vector.broadcast %421 : vector<1x128xf32> to vector<8x128xf32>
      %423 = vector.broadcast %cst_0 : f32 to vector<8x128xf32>
      %424 = vector.broadcast %cst_0 : f32 to vector<8x128xf32>
      %425 = arith.cmpf ogt, %23, %422 : vector<8x128xf32>
      %426 = vector.broadcast %cst_0 : f32 to vector<8x128xf32>
      %427 = arith.select %425, %23, %426 : vector<8x128xi1>, vector<8x128xf32>
      %428 = arith.maximumf %423, %427 : vector<8x128xf32>
      %429 = arith.minimumf %428, %424 : vector<8x128xf32>
      %430 = arith.minimumf %423, %427 : vector<8x128xf32>
      %431 = arith.cmpf ogt, %24, %422 : vector<8x128xf32>
      %432 = vector.broadcast %cst_0 : f32 to vector<8x128xf32>
      %433 = arith.select %431, %24, %432 : vector<8x128xi1>, vector<8x128xf32>
      %434 = arith.maximumf %430, %433 : vector<8x128xf32>
      %435 = arith.minimumf %434, %429 : vector<8x128xf32>
      %436 = arith.minimumf %430, %433 : vector<8x128xf32>
      %437 = arith.cmpf ogt, %25, %422 : vector<8x128xf32>
      %438 = vector.broadcast %cst_0 : f32 to vector<8x128xf32>
      %439 = arith.select %437, %25, %438 : vector<8x128xi1>, vector<8x128xf32>
      %440 = arith.maximumf %436, %439 : vector<8x128xf32>
      %441 = arith.minimumf %440, %435 : vector<8x128xf32>
      %442 = arith.minimumf %436, %439 : vector<8x128xf32>
      %443 = arith.cmpf ogt, %26, %422 : vector<8x128xf32>
      %444 = vector.broadcast %cst_0 : f32 to vector<8x128xf32>
      %445 = arith.select %443, %26, %444 : vector<8x128xi1>, vector<8x128xf32>
      %446 = arith.maximumf %442, %445 : vector<8x128xf32>
      %447 = arith.minimumf %446, %441 : vector<8x128xf32>
      %448 = arith.minimumf %442, %445 : vector<8x128xf32>
      %449 = arith.cmpf ogt, %27, %422 : vector<8x128xf32>
      %450 = vector.broadcast %cst_0 : f32 to vector<8x128xf32>
      %451 = arith.select %449, %27, %450 : vector<8x128xi1>, vector<8x128xf32>
      %452 = arith.maximumf %448, %451 : vector<8x128xf32>
      %453 = arith.minimumf %452, %447 : vector<8x128xf32>
      %454 = arith.minimumf %448, %451 : vector<8x128xf32>
      %455 = arith.cmpf ogt, %28, %422 : vector<8x128xf32>
      %456 = vector.broadcast %cst_0 : f32 to vector<8x128xf32>
      %457 = arith.select %455, %28, %456 : vector<8x128xi1>, vector<8x128xf32>
      %458 = arith.maximumf %454, %457 : vector<8x128xf32>
      %459 = arith.minimumf %458, %453 : vector<8x128xf32>
      %460 = arith.minimumf %454, %457 : vector<8x128xf32>
      %461 = arith.cmpf ogt, %29, %422 : vector<8x128xf32>
      %462 = vector.broadcast %cst_0 : f32 to vector<8x128xf32>
      %463 = arith.select %461, %29, %462 : vector<8x128xi1>, vector<8x128xf32>
      %464 = arith.maximumf %460, %463 : vector<8x128xf32>
      %465 = arith.minimumf %464, %459 : vector<8x128xf32>
      %466 = arith.minimumf %460, %463 : vector<8x128xf32>
      %467 = arith.cmpf ogt, %30, %422 : vector<8x128xf32>
      %468 = vector.broadcast %cst_0 : f32 to vector<8x128xf32>
      %469 = arith.select %467, %30, %468 : vector<8x128xi1>, vector<8x128xf32>
      %470 = arith.maximumf %466, %469 : vector<8x128xf32>
      %471 = arith.minimumf %470, %465 : vector<8x128xf32>
      %472 = arith.minimumf %466, %469 : vector<8x128xf32>
      %473 = arith.cmpf ogt, %31, %422 : vector<8x128xf32>
      %474 = vector.broadcast %cst_0 : f32 to vector<8x128xf32>
      %475 = arith.select %473, %31, %474 : vector<8x128xi1>, vector<8x128xf32>
      %476 = arith.maximumf %472, %475 : vector<8x128xf32>
      %477 = arith.minimumf %476, %471 : vector<8x128xf32>
      %478 = arith.minimumf %472, %475 : vector<8x128xf32>
      %479 = arith.cmpf ogt, %32, %422 : vector<8x128xf32>
      %480 = vector.broadcast %cst_0 : f32 to vector<8x128xf32>
      %481 = arith.select %479, %32, %480 : vector<8x128xi1>, vector<8x128xf32>
      %482 = arith.maximumf %478, %481 : vector<8x128xf32>
      %483 = arith.minimumf %482, %477 : vector<8x128xf32>
      %484 = arith.minimumf %478, %481 : vector<8x128xf32>
      %485 = arith.cmpf ogt, %33, %422 : vector<8x128xf32>
      %486 = vector.broadcast %cst_0 : f32 to vector<8x128xf32>
      %487 = arith.select %485, %33, %486 : vector<8x128xi1>, vector<8x128xf32>
      %488 = arith.maximumf %484, %487 : vector<8x128xf32>
      %489 = arith.minimumf %488, %483 : vector<8x128xf32>
      %490 = arith.minimumf %484, %487 : vector<8x128xf32>
      %491 = arith.cmpf ogt, %34, %422 : vector<8x128xf32>
      %492 = vector.broadcast %cst_0 : f32 to vector<8x128xf32>
      %493 = arith.select %491, %34, %492 : vector<8x128xi1>, vector<8x128xf32>
      %494 = arith.maximumf %490, %493 : vector<8x128xf32>
      %495 = arith.minimumf %494, %489 : vector<8x128xf32>
      %496 = arith.minimumf %490, %493 : vector<8x128xf32>
      %497 = arith.cmpf ogt, %35, %422 : vector<8x128xf32>
      %498 = vector.broadcast %cst_0 : f32 to vector<8x128xf32>
      %499 = arith.select %497, %35, %498 : vector<8x128xi1>, vector<8x128xf32>
      %500 = arith.maximumf %496, %499 : vector<8x128xf32>
      %501 = arith.minimumf %500, %495 : vector<8x128xf32>
      %502 = arith.minimumf %496, %499 : vector<8x128xf32>
      %503 = arith.cmpf ogt, %36, %422 : vector<8x128xf32>
      %504 = vector.broadcast %cst_0 : f32 to vector<8x128xf32>
      %505 = arith.select %503, %36, %504 : vector<8x128xi1>, vector<8x128xf32>
      %506 = arith.maximumf %502, %505 : vector<8x128xf32>
      %507 = arith.minimumf %506, %501 : vector<8x128xf32>
      %508 = arith.minimumf %502, %505 : vector<8x128xf32>
      %509 = arith.cmpf ogt, %37, %422 : vector<8x128xf32>
      %510 = vector.broadcast %cst_0 : f32 to vector<8x128xf32>
      %511 = arith.select %509, %37, %510 : vector<8x128xi1>, vector<8x128xf32>
      %512 = arith.maximumf %508, %511 : vector<8x128xf32>
      %513 = arith.minimumf %512, %507 : vector<8x128xf32>
      %514 = arith.minimumf %508, %511 : vector<8x128xf32>
      %515 = arith.cmpf ogt, %38, %422 : vector<8x128xf32>
      %516 = vector.broadcast %cst_0 : f32 to vector<8x128xf32>
      %517 = arith.select %515, %38, %516 : vector<8x128xi1>, vector<8x128xf32>
      %518 = arith.maximumf %514, %517 : vector<8x128xf32>
      %519 = arith.minimumf %518, %513 : vector<8x128xf32>
      %520 = arith.minimumf %514, %517 : vector<8x128xf32>
      %cst_34 = arith.constant dense<0x7F800000> : vector<128xf32>
      %521 = vector.multi_reduction <minimumf>, %520, %cst_34 [0] : vector<8x128xf32> to vector<128xf32>
      %522 = vector.shape_cast %521 : vector<128xf32> to vector<1x128xf32>
      %523 = vector.shape_cast %522 : vector<1x128xf32> to vector<1x128xf32>
      %524 = vector.broadcast %523 : vector<1x128xf32> to vector<8x128xf32>
      %525 = arith.cmpf oeq, %520, %524 : vector<8x128xf32>
      %526 = arith.select %525, %519, %520 : vector<8x128xi1>, vector<8x128xf32>
      %cst_35 = arith.constant dense<0x7F800000> : vector<128xf32>
      %527 = vector.multi_reduction <minimumf>, %526, %cst_35 [0] : vector<8x128xf32> to vector<128xf32>
      %528 = vector.shape_cast %527 : vector<128xf32> to vector<1x128xf32>
      %529 = tpu.concatenate %522, %528 in 0 : vector<1x128xf32>, vector<1x128xf32> -> vector<2x128xf32>
      %530 = tpu.bitcast %529 : vector<2x128xf32> -> vector<2x128xi32>
      %c127_i32_36 = arith.constant 127 : i32
      %531 = vector.broadcast %c127_i32_36 : i32 to vector<2x128xi32>
      %532 = arith.andi %530, %531 : vector<2x128xi32>
      %533 = vector.broadcast %c-128_i32 : i32 to vector<2x128xi32>
      %534 = arith.andi %530, %533 : vector<2x128xi32>
      %535 = tpu.bitcast %534 : vector<2x128xi32> -> vector<2x128xf32>
      %cst_37 = arith.constant 1.000000e+00 : f32
      %536 = vector.broadcast %cst_37 : f32 to vector<2x128xf32>
      %537 = arith.subf %535, %536 : vector<2x128xf32>
      %cst_38 = arith.constant 0.000000e+00 : f32
      %538 = vector.broadcast %cst_38 : f32 to vector<2x128xf32>
      %539 = arith.maximumf %537, %538 : vector<2x128xf32>
      %540 = arith.index_cast %4 : i32 to index
      %c6 = arith.constant 6 : index
      %c0_39 = arith.constant 0 : index
      %541 = vector.load %arg2[%540, %c6, %c0_39] : memref<4x16x128xf32, #tpu.memory_space<vmem>>, vector<1x2x128xf32>
      %542 = vector.shape_cast %541 : vector<1x2x128xf32> to vector<2x128xf32>
      %543 = vector.shape_cast %539 : vector<2x128xf32> to vector<1x2x128xf32>
      tpu.vector_store %arg2[%540, %c6, %c0_39], %543 {strides = array<i32>} : memref<4x16x128xf32, #tpu.memory_space<vmem>>, vector<1x2x128xf32>,
      %544 = arith.index_cast %4 : i32 to index
      %c6_40 = arith.constant 6 : index
      %c0_41 = arith.constant 0 : index
      %545 = vector.load %arg3[%544, %c6_40, %c0_41] : memref<4x16x128xi32, #tpu.memory_space<vmem>>, vector<1x2x128xi32>
      %546 = vector.shape_cast %545 : vector<1x2x128xi32> to vector<2x128xi32>
      %547 = vector.shape_cast %532 : vector<2x128xi32> to vector<1x2x128xi32>
      tpu.vector_store %arg3[%544, %c6_40, %c0_41], %547 {strides = array<i32>} : memref<4x16x128xi32, #tpu.memory_space<vmem>>, vector<1x2x128xi32>,
      %548 = vector.shape_cast %528 : vector<1x128xf32> to vector<1x128xf32>
      %549 = vector.broadcast %548 : vector<1x128xf32> to vector<8x128xf32>
      %550 = vector.broadcast %cst_0 : f32 to vector<8x128xf32>
      %551 = vector.broadcast %cst_0 : f32 to vector<8x128xf32>
      %552 = arith.cmpf ogt, %23, %549 : vector<8x128xf32>
      %553 = vector.broadcast %cst_0 : f32 to vector<8x128xf32>
      %554 = arith.select %552, %23, %553 : vector<8x128xi1>, vector<8x128xf32>
      %555 = arith.maximumf %550, %554 : vector<8x128xf32>
      %556 = arith.minimumf %555, %551 : vector<8x128xf32>
      %557 = arith.minimumf %550, %554 : vector<8x128xf32>
      %558 = arith.cmpf ogt, %24, %549 : vector<8x128xf32>
      %559 = vector.broadcast %cst_0 : f32 to vector<8x128xf32>
      %560 = arith.select %558, %24, %559 : vector<8x128xi1>, vector<8x128xf32>
      %561 = arith.maximumf %557, %560 : vector<8x128xf32>
      %562 = arith.minimumf %561, %556 : vector<8x128xf32>
      %563 = arith.minimumf %557, %560 : vector<8x128xf32>
      %564 = arith.cmpf ogt, %25, %549 : vector<8x128xf32>
      %565 = vector.broadcast %cst_0 : f32 to vector<8x128xf32>
      %566 = arith.select %564, %25, %565 : vector<8x128xi1>, vector<8x128xf32>
      %567 = arith.maximumf %563, %566 : vector<8x128xf32>
      %568 = arith.minimumf %567, %562 : vector<8x128xf32>
      %569 = arith.minimumf %563, %566 : vector<8x128xf32>
      %570 = arith.cmpf ogt, %26, %549 : vector<8x128xf32>
      %571 = vector.broadcast %cst_0 : f32 to vector<8x128xf32>
      %572 = arith.select %570, %26, %571 : vector<8x128xi1>, vector<8x128xf32>
      %573 = arith.maximumf %569, %572 : vector<8x128xf32>
      %574 = arith.minimumf %573, %568 : vector<8x128xf32>
      %575 = arith.minimumf %569, %572 : vector<8x128xf32>
      %576 = arith.cmpf ogt, %27, %549 : vector<8x128xf32>
      %577 = vector.broadcast %cst_0 : f32 to vector<8x128xf32>
      %578 = arith.select %576, %27, %577 : vector<8x128xi1>, vector<8x128xf32>
      %579 = arith.maximumf %575, %578 : vector<8x128xf32>
      %580 = arith.minimumf %579, %574 : vector<8x128xf32>
      %581 = arith.minimumf %575, %578 : vector<8x128xf32>
      %582 = arith.cmpf ogt, %28, %549 : vector<8x128xf32>
      %583 = vector.broadcast %cst_0 : f32 to vector<8x128xf32>
      %584 = arith.select %582, %28, %583 : vector<8x128xi1>, vector<8x128xf32>
      %585 = arith.maximumf %581, %584 : vector<8x128xf32>
      %586 = arith.minimumf %585, %580 : vector<8x128xf32>
      %587 = arith.minimumf %581, %584 : vector<8x128xf32>
      %588 = arith.cmpf ogt, %29, %549 : vector<8x128xf32>
      %589 = vector.broadcast %cst_0 : f32 to vector<8x128xf32>
      %590 = arith.select %588, %29, %589 : vector<8x128xi1>, vector<8x128xf32>
      %591 = arith.maximumf %587, %590 : vector<8x128xf32>
      %592 = arith.minimumf %591, %586 : vector<8x128xf32>
      %593 = arith.minimumf %587, %590 : vector<8x128xf32>
      %594 = arith.cmpf ogt, %30, %549 : vector<8x128xf32>
      %595 = vector.broadcast %cst_0 : f32 to vector<8x128xf32>
      %596 = arith.select %594, %30, %595 : vector<8x128xi1>, vector<8x128xf32>
      %597 = arith.maximumf %593, %596 : vector<8x128xf32>
      %598 = arith.minimumf %597, %592 : vector<8x128xf32>
      %599 = arith.minimumf %593, %596 : vector<8x128xf32>
      %600 = arith.cmpf ogt, %31, %549 : vector<8x128xf32>
      %601 = vector.broadcast %cst_0 : f32 to vector<8x128xf32>
      %602 = arith.select %600, %31, %601 : vector<8x128xi1>, vector<8x128xf32>
      %603 = arith.maximumf %599, %602 : vector<8x128xf32>
      %604 = arith.minimumf %603, %598 : vector<8x128xf32>
      %605 = arith.minimumf %599, %602 : vector<8x128xf32>
      %606 = arith.cmpf ogt, %32, %549 : vector<8x128xf32>
      %607 = vector.broadcast %cst_0 : f32 to vector<8x128xf32>
      %608 = arith.select %606, %32, %607 : vector<8x128xi1>, vector<8x128xf32>
      %609 = arith.maximumf %605, %608 : vector<8x128xf32>
      %610 = arith.minimumf %609, %604 : vector<8x128xf32>
      %611 = arith.minimumf %605, %608 : vector<8x128xf32>
      %612 = arith.cmpf ogt, %33, %549 : vector<8x128xf32>
      %613 = vector.broadcast %cst_0 : f32 to vector<8x128xf32>
      %614 = arith.select %612, %33, %613 : vector<8x128xi1>, vector<8x128xf32>
      %615 = arith.maximumf %611, %614 : vector<8x128xf32>
      %616 = arith.minimumf %615, %610 : vector<8x128xf32>
      %617 = arith.minimumf %611, %614 : vector<8x128xf32>
      %618 = arith.cmpf ogt, %34, %549 : vector<8x128xf32>
      %619 = vector.broadcast %cst_0 : f32 to vector<8x128xf32>
      %620 = arith.select %618, %34, %619 : vector<8x128xi1>, vector<8x128xf32>
      %621 = arith.maximumf %617, %620 : vector<8x128xf32>
      %622 = arith.minimumf %621, %616 : vector<8x128xf32>
      %623 = arith.minimumf %617, %620 : vector<8x128xf32>
      %624 = arith.cmpf ogt, %35, %549 : vector<8x128xf32>
      %625 = vector.broadcast %cst_0 : f32 to vector<8x128xf32>
      %626 = arith.select %624, %35, %625 : vector<8x128xi1>, vector<8x128xf32>
      %627 = arith.maximumf %623, %626 : vector<8x128xf32>
      %628 = arith.minimumf %627, %622 : vector<8x128xf32>
      %629 = arith.minimumf %623, %626 : vector<8x128xf32>
      %630 = arith.cmpf ogt, %36, %549 : vector<8x128xf32>
      %631 = vector.broadcast %cst_0 : f32 to vector<8x128xf32>
      %632 = arith.select %630, %36, %631 : vector<8x128xi1>, vector<8x128xf32>
      %633 = arith.maximumf %629, %632 : vector<8x128xf32>
      %634 = arith.minimumf %633, %628 : vector<8x128xf32>
      %635 = arith.minimumf %629, %632 : vector<8x128xf32>
      %636 = arith.cmpf ogt, %37, %549 : vector<8x128xf32>
      %637 = vector.broadcast %cst_0 : f32 to vector<8x128xf32>
      %638 = arith.select %636, %37, %637 : vector<8x128xi1>, vector<8x128xf32>
      %639 = arith.maximumf %635, %638 : vector<8x128xf32>
      %640 = arith.minimumf %639, %634 : vector<8x128xf32>
      %641 = arith.minimumf %635, %638 : vector<8x128xf32>
      %642 = arith.cmpf ogt, %38, %549 : vector<8x128xf32>
      %643 = vector.broadcast %cst_0 : f32 to vector<8x128xf32>
      %644 = arith.select %642, %38, %643 : vector<8x128xi1>, vector<8x128xf32>
      %645 = arith.maximumf %641, %644 : vector<8x128xf32>
      %646 = arith.minimumf %645, %640 : vector<8x128xf32>
      %647 = arith.minimumf %641, %644 : vector<8x128xf32>
      %cst_42 = arith.constant dense<0x7F800000> : vector<128xf32>
      %648 = vector.multi_reduction <minimumf>, %647, %cst_42 [0] : vector<8x128xf32> to vector<128xf32>
      %649 = vector.shape_cast %648 : vector<128xf32> to vector<1x128xf32>
      %650 = vector.shape_cast %649 : vector<1x128xf32> to vector<1x128xf32>
      %651 = vector.broadcast %650 : vector<1x128xf32> to vector<8x128xf32>
      %652 = arith.cmpf oeq, %647, %651 : vector<8x128xf32>
      %653 = arith.select %652, %646, %647 : vector<8x128xi1>, vector<8x128xf32>
      %cst_43 = arith.constant dense<0x7F800000> : vector<128xf32>
      %654 = vector.multi_reduction <minimumf>, %653, %cst_43 [0] : vector<8x128xf32> to vector<128xf32>
      %655 = vector.shape_cast %654 : vector<128xf32> to vector<1x128xf32>
      %656 = tpu.concatenate %649, %655 in 0 : vector<1x128xf32>, vector<1x128xf32> -> vector<2x128xf32>
      %657 = tpu.bitcast %656 : vector<2x128xf32> -> vector<2x128xi32>
      %c127_i32_44 = arith.constant 127 : i32
      %658 = vector.broadcast %c127_i32_44 : i32 to vector<2x128xi32>
      %659 = arith.andi %657, %658 : vector<2x128xi32>
      %660 = vector.broadcast %c-128_i32 : i32 to vector<2x128xi32>
      %661 = arith.andi %657, %660 : vector<2x128xi32>
      %662 = tpu.bitcast %661 : vector<2x128xi32> -> vector<2x128xf32>
      %cst_45 = arith.constant 1.000000e+00 : f32
      %663 = vector.broadcast %cst_45 : f32 to vector<2x128xf32>
      %664 = arith.subf %662, %663 : vector<2x128xf32>
      %cst_46 = arith.constant 0.000000e+00 : f32
      %665 = vector.broadcast %cst_46 : f32 to vector<2x128xf32>
      %666 = arith.maximumf %664, %665 : vector<2x128xf32>
      %667 = arith.index_cast %4 : i32 to index
      %c8 = arith.constant 8 : index
      %c0_47 = arith.constant 0 : index
      %668 = vector.load %arg2[%667, %c8, %c0_47] : memref<4x16x128xf32, #tpu.memory_space<vmem>>, vector<1x2x128xf32>
      %669 = vector.shape_cast %668 : vector<1x2x128xf32> to vector<2x128xf32>
      %670 = vector.shape_cast %666 : vector<2x128xf32> to vector<1x2x128xf32>
      tpu.vector_store %arg2[%667, %c8, %c0_47], %670 {strides = array<i32>} : memref<4x16x128xf32, #tpu.memory_space<vmem>>, vector<1x2x128xf32>,
      %671 = arith.index_cast %4 : i32 to index
      %c8_48 = arith.constant 8 : index
      %c0_49 = arith.constant 0 : index
      %672 = vector.load %arg3[%671, %c8_48, %c0_49] : memref<4x16x128xi32, #tpu.memory_space<vmem>>, vector<1x2x128xi32>
      %673 = vector.shape_cast %672 : vector<1x2x128xi32> to vector<2x128xi32>
      %674 = vector.shape_cast %659 : vector<2x128xi32> to vector<1x2x128xi32>
      tpu.vector_store %arg3[%671, %c8_48, %c0_49], %674 {strides = array<i32>} : memref<4x16x128xi32, #tpu.memory_space<vmem>>, vector<1x2x128xi32>,
      %675 = vector.shape_cast %655 : vector<1x128xf32> to vector<1x128xf32>
      %676 = vector.broadcast %675 : vector<1x128xf32> to vector<8x128xf32>
      %677 = vector.broadcast %cst_0 : f32 to vector<8x128xf32>
      %678 = vector.broadcast %cst_0 : f32 to vector<8x128xf32>
      %679 = arith.cmpf ogt, %23, %676 : vector<8x128xf32>
      %680 = vector.broadcast %cst_0 : f32 to vector<8x128xf32>
      %681 = arith.select %679, %23, %680 : vector<8x128xi1>, vector<8x128xf32>
      %682 = arith.maximumf %677, %681 : vector<8x128xf32>
      %683 = arith.minimumf %682, %678 : vector<8x128xf32>
      %684 = arith.minimumf %677, %681 : vector<8x128xf32>
      %685 = arith.cmpf ogt, %24, %676 : vector<8x128xf32>
      %686 = vector.broadcast %cst_0 : f32 to vector<8x128xf32>
      %687 = arith.select %685, %24, %686 : vector<8x128xi1>, vector<8x128xf32>
      %688 = arith.maximumf %684, %687 : vector<8x128xf32>
      %689 = arith.minimumf %688, %683 : vector<8x128xf32>
      %690 = arith.minimumf %684, %687 : vector<8x128xf32>
      %691 = arith.cmpf ogt, %25, %676 : vector<8x128xf32>
      %692 = vector.broadcast %cst_0 : f32 to vector<8x128xf32>
      %693 = arith.select %691, %25, %692 : vector<8x128xi1>, vector<8x128xf32>
      %694 = arith.maximumf %690, %693 : vector<8x128xf32>
      %695 = arith.minimumf %694, %689 : vector<8x128xf32>
      %696 = arith.minimumf %690, %693 : vector<8x128xf32>
      %697 = arith.cmpf ogt, %26, %676 : vector<8x128xf32>
      %698 = vector.broadcast %cst_0 : f32 to vector<8x128xf32>
      %699 = arith.select %697, %26, %698 : vector<8x128xi1>, vector<8x128xf32>
      %700 = arith.maximumf %696, %699 : vector<8x128xf32>
      %701 = arith.minimumf %700, %695 : vector<8x128xf32>
      %702 = arith.minimumf %696, %699 : vector<8x128xf32>
      %703 = arith.cmpf ogt, %27, %676 : vector<8x128xf32>
      %704 = vector.broadcast %cst_0 : f32 to vector<8x128xf32>
      %705 = arith.select %703, %27, %704 : vector<8x128xi1>, vector<8x128xf32>
      %706 = arith.maximumf %702, %705 : vector<8x128xf32>
      %707 = arith.minimumf %706, %701 : vector<8x128xf32>
      %708 = arith.minimumf %702, %705 : vector<8x128xf32>
      %709 = arith.cmpf ogt, %28, %676 : vector<8x128xf32>
      %710 = vector.broadcast %cst_0 : f32 to vector<8x128xf32>
      %711 = arith.select %709, %28, %710 : vector<8x128xi1>, vector<8x128xf32>
      %712 = arith.maximumf %708, %711 : vector<8x128xf32>
      %713 = arith.minimumf %712, %707 : vector<8x128xf32>
      %714 = arith.minimumf %708, %711 : vector<8x128xf32>
      %715 = arith.cmpf ogt, %29, %676 : vector<8x128xf32>
      %716 = vector.broadcast %cst_0 : f32 to vector<8x128xf32>
      %717 = arith.select %715, %29, %716 : vector<8x128xi1>, vector<8x128xf32>
      %718 = arith.maximumf %714, %717 : vector<8x128xf32>
      %719 = arith.minimumf %718, %713 : vector<8x128xf32>
      %720 = arith.minimumf %714, %717 : vector<8x128xf32>
      %721 = arith.cmpf ogt, %30, %676 : vector<8x128xf32>
      %722 = vector.broadcast %cst_0 : f32 to vector<8x128xf32>
      %723 = arith.select %721, %30, %722 : vector<8x128xi1>, vector<8x128xf32>
      %724 = arith.maximumf %720, %723 : vector<8x128xf32>
      %725 = arith.minimumf %724, %719 : vector<8x128xf32>
      %726 = arith.minimumf %720, %723 : vector<8x128xf32>
      %727 = arith.cmpf ogt, %31, %676 : vector<8x128xf32>
      %728 = vector.broadcast %cst_0 : f32 to vector<8x128xf32>
      %729 = arith.select %727, %31, %728 : vector<8x128xi1>, vector<8x128xf32>
      %730 = arith.maximumf %726, %729 : vector<8x128xf32>
      %731 = arith.minimumf %730, %725 : vector<8x128xf32>
      %732 = arith.minimumf %726, %729 : vector<8x128xf32>
      %733 = arith.cmpf ogt, %32, %676 : vector<8x128xf32>
      %734 = vector.broadcast %cst_0 : f32 to vector<8x128xf32>
      %735 = arith.select %733, %32, %734 : vector<8x128xi1>, vector<8x128xf32>
      %736 = arith.maximumf %732, %735 : vector<8x128xf32>
      %737 = arith.minimumf %736, %731 : vector<8x128xf32>
      %738 = arith.minimumf %732, %735 : vector<8x128xf32>
      %739 = arith.cmpf ogt, %33, %676 : vector<8x128xf32>
      %740 = vector.broadcast %cst_0 : f32 to vector<8x128xf32>
      %741 = arith.select %739, %33, %740 : vector<8x128xi1>, vector<8x128xf32>
      %742 = arith.maximumf %738, %741 : vector<8x128xf32>
      %743 = arith.minimumf %742, %737 : vector<8x128xf32>
      %744 = arith.minimumf %738, %741 : vector<8x128xf32>
      %745 = arith.cmpf ogt, %34, %676 : vector<8x128xf32>
      %746 = vector.broadcast %cst_0 : f32 to vector<8x128xf32>
      %747 = arith.select %745, %34, %746 : vector<8x128xi1>, vector<8x128xf32>
      %748 = arith.maximumf %744, %747 : vector<8x128xf32>
      %749 = arith.minimumf %748, %743 : vector<8x128xf32>
      %750 = arith.minimumf %744, %747 : vector<8x128xf32>
      %751 = arith.cmpf ogt, %35, %676 : vector<8x128xf32>
      %752 = vector.broadcast %cst_0 : f32 to vector<8x128xf32>
      %753 = arith.select %751, %35, %752 : vector<8x128xi1>, vector<8x128xf32>
      %754 = arith.maximumf %750, %753 : vector<8x128xf32>
      %755 = arith.minimumf %754, %749 : vector<8x128xf32>
      %756 = arith.minimumf %750, %753 : vector<8x128xf32>
      %757 = arith.cmpf ogt, %36, %676 : vector<8x128xf32>
      %758 = vector.broadcast %cst_0 : f32 to vector<8x128xf32>
      %759 = arith.select %757, %36, %758 : vector<8x128xi1>, vector<8x128xf32>
      %760 = arith.maximumf %756, %759 : vector<8x128xf32>
      %761 = arith.minimumf %760, %755 : vector<8x128xf32>
      %762 = arith.minimumf %756, %759 : vector<8x128xf32>
      %763 = arith.cmpf ogt, %37, %676 : vector<8x128xf32>
      %764 = vector.broadcast %cst_0 : f32 to vector<8x128xf32>
      %765 = arith.select %763, %37, %764 : vector<8x128xi1>, vector<8x128xf32>
      %766 = arith.maximumf %762, %765 : vector<8x128xf32>
      %767 = arith.minimumf %766, %761 : vector<8x128xf32>
      %768 = arith.minimumf %762, %765 : vector<8x128xf32>
      %769 = arith.cmpf ogt, %38, %676 : vector<8x128xf32>
      %770 = vector.broadcast %cst_0 : f32 to vector<8x128xf32>
      %771 = arith.select %769, %38, %770 : vector<8x128xi1>, vector<8x128xf32>
      %772 = arith.maximumf %768, %771 : vector<8x128xf32>
      %773 = arith.minimumf %772, %767 : vector<8x128xf32>
      %774 = arith.minimumf %768, %771 : vector<8x128xf32>
      %cst_50 = arith.constant dense<0x7F800000> : vector<128xf32>
      %775 = vector.multi_reduction <minimumf>, %774, %cst_50 [0] : vector<8x128xf32> to vector<128xf32>
      %776 = vector.shape_cast %775 : vector<128xf32> to vector<1x128xf32>
      %777 = vector.shape_cast %776 : vector<1x128xf32> to vector<1x128xf32>
      %778 = vector.broadcast %777 : vector<1x128xf32> to vector<8x128xf32>
      %779 = arith.cmpf oeq, %774, %778 : vector<8x128xf32>
      %780 = arith.select %779, %773, %774 : vector<8x128xi1>, vector<8x128xf32>
      %cst_51 = arith.constant dense<0x7F800000> : vector<128xf32>
      %781 = vector.multi_reduction <minimumf>, %780, %cst_51 [0] : vector<8x128xf32> to vector<128xf32>
      %782 = vector.shape_cast %781 : vector<128xf32> to vector<1x128xf32>
      %783 = tpu.concatenate %776, %782 in 0 : vector<1x128xf32>, vector<1x128xf32> -> vector<2x128xf32>
      %784 = tpu.bitcast %783 : vector<2x128xf32> -> vector<2x128xi32>
      %c127_i32_52 = arith.constant 127 : i32
      %785 = vector.broadcast %c127_i32_52 : i32 to vector<2x128xi32>
      %786 = arith.andi %784, %785 : vector<2x128xi32>
      %787 = vector.broadcast %c-128_i32 : i32 to vector<2x128xi32>
      %788 = arith.andi %784, %787 : vector<2x128xi32>
      %789 = tpu.bitcast %788 : vector<2x128xi32> -> vector<2x128xf32>
      %cst_53 = arith.constant 1.000000e+00 : f32
      %790 = vector.broadcast %cst_53 : f32 to vector<2x128xf32>
      %791 = arith.subf %789, %790 : vector<2x128xf32>
      %cst_54 = arith.constant 0.000000e+00 : f32
      %792 = vector.broadcast %cst_54 : f32 to vector<2x128xf32>
      %793 = arith.maximumf %791, %792 : vector<2x128xf32>
      %794 = arith.index_cast %4 : i32 to index
      %c10 = arith.constant 10 : index
      %c0_55 = arith.constant 0 : index
      %795 = vector.load %arg2[%794, %c10, %c0_55] : memref<4x16x128xf32, #tpu.memory_space<vmem>>, vector<1x2x128xf32>
      %796 = vector.shape_cast %795 : vector<1x2x128xf32> to vector<2x128xf32>
      %797 = vector.shape_cast %793 : vector<2x128xf32> to vector<1x2x128xf32>
      tpu.vector_store %arg2[%794, %c10, %c0_55], %797 {strides = array<i32>} : memref<4x16x128xf32, #tpu.memory_space<vmem>>, vector<1x2x128xf32>,
      %798 = arith.index_cast %4 : i32 to index
      %c10_56 = arith.constant 10 : index
      %c0_57 = arith.constant 0 : index
      %799 = vector.load %arg3[%798, %c10_56, %c0_57] : memref<4x16x128xi32, #tpu.memory_space<vmem>>, vector<1x2x128xi32>
      %800 = vector.shape_cast %799 : vector<1x2x128xi32> to vector<2x128xi32>
      %801 = vector.shape_cast %786 : vector<2x128xi32> to vector<1x2x128xi32>
      tpu.vector_store %arg3[%798, %c10_56, %c0_57], %801 {strides = array<i32>} : memref<4x16x128xi32, #tpu.memory_space<vmem>>, vector<1x2x128xi32>,
      %802 = vector.shape_cast %782 : vector<1x128xf32> to vector<1x128xf32>
      %803 = vector.broadcast %802 : vector<1x128xf32> to vector<8x128xf32>
      %804 = vector.broadcast %cst_0 : f32 to vector<8x128xf32>
      %805 = vector.broadcast %cst_0 : f32 to vector<8x128xf32>
      %806 = arith.cmpf ogt, %23, %803 : vector<8x128xf32>
      %807 = vector.broadcast %cst_0 : f32 to vector<8x128xf32>
      %808 = arith.select %806, %23, %807 : vector<8x128xi1>, vector<8x128xf32>
      %809 = arith.maximumf %804, %808 : vector<8x128xf32>
      %810 = arith.minimumf %809, %805 : vector<8x128xf32>
      %811 = arith.minimumf %804, %808 : vector<8x128xf32>
      %812 = arith.cmpf ogt, %24, %803 : vector<8x128xf32>
      %813 = vector.broadcast %cst_0 : f32 to vector<8x128xf32>
      %814 = arith.select %812, %24, %813 : vector<8x128xi1>, vector<8x128xf32>
      %815 = arith.maximumf %811, %814 : vector<8x128xf32>
      %816 = arith.minimumf %815, %810 : vector<8x128xf32>
      %817 = arith.minimumf %811, %814 : vector<8x128xf32>
      %818 = arith.cmpf ogt, %25, %803 : vector<8x128xf32>
      %819 = vector.broadcast %cst_0 : f32 to vector<8x128xf32>
      %820 = arith.select %818, %25, %819 : vector<8x128xi1>, vector<8x128xf32>
      %821 = arith.maximumf %817, %820 : vector<8x128xf32>
      %822 = arith.minimumf %821, %816 : vector<8x128xf32>
      %823 = arith.minimumf %817, %820 : vector<8x128xf32>
      %824 = arith.cmpf ogt, %26, %803 : vector<8x128xf32>
      %825 = vector.broadcast %cst_0 : f32 to vector<8x128xf32>
      %826 = arith.select %824, %26, %825 : vector<8x128xi1>, vector<8x128xf32>
      %827 = arith.maximumf %823, %826 : vector<8x128xf32>
      %828 = arith.minimumf %827, %822 : vector<8x128xf32>
      %829 = arith.minimumf %823, %826 : vector<8x128xf32>
      %830 = arith.cmpf ogt, %27, %803 : vector<8x128xf32>
      %831 = vector.broadcast %cst_0 : f32 to vector<8x128xf32>
      %832 = arith.select %830, %27, %831 : vector<8x128xi1>, vector<8x128xf32>
      %833 = arith.maximumf %829, %832 : vector<8x128xf32>
      %834 = arith.minimumf %833, %828 : vector<8x128xf32>
      %835 = arith.minimumf %829, %832 : vector<8x128xf32>
      %836 = arith.cmpf ogt, %28, %803 : vector<8x128xf32>
      %837 = vector.broadcast %cst_0 : f32 to vector<8x128xf32>
      %838 = arith.select %836, %28, %837 : vector<8x128xi1>, vector<8x128xf32>
      %839 = arith.maximumf %835, %838 : vector<8x128xf32>
      %840 = arith.minimumf %839, %834 : vector<8x128xf32>
      %841 = arith.minimumf %835, %838 : vector<8x128xf32>
      %842 = arith.cmpf ogt, %29, %803 : vector<8x128xf32>
      %843 = vector.broadcast %cst_0 : f32 to vector<8x128xf32>
      %844 = arith.select %842, %29, %843 : vector<8x128xi1>, vector<8x128xf32>
      %845 = arith.maximumf %841, %844 : vector<8x128xf32>
      %846 = arith.minimumf %845, %840 : vector<8x128xf32>
      %847 = arith.minimumf %841, %844 : vector<8x128xf32>
      %848 = arith.cmpf ogt, %30, %803 : vector<8x128xf32>
      %849 = vector.broadcast %cst_0 : f32 to vector<8x128xf32>
      %850 = arith.select %848, %30, %849 : vector<8x128xi1>, vector<8x128xf32>
      %851 = arith.maximumf %847, %850 : vector<8x128xf32>
      %852 = arith.minimumf %851, %846 : vector<8x128xf32>
      %853 = arith.minimumf %847, %850 : vector<8x128xf32>
      %854 = arith.cmpf ogt, %31, %803 : vector<8x128xf32>
      %855 = vector.broadcast %cst_0 : f32 to vector<8x128xf32>
      %856 = arith.select %854, %31, %855 : vector<8x128xi1>, vector<8x128xf32>
      %857 = arith.maximumf %853, %856 : vector<8x128xf32>
      %858 = arith.minimumf %857, %852 : vector<8x128xf32>
      %859 = arith.minimumf %853, %856 : vector<8x128xf32>
      %860 = arith.cmpf ogt, %32, %803 : vector<8x128xf32>
      %861 = vector.broadcast %cst_0 : f32 to vector<8x128xf32>
      %862 = arith.select %860, %32, %861 : vector<8x128xi1>, vector<8x128xf32>
      %863 = arith.maximumf %859, %862 : vector<8x128xf32>
      %864 = arith.minimumf %863, %858 : vector<8x128xf32>
      %865 = arith.minimumf %859, %862 : vector<8x128xf32>
      %866 = arith.cmpf ogt, %33, %803 : vector<8x128xf32>
      %867 = vector.broadcast %cst_0 : f32 to vector<8x128xf32>
      %868 = arith.select %866, %33, %867 : vector<8x128xi1>, vector<8x128xf32>
      %869 = arith.maximumf %865, %868 : vector<8x128xf32>
      %870 = arith.minimumf %869, %864 : vector<8x128xf32>
      %871 = arith.minimumf %865, %868 : vector<8x128xf32>
      %872 = arith.cmpf ogt, %34, %803 : vector<8x128xf32>
      %873 = vector.broadcast %cst_0 : f32 to vector<8x128xf32>
      %874 = arith.select %872, %34, %873 : vector<8x128xi1>, vector<8x128xf32>
      %875 = arith.maximumf %871, %874 : vector<8x128xf32>
      %876 = arith.minimumf %875, %870 : vector<8x128xf32>
      %877 = arith.minimumf %871, %874 : vector<8x128xf32>
      %878 = arith.cmpf ogt, %35, %803 : vector<8x128xf32>
      %879 = vector.broadcast %cst_0 : f32 to vector<8x128xf32>
      %880 = arith.select %878, %35, %879 : vector<8x128xi1>, vector<8x128xf32>
      %881 = arith.maximumf %877, %880 : vector<8x128xf32>
      %882 = arith.minimumf %881, %876 : vector<8x128xf32>
      %883 = arith.minimumf %877, %880 : vector<8x128xf32>
      %884 = arith.cmpf ogt, %36, %803 : vector<8x128xf32>
      %885 = vector.broadcast %cst_0 : f32 to vector<8x128xf32>
      %886 = arith.select %884, %36, %885 : vector<8x128xi1>, vector<8x128xf32>
      %887 = arith.maximumf %883, %886 : vector<8x128xf32>
      %888 = arith.minimumf %887, %882 : vector<8x128xf32>
      %889 = arith.minimumf %883, %886 : vector<8x128xf32>
      %890 = arith.cmpf ogt, %37, %803 : vector<8x128xf32>
      %891 = vector.broadcast %cst_0 : f32 to vector<8x128xf32>
      %892 = arith.select %890, %37, %891 : vector<8x128xi1>, vector<8x128xf32>
      %893 = arith.maximumf %889, %892 : vector<8x128xf32>
      %894 = arith.minimumf %893, %888 : vector<8x128xf32>
      %895 = arith.minimumf %889, %892 : vector<8x128xf32>
      %896 = arith.cmpf ogt, %38, %803 : vector<8x128xf32>
      %897 = vector.broadcast %cst_0 : f32 to vector<8x128xf32>
      %898 = arith.select %896, %38, %897 : vector<8x128xi1>, vector<8x128xf32>
      %899 = arith.maximumf %895, %898 : vector<8x128xf32>
      %900 = arith.minimumf %899, %894 : vector<8x128xf32>
      %901 = arith.minimumf %895, %898 : vector<8x128xf32>
      %cst_58 = arith.constant dense<0x7F800000> : vector<128xf32>
      %902 = vector.multi_reduction <minimumf>, %901, %cst_58 [0] : vector<8x128xf32> to vector<128xf32>
      %903 = vector.shape_cast %902 : vector<128xf32> to vector<1x128xf32>
      %904 = vector.shape_cast %903 : vector<1x128xf32> to vector<1x128xf32>
      %905 = vector.broadcast %904 : vector<1x128xf32> to vector<8x128xf32>
      %906 = arith.cmpf oeq, %901, %905 : vector<8x128xf32>
      %907 = arith.select %906, %900, %901 : vector<8x128xi1>, vector<8x128xf32>
      %cst_59 = arith.constant dense<0x7F800000> : vector<128xf32>
      %908 = vector.multi_reduction <minimumf>, %907, %cst_59 [0] : vector<8x128xf32> to vector<128xf32>
      %909 = vector.shape_cast %908 : vector<128xf32> to vector<1x128xf32>
      %910 = tpu.concatenate %903, %909 in 0 : vector<1x128xf32>, vector<1x128xf32> -> vector<2x128xf32>
      %911 = tpu.bitcast %910 : vector<2x128xf32> -> vector<2x128xi32>
      %c127_i32_60 = arith.constant 127 : i32
      %912 = vector.broadcast %c127_i32_60 : i32 to vector<2x128xi32>
      %913 = arith.andi %911, %912 : vector<2x128xi32>
      %914 = vector.broadcast %c-128_i32 : i32 to vector<2x128xi32>
      %915 = arith.andi %911, %914 : vector<2x128xi32>
      %916 = tpu.bitcast %915 : vector<2x128xi32> -> vector<2x128xf32>
      %cst_61 = arith.constant 1.000000e+00 : f32
      %917 = vector.broadcast %cst_61 : f32 to vector<2x128xf32>
      %918 = arith.subf %916, %917 : vector<2x128xf32>
      %cst_62 = arith.constant 0.000000e+00 : f32
      %919 = vector.broadcast %cst_62 : f32 to vector<2x128xf32>
      %920 = arith.maximumf %918, %919 : vector<2x128xf32>
      %921 = arith.index_cast %4 : i32 to index
      %c12 = arith.constant 12 : index
      %c0_63 = arith.constant 0 : index
      %922 = vector.load %arg2[%921, %c12, %c0_63] : memref<4x16x128xf32, #tpu.memory_space<vmem>>, vector<1x2x128xf32>
      %923 = vector.shape_cast %922 : vector<1x2x128xf32> to vector<2x128xf32>
      %924 = vector.shape_cast %920 : vector<2x128xf32> to vector<1x2x128xf32>
      tpu.vector_store %arg2[%921, %c12, %c0_63], %924 {strides = array<i32>} : memref<4x16x128xf32, #tpu.memory_space<vmem>>, vector<1x2x128xf32>,
      %925 = arith.index_cast %4 : i32 to index
      %c12_64 = arith.constant 12 : index
      %c0_65 = arith.constant 0 : index
      %926 = vector.load %arg3[%925, %c12_64, %c0_65] : memref<4x16x128xi32, #tpu.memory_space<vmem>>, vector<1x2x128xi32>
      %927 = vector.shape_cast %926 : vector<1x2x128xi32> to vector<2x128xi32>
      %928 = vector.shape_cast %913 : vector<2x128xi32> to vector<1x2x128xi32>
      tpu.vector_store %arg3[%925, %c12_64, %c0_65], %928 {strides = array<i32>} : memref<4x16x128xi32, #tpu.memory_space<vmem>>, vector<1x2x128xi32>,
      %929 = vector.shape_cast %909 : vector<1x128xf32> to vector<1x128xf32>
      %930 = vector.broadcast %929 : vector<1x128xf32> to vector<8x128xf32>
      %931 = vector.broadcast %cst_0 : f32 to vector<8x128xf32>
      %932 = vector.broadcast %cst_0 : f32 to vector<8x128xf32>
      %933 = arith.cmpf ogt, %23, %930 : vector<8x128xf32>
      %934 = vector.broadcast %cst_0 : f32 to vector<8x128xf32>
      %935 = arith.select %933, %23, %934 : vector<8x128xi1>, vector<8x128xf32>
      %936 = arith.maximumf %931, %935 : vector<8x128xf32>
      %937 = arith.minimumf %936, %932 : vector<8x128xf32>
      %938 = arith.minimumf %931, %935 : vector<8x128xf32>
      %939 = arith.cmpf ogt, %24, %930 : vector<8x128xf32>
      %940 = vector.broadcast %cst_0 : f32 to vector<8x128xf32>
      %941 = arith.select %939, %24, %940 : vector<8x128xi1>, vector<8x128xf32>
      %942 = arith.maximumf %938, %941 : vector<8x128xf32>
      %943 = arith.minimumf %942, %937 : vector<8x128xf32>
      %944 = arith.minimumf %938, %941 : vector<8x128xf32>
      %945 = arith.cmpf ogt, %25, %930 : vector<8x128xf32>
      %946 = vector.broadcast %cst_0 : f32 to vector<8x128xf32>
      %947 = arith.select %945, %25, %946 : vector<8x128xi1>, vector<8x128xf32>
      %948 = arith.maximumf %944, %947 : vector<8x128xf32>
      %949 = arith.minimumf %948, %943 : vector<8x128xf32>
      %950 = arith.minimumf %944, %947 : vector<8x128xf32>
      %951 = arith.cmpf ogt, %26, %930 : vector<8x128xf32>
      %952 = vector.broadcast %cst_0 : f32 to vector<8x128xf32>
      %953 = arith.select %951, %26, %952 : vector<8x128xi1>, vector<8x128xf32>
      %954 = arith.maximumf %950, %953 : vector<8x128xf32>
      %955 = arith.minimumf %954, %949 : vector<8x128xf32>
      %956 = arith.minimumf %950, %953 : vector<8x128xf32>
      %957 = arith.cmpf ogt, %27, %930 : vector<8x128xf32>
      %958 = vector.broadcast %cst_0 : f32 to vector<8x128xf32>
      %959 = arith.select %957, %27, %958 : vector<8x128xi1>, vector<8x128xf32>
      %960 = arith.maximumf %956, %959 : vector<8x128xf32>
      %961 = arith.minimumf %960, %955 : vector<8x128xf32>
      %962 = arith.minimumf %956, %959 : vector<8x128xf32>
      %963 = arith.cmpf ogt, %28, %930 : vector<8x128xf32>
      %964 = vector.broadcast %cst_0 : f32 to vector<8x128xf32>
      %965 = arith.select %963, %28, %964 : vector<8x128xi1>, vector<8x128xf32>
      %966 = arith.maximumf %962, %965 : vector<8x128xf32>
      %967 = arith.minimumf %966, %961 : vector<8x128xf32>
      %968 = arith.minimumf %962, %965 : vector<8x128xf32>
      %969 = arith.cmpf ogt, %29, %930 : vector<8x128xf32>
      %970 = vector.broadcast %cst_0 : f32 to vector<8x128xf32>
      %971 = arith.select %969, %29, %970 : vector<8x128xi1>, vector<8x128xf32>
      %972 = arith.maximumf %968, %971 : vector<8x128xf32>
      %973 = arith.minimumf %972, %967 : vector<8x128xf32>
      %974 = arith.minimumf %968, %971 : vector<8x128xf32>
      %975 = arith.cmpf ogt, %30, %930 : vector<8x128xf32>
      %976 = vector.broadcast %cst_0 : f32 to vector<8x128xf32>
      %977 = arith.select %975, %30, %976 : vector<8x128xi1>, vector<8x128xf32>
      %978 = arith.maximumf %974, %977 : vector<8x128xf32>
      %979 = arith.minimumf %978, %973 : vector<8x128xf32>
      %980 = arith.minimumf %974, %977 : vector<8x128xf32>
      %981 = arith.cmpf ogt, %31, %930 : vector<8x128xf32>
      %982 = vector.broadcast %cst_0 : f32 to vector<8x128xf32>
      %983 = arith.select %981, %31, %982 : vector<8x128xi1>, vector<8x128xf32>
      %984 = arith.maximumf %980, %983 : vector<8x128xf32>
      %985 = arith.minimumf %984, %979 : vector<8x128xf32>
      %986 = arith.minimumf %980, %983 : vector<8x128xf32>
      %987 = arith.cmpf ogt, %32, %930 : vector<8x128xf32>
      %988 = vector.broadcast %cst_0 : f32 to vector<8x128xf32>
      %989 = arith.select %987, %32, %988 : vector<8x128xi1>, vector<8x128xf32>
      %990 = arith.maximumf %986, %989 : vector<8x128xf32>
      %991 = arith.minimumf %990, %985 : vector<8x128xf32>
      %992 = arith.minimumf %986, %989 : vector<8x128xf32>
      %993 = arith.cmpf ogt, %33, %930 : vector<8x128xf32>
      %994 = vector.broadcast %cst_0 : f32 to vector<8x128xf32>
      %995 = arith.select %993, %33, %994 : vector<8x128xi1>, vector<8x128xf32>
      %996 = arith.maximumf %992, %995 : vector<8x128xf32>
      %997 = arith.minimumf %996, %991 : vector<8x128xf32>
      %998 = arith.minimumf %992, %995 : vector<8x128xf32>
      %999 = arith.cmpf ogt, %34, %930 : vector<8x128xf32>
      %1000 = vector.broadcast %cst_0 : f32 to vector<8x128xf32>
      %1001 = arith.select %999, %34, %1000 : vector<8x128xi1>, vector<8x128xf32>
      %1002 = arith.maximumf %998, %1001 : vector<8x128xf32>
      %1003 = arith.minimumf %1002, %997 : vector<8x128xf32>
      %1004 = arith.minimumf %998, %1001 : vector<8x128xf32>
      %1005 = arith.cmpf ogt, %35, %930 : vector<8x128xf32>
      %1006 = vector.broadcast %cst_0 : f32 to vector<8x128xf32>
      %1007 = arith.select %1005, %35, %1006 : vector<8x128xi1>, vector<8x128xf32>
      %1008 = arith.maximumf %1004, %1007 : vector<8x128xf32>
      %1009 = arith.minimumf %1008, %1003 : vector<8x128xf32>
      %1010 = arith.minimumf %1004, %1007 : vector<8x128xf32>
      %1011 = arith.cmpf ogt, %36, %930 : vector<8x128xf32>
      %1012 = vector.broadcast %cst_0 : f32 to vector<8x128xf32>
      %1013 = arith.select %1011, %36, %1012 : vector<8x128xi1>, vector<8x128xf32>
      %1014 = arith.maximumf %1010, %1013 : vector<8x128xf32>
      %1015 = arith.minimumf %1014, %1009 : vector<8x128xf32>
      %1016 = arith.minimumf %1010, %1013 : vector<8x128xf32>
      %1017 = arith.cmpf ogt, %37, %930 : vector<8x128xf32>
      %1018 = vector.broadcast %cst_0 : f32 to vector<8x128xf32>
      %1019 = arith.select %1017, %37, %1018 : vector<8x128xi1>, vector<8x128xf32>
      %1020 = arith.maximumf %1016, %1019 : vector<8x128xf32>
      %1021 = arith.minimumf %1020, %1015 : vector<8x128xf32>
      %1022 = arith.minimumf %1016, %1019 : vector<8x128xf32>
      %1023 = arith.cmpf ogt, %38, %930 : vector<8x128xf32>
      %1024 = vector.broadcast %cst_0 : f32 to vector<8x128xf32>
      %1025 = arith.select %1023, %38, %1024 : vector<8x128xi1>, vector<8x128xf32>
      %1026 = arith.maximumf %1022, %1025 : vector<8x128xf32>
      %1027 = arith.minimumf %1026, %1021 : vector<8x128xf32>
      %1028 = arith.minimumf %1022, %1025 : vector<8x128xf32>
      %cst_66 = arith.constant dense<0x7F800000> : vector<128xf32>
      %1029 = vector.multi_reduction <minimumf>, %1028, %cst_66 [0] : vector<8x128xf32> to vector<128xf32>
      %1030 = vector.shape_cast %1029 : vector<128xf32> to vector<1x128xf32>
      %1031 = vector.shape_cast %1030 : vector<1x128xf32> to vector<1x128xf32>
      %1032 = vector.broadcast %1031 : vector<1x128xf32> to vector<8x128xf32>
      %1033 = arith.cmpf oeq, %1028, %1032 : vector<8x128xf32>
      %1034 = arith.select %1033, %1027, %1028 : vector<8x128xi1>, vector<8x128xf32>
      %cst_67 = arith.constant dense<0x7F800000> : vector<128xf32>
      %1035 = vector.multi_reduction <minimumf>, %1034, %cst_67 [0] : vector<8x128xf32> to vector<128xf32>
      %1036 = vector.shape_cast %1035 : vector<128xf32> to vector<1x128xf32>
      %1037 = tpu.concatenate %1030, %1036 in 0 : vector<1x128xf32>, vector<1x128xf32> -> vector<2x128xf32>
      %1038 = tpu.bitcast %1037 : vector<2x128xf32> -> vector<2x128xi32>
      %c127_i32_68 = arith.constant 127 : i32
      %1039 = vector.broadcast %c127_i32_68 : i32 to vector<2x128xi32>
      %1040 = arith.andi %1038, %1039 : vector<2x128xi32>
      %1041 = vector.broadcast %c-128_i32 : i32 to vector<2x128xi32>
      %1042 = arith.andi %1038, %1041 : vector<2x128xi32>
      %1043 = tpu.bitcast %1042 : vector<2x128xi32> -> vector<2x128xf32>
      %cst_69 = arith.constant 1.000000e+00 : f32
      %1044 = vector.broadcast %cst_69 : f32 to vector<2x128xf32>
      %1045 = arith.subf %1043, %1044 : vector<2x128xf32>
      %cst_70 = arith.constant 0.000000e+00 : f32
      %1046 = vector.broadcast %cst_70 : f32 to vector<2x128xf32>
      %1047 = arith.maximumf %1045, %1046 : vector<2x128xf32>
      %1048 = arith.index_cast %4 : i32 to index
      %c14 = arith.constant 14 : index
      %c0_71 = arith.constant 0 : index
      %1049 = vector.load %arg2[%1048, %c14, %c0_71] : memref<4x16x128xf32, #tpu.memory_space<vmem>>, vector<1x2x128xf32>
      %1050 = vector.shape_cast %1049 : vector<1x2x128xf32> to vector<2x128xf32>
      %1051 = vector.shape_cast %1047 : vector<2x128xf32> to vector<1x2x128xf32>
      tpu.vector_store %arg2[%1048, %c14, %c0_71], %1051 {strides = array<i32>} : memref<4x16x128xf32, #tpu.memory_space<vmem>>, vector<1x2x128xf32>,
      %1052 = arith.index_cast %4 : i32 to index
      %c14_72 = arith.constant 14 : index
      %c0_73 = arith.constant 0 : index
      %1053 = vector.load %arg3[%1052, %c14_72, %c0_73] : memref<4x16x128xi32, #tpu.memory_space<vmem>>, vector<1x2x128xi32>
      %1054 = vector.shape_cast %1053 : vector<1x2x128xi32> to vector<2x128xi32>
      %1055 = vector.shape_cast %1040 : vector<2x128xi32> to vector<1x2x128xi32>
      tpu.vector_store %arg3[%1052, %c14_72, %c0_73], %1055 {strides = array<i32>} : memref<4x16x128xi32, #tpu.memory_space<vmem>>, vector<1x2x128xi32>,
    }
    %c4_i32_1 = arith.constant 4 : i32
    return
  }
  func.func @transform_0(%arg0: i32) -> (i32, i32, i32) {
    %c0_i32 = arith.constant 0 : i32
    %c0_i32_0 = arith.constant 0 : i32
    %c0_i32_1 = arith.constant 0 : i32
    return %arg0, %c0_i32, %c0_i32_0 : i32, i32, i32
  }
  func.func @transform_1(%arg0: i32) -> (i32, i32, i32) {
    %c0_i32 = arith.constant 0 : i32
    %c0_i32_0 = arith.constant 0 : i32
    %c0_i32_1 = arith.constant 0 : i32
    return %arg0, %c0_i32, %c0_i32_0 : i32, i32, i32
  }
  func.func @transform_2(%arg0: i32) -> (i32, i32, i32) {
    %c0_i32 = arith.constant 0 : i32
    %c0_i32_0 = arith.constant 0 : i32
    %c0_i32_1 = arith.constant 0 : i32
    return %arg0, %c0_i32, %c0_i32_0 : i32, i32, i32
  }
}

</mosaic_0001>

<bundles_post_ra>
// kernel: knn_pallas.1
= control target key start
LH: loop header
LB: loop body
LE: loop exit
PB: predicated region body
PF: predicated region fallthrough
CT: control target
= control target key end

     0   :  { %8 = vsyncpa [#allocation3], 0  ;;  %s2997_s0 = inlined_call_operand.vmem [shape: f32[8,128,3], index: 0, kind: input, shape index: {}]   ;;  %s2998_s1 = inlined_call_operand.hbm [shape: f32[8,16,128], index: 1, kind: output, shape index: {0}]   ;;  %s2999_s2 = inlined_call_operand.hbm [shape: s32[8,16,128], index: 2, kind: output, shape index: {1}]  }
   0x1   :  { %10 = vsyncpa [#allocation3 + $0x1], 0 }
   0x2   :  { %11 = vsyncpa [#allocation5], 0 }
   0x3   :  { %13 = vsyncpa [#allocation5 + $0x1], 0  ;;  %s1998_s9 = smov 0   ;;  %s2000_s10 = smov 0  }
   0x4   :  { %s2002_s11 = smov 0   ;;  %s2004_s12 = smov 0  }
   0x5 LB: > { %s2019_s13 = sadd.s32 4294967295, %s1973_s12   ;;  %s1639_s14 = sadd.s32 4294967294, %s1973_s12   ;;  %s1973_s12 = sphi %s2004_s12, %s3005_s12   ;;  %s1969_s11 = sphi %s2002_s11, %s3004_s11   ;;  %s1965_s10 = sphi %s2000_s10, %s3003_s10   ;;  %s1961_s9 = sphi %s1998_s9, %s3002_s9  }
   0x6   : > { %s2023_s15 = sadd.s32 1, %s1973_s12   ;;  %s52_s16 = sadd.s32 1, %s1969_s11 }
   0x7   : > { %s49_s17 = ssub.s32 %s1973_s12, %s2023_s15  ;;  %p62_p0 = scmp.ne.s32.totalorder %s1969_s11, %s1965_s10 }
   0x8   : > { %p50_p1 = scmp.eq.s32.totalorder %s49_s17, 0  ;;  %p63_p2 = scmp.eq.s32.totalorder %s2019_s13, 1 }
   0x9   : > { %p68_p3 = scmp.ne.s32.totalorder %s1965_s10, %s1961_s9  ;;  %p69_p4 = scmp.eq.s32.totalorder %s1639_s14, 1 }
   0xa   : > { %s2034_s18 = scalar_select %p50_p1, %s1969_s11, %s52_s16  }
   0xb   : > { %p2036_p5 = por %p63_p2, %p62_p0  ;;  %p2040_p6 = por %p69_p4, %p68_p3 }
   0xc   : > { %p1642_p7 = scmp.ge.s32.totalorder %s1973_s12, 1  ;;  %p123_p8 = scmp.lt.s32.totalorder %s1973_s12, 3 }
   0xe   : > { %p124_p9 = pnand %p1642_p7, %p123_p8 }
   0xf   : > { %s2047_s21 = sand.u32 (!%p124_p9), 1, %s1965_s10   ;;  %s1645_s22 = sshll.u32 (!%p124_p9), %s2019_s13, 2 }
  0x10   : > { %127 = sbr.rel (%p124_p9) target bundleno = 964 (0x3c4), region = 24  ;;  %s1643_s23 = sshll.u32 (!%p124_p9), %s2047_s21, 6 }
  0x11   : > { %p152_p10 = scmp.lt.s32.totalorder (!%p124_p9), %s1645_s22, 7  ;;  %s2103_s28 = scalar_lea.vmem (!%p124_p9), [#allocation2], %s1643_s23 }
  0x12   : > { %s2105_s29 = scalar_lea.vmem (!%p124_p9), [#allocation4], %s1643_s23  ;;  %s2107_s30 = smov (!%p124_p9), 0  }
  0x15   : > { %v160_v0 = vlaneseq  ;;  %s3007_s22 = smov (!%p152_p10, %s1645_s22), 7 }
  0x16   : > { %s1700_s24 = sshll.u32 %s3007_s22, 7 }
  0x17   : > { %v2051_v1 = vshrl.u32 %v160_v0, 7  ;;  %s2080_s27 = scalar_lea.vmem %s2997_s0, %s1700_s24 }
  0x19   : > { %v2054_v2 = vadd.s32 8, %v2051_v1  ;;  %v2057_v3 = vadd.s32 16, %v2051_v1  ;;  %v2060_v4 = vadd.s32 24, %v2051_v1  ;;  %v2063_v5 = vadd.s32 32, %v2051_v1 }
  0x1a   : > { %v2066_v6 = vadd.s32 40, %v2051_v1  ;;  %v2069_v7 = vadd.s32 48, %v2051_v1  ;;  %v2072_v8 = vadd.s32 56, %v2051_v1  ;;  %v2075_v9 = vadd.s32 64, %v2051_v1 }
  0x1b   : > { %v2083_v10 = vadd.s32 72, %v2051_v1  ;;  %v2086_v11 = vadd.s32 80, %v2051_v1  ;;  %v2089_v12 = vadd.s32 88, %v2051_v1  ;;  %v2092_v13 = vadd.s32 96, %v2051_v1 }
  0x1c   : > { %v2095_v14 = vadd.s32 104, %v2051_v1  ;;  %v2098_v15 = vadd.s32 112, %v2051_v1  ;;  %v2101_v16 = vadd.s32 120, %v2051_v1 }
  0x1d LB: >> { %s1648_s3 = sshll.u32 %s1977_s30, 7  ;;  %vm217_vm0 = vcmask 23552   ;;  %vm282_vm1 = vcmask 31744   ;;  %vm363_vm2 = vcmask 39936   ;;  %s1682_s5 = sshll.u32 %s1977_s30, 4  ;;  %s1977_s30 = sphi %s2107_s30, %s182_s30  }
  0x1e   : >> { %s2114_s4 = scalar_lea.vmem %s2080_s27, %s1648_s3  ;;  %s2522_s6 = scalar_lea.vmem %s2105_s29, %s1682_s5 [#allocation4] }
  0x1f   : >> { %v2117_v17 = vld [vmem:[%s2114_s4 + $0x78] sm:$0xff]  ;;  %v2120_v18 = vld [vmem:[%s2114_s4 + $0x70] sm:$0xff]  ;;  %v2123_v19 = vld [vmem:[%s2114_s4 + $0x68] sm:$0xff]  ;;  %s2536_s7 = scalar_lea.vmem %s2103_s28, %s1682_s5 [#allocation2]  ;;  %s182_s30 = sadd.s32 1, %s1977_s30  }
  0x20   : >> { %v216_v20 = vmul.f32 %v2117_v17, %v2117_v17  ;;  %v215_v21 = vmul.f32 %v2120_v18, %v2120_v18  ;;  %v2130_v22 = vld [vmem:[%s2114_s4 + $0x60] sm:$0xff]  ;;  %v214_v23 = vmul.f32 %v2123_v19, %v2123_v19  ;;  %v2137_v25 = vld [vmem:[%s2114_s4 + $0x58] sm:$0xff]  ;;  %v2141_v27 = vld [vmem:[%s2114_s4 + $0x50] sm:$0xff]  ;;  %p179_p11 = scmp.ge.s32.totalorder %s182_s30, 4  }
  0x21   : >> { %v213_v24 = vmul.f32 %v2130_v22, %v2130_v22  ;;  %v212_v30 = vmul.f32 %v2137_v25, %v2137_v25  ;;  %v211_v32 = vmul.f32 %v2141_v27, %v2141_v27  ;;  %v2151_v33 = vld [vmem:[%s2114_s4 + $0x48] sm:$0xff]  ;;  %v2154_v34 = vld [vmem:[%s2114_s4 + $0x40] sm:$0xff]  ;;  %v2163_v39 = vld [vmem:[%s2114_s4 + $0x38] sm:$0xff]  ;;  %s1702_s8 = sshll.u32 (%p179_p11), %s2019_s13, 10  ;;  %s1517_s22 = sshll.u32 (%p179_p11), %s2103_s28, 4  ;;  %s2918_s22 = int_to_ptr.vmem [resolvable:$true] %s1517_s22 }
  0x22   : >> { %v263_v26 = vsel %vm217_vm0, %v216_v20, 0.0  ;;  %v257_v28 = vsel %vm217_vm0, %v214_v23, 0.0  ;;  %v260_v29 = vsel %vm217_vm0, %v215_v21, 0.0  ;;  %v210_v36 = vmul.f32 %v2151_v33, %v2151_v33  ;;  %v2166_v40 = vld [vmem:[%s2114_s4 + $0x30] sm:$0xff]  ;;  %v2175_v45 = vld [vmem:[%s2114_s4 + $0x28] sm:$0xff]  ;;  %v2178_v46 = vld [vmem:[%s2114_s4 + $0x20] sm:$0xff]  ;;  %s2915_s17 = scalar_lea.hbm (%p179_p11), %s2998_s1, %s1702_s8 }
  0x23   : >> { %264 = vadd.xlane.f32.xlu0 %v263_v26  ;;  %258 = vadd.xlane.f32.xlu1 %v257_v28  ;;  %v254_v31 = vsel %vm217_vm0, %v213_v24, 0.0  ;;  %v251_v35 = vsel %vm217_vm0, %v212_v30, 0.0  ;;  %v248_v37 = vsel %vm217_vm0, %v211_v32, 0.0  ;;  %v209_v38 = vmul.f32 %v2154_v34, %v2154_v34  ;;  %v2187_v51 = vld [vmem:[%s2114_s4 + $0x18] sm:$0xff]  ;;  %v2190_v52 = vld [vmem:[%s2114_s4 + $0x10] sm:$0xff]  ;;  %v2199_v57 = vld [vmem:[%s2114_s4 + $0x8] sm:$0xff] }
  0x24   : >> { %v245_v41 = vsel %vm217_vm0, %v210_v36, 0.0  ;;  %v208_v42 = vmul.f32 %v2163_v39, %v2163_v39  ;;  %v207_v44 = vmul.f32 %v2166_v40, %v2166_v40  ;;  %v206_v48 = vmul.f32 %v2175_v45, %v2175_v45  ;;  %v2202_v58 = vld [vmem:[%s2114_s4] sm:$0xff]  ;;  %s1498_s23 = scalar_lea.sflag (%p179_p11), [#allocation3], %s2047_s21  ;;  %s1879_s24 = scalar_lea.vmem (%p179_p11), %s2918_s22, 1024 }
  0x25   : >> { %v242_v43 = vsel %vm217_vm0, %v209_v38, 0.0  ;;  %v205_v50 = vmul.f32 %v2178_v46, %v2178_v46  ;;  %v204_v54 = vmul.f32 %v2187_v51, %v2187_v51  ;;  %v203_v56 = vmul.f32 %v2190_v52, %v2190_v52  ;;  %p1880_p12 = scmp.ne.s32.totalorder (%p179_p11), %s2918_s22, %s1879_s24  ;;  %s1979_s25 = smov (%p179_p11), [#allocation2]  }
  0x26   : >> { %v239_v47 = vsel %vm217_vm0, %v208_v42, 0.0  ;;  %v236_v49 = vsel %vm217_vm0, %v207_v44, 0.0  ;;  %v233_v53 = vsel %vm217_vm0, %v206_v48, 0.0  ;;  %v202_v60 = vmul.f32 %v2199_v57, %v2199_v57  ;;  %s1883_s26 = sshll.u32 (%p179_p11), %s1979_s25, 4  ;;  %s1884_s26 = int_to_ptr.vmem [resolvable:$false] %s1883_s26 }
  0x27   : >> { %261 = vadd.xlane.f32.xlu0 %v260_v29  ;;  %255 = vadd.xlane.f32.xlu1 %v254_v31  ;;  %v230_v55 = vsel %vm217_vm0, %v205_v50, 0.0  ;;  %v227_v59 = vsel %vm217_vm0, %v204_v54, 0.0  ;;  %v224_v61 = vsel %vm217_vm0, %v203_v56, 0.0  ;;  %v201_v62 = vmul.f32 %v2202_v58, %v2202_v58  ;;  %p1881_p13 = pnand (%p179_p11), %p1880_p12, %p2036_p5  ;;  %s1885_s27 = scalar_lea.vmem (%p179_p11), %s1884_s26, 2048 }
  0x28   : >> { %v221_v63 = vsel %vm217_vm0, %v202_v60, 0.0  ;;  %v314_v20 = vmul.f32 -2.0, %v2117_v17  ;;  %v313_v21 = vmul.f32 -2.0, %v2120_v18  ;;  %v312_v23 = vmul.f32 -2.0, %v2123_v19  ;;  %p1886_p1 = scmp.lt.s32.totalorder (%p179_p11), %s2918_s22, %s1884_s26  ;;  %p1887_p2 = scmp.lt.s32.totalorder (%p179_p11), %s1885_s27, %s1879_s24 }
  0x29   : >> { %v218_v0 = vsel %vm217_vm0, %v201_v62, 0.0  ;;  %v311_v38 = vmul.f32 -2.0, %v2130_v22  ;;  %v310_v54 = vmul.f32 -2.0, %v2137_v25  ;;  %p1882_p0 = pneg (%p179_p11), %p1881_p13 }
  0x2a   : >> { %v346_v26 = vsel %vm217_vm0, %v314_v20, 1.0  ;;  %v344_v42 = vsel %vm217_vm0, %v312_v23, 1.0  ;;  %p1888_p3 = por (%p179_p11), %p1887_p2, %p1886_p1 }
  0x2b   : >> { %252 = vadd.xlane.f32.xlu0 %v251_v35  ;;  %249 = vadd.xlane.f32.xlu1 %v248_v37  ;;  %v342_v62 = vsel %vm217_vm0, %v310_v54, 1.0 }
  0x2c   : > { %p1889_p4 = pnand (%p179_p11), %p1888_p3, %p1882_p0 }
  0x2f   : >> { %246 = vadd.xlane.f32.xlu0 %v245_v41  ;;  %243 = vadd.xlane.f32.xlu1 %v242_v43  ;;  %v345_v41 = vsel %vm217_vm0, %v313_v21, 1.0 }
  0x33   : >> { %240 = vadd.xlane.f32.xlu0 %v239_v47  ;;  %237 = vadd.xlane.f32.xlu1 %v236_v49 }
  0x37   : >> { %234 = vadd.xlane.f32.xlu0 %v233_v53  ;;  %231 = vadd.xlane.f32.xlu1 %v230_v55  ;;  %v343_v55 = vsel %vm217_vm0, %v311_v38, 1.0 }
  0x3b   : >> { %228 = vadd.xlane.f32.xlu0 %v227_v59  ;;  %225 = vadd.xlane.f32.xlu1 %v224_v61  ;;  %v309_v61 = vmul.f32 -2.0, %v2141_v27 }
  0x3f   : >> { %222 = vadd.xlane.f32.xlu0 %v221_v63  ;;  %219 = vadd.xlane.f32.xlu1 %v218_v0 }
  0xac   : >> { %v265_v24 = vpop.xlane.xlu0 %264  ;;  %v259_v30 = vpop.xlane.xlu1 %258 }
  0xad   : >> { %v281_v28 = vsel %vm217_vm0, %v2117_v17, %v265_v24  ;;  %v330_v29 = vadd.f32 1.0, %v265_v24  ;;  %v279_v32 = vsel %vm217_vm0, %v2123_v19, %v259_v30  ;;  %v328_v37 = vadd.f32 1.0, %v259_v30 }
  0xae   : >> { %v2219_v31 = vsel %vm282_vm1, %v281_v28, 1.0  ;;  %v2225_v36 = vsel %vm282_vm1, %v279_v32, 1.0  ;;  %v308_v24 = vmul.f32 -2.0, %v2151_v33 }
  0xaf   : >> { %v362_v35 = vsel %vm282_vm1, %v346_v26, %v330_v29  ;;  %v360_v50 = vsel %vm282_vm1, %v344_v42, %v328_v37  ;;  %v341_v26 = vsel %vm217_vm0, %v309_v61, 1.0  ;;  %v306_v42 = vmul.f32 -2.0, %v2163_v39 }
  0xb0   : >> { %1737 = vmatprep.subr.msk.mxu0 %vm363_vm2, %v362_v35  ;;  %1793 = vmatprep.subr.msk.mxu1 %vm363_vm2, %v362_v35  ;;  %v262_v17 = vpop.xlane.xlu0 %261  ;;  %v256_v44 = vpop.xlane.xlu1 %255  ;;  %v340_v37 = vsel %vm217_vm0, %v308_v24, 1.0  ;;  %v304_v61 = vmul.f32 -2.0, %v2175_v45 }
  0xb1   : >> { %v280_v19 = vsel %vm217_vm0, %v2120_v18, %v262_v17  ;;  %v329_v43 = vadd.f32 1.0, %v262_v17  ;;  %1738 = vmatpush3.xpose.msk.msra.mxu0 %vm363_vm2, %v362_v35  ;;  %1809 = vmatpush3.xpose.msk.msra.mxu1 %vm363_vm2, %v362_v35  ;;  %v278_v48 = vsel %vm217_vm0, %v2130_v22, %v256_v44  ;;  %v327_v18 = vadd.f32 1.0, %v256_v44 }
  0xb2   : >> { %v2237_v47 = vsel %vm282_vm1, %v280_v19, 1.0  ;;  %v2244_v53 = vsel %vm282_vm1, %v278_v48, 1.0  ;;  %v307_v35 = vmul.f32 -2.0, %v2154_v34 }
  0xb3   : >> { %v361_v49 = vsel %vm282_vm1, %v345_v41, %v329_v43  ;;  %v359_v59 = vsel %vm282_vm1, %v343_v55, %v327_v18 }
  0xb4   : >> { %1739 = vmatprep.subr.msk.mxu0 %vm363_vm2, %v361_v49  ;;  %1794 = vmatprep.subr.msk.mxu1 %vm363_vm2, %v361_v49  ;;  %v2250_v56 = vpop.xlane.xlu0 %252  ;;  %v2254_v22 = vpop.xlane.xlu1 %249  ;;  %v339_v19 = vsel %vm217_vm0, %v307_v35, 1.0 }
  0xb5   : >> { %1740 = vmatpush3.xpose.msk.msra.mxu0 %vm363_vm2, %v361_v49  ;;  %1810 = vmatpush3.xpose.msk.msra.mxu1 %vm363_vm2, %v361_v49  ;;  %v326_v60 = vadd.f32 1.0, %v2250_v56  ;;  %v325_v21 = vadd.f32 1.0, %v2254_v22  ;;  %v305_v49 = vmul.f32 -2.0, %v2166_v40 }
  0xb6   : >> { %1741 = vmatprep.subr.msk.mxu0 %vm363_vm2, %v360_v50  ;;  %1795 = vmatprep.subr.msk.mxu1 %vm363_vm2, %v360_v50 }
  0xb7   : >> { %v358_v20 = vsel %vm282_vm1, %v342_v62, %v326_v60  ;;  %v357_v30 = vsel %vm282_vm1, %v341_v26, %v325_v21  ;;  %v337_v62 = vsel %vm217_vm0, %v305_v49, 1.0  ;;  %v303_v21 = vmul.f32 -2.0, %v2178_v46 }
  0xb8   : >> { %v244_v63 = vpop.xlane.xlu1 %243  ;;  %v2273_v28 = vpop.xlane.xlu0 %246 }
  0xb9   : >> { %1742 = vmatpush3.xpose.msk.msra.mxu0 %vm363_vm2, %v360_v50  ;;  %1811 = vmatpush3.xpose.msk.msra.mxu1 %vm363_vm2, %v360_v50  ;;  %v274_v0 = vsel %vm217_vm0, %v2154_v34, %v244_v63  ;;  %v324_v32 = vadd.f32 1.0, %v2273_v28  ;;  %v323_v41 = vadd.f32 1.0, %v244_v63  ;;  %v338_v50 = vsel %vm217_vm0, %v306_v42, 1.0 }
  0xba   : >> { %1743 = vmatprep.subr.msk.mxu0 %vm363_vm2, %v359_v59  ;;  %1796 = vmatprep.subr.msk.mxu1 %vm363_vm2, %v359_v59  ;;  %v291_v23 = vsel %vm282_vm1, %v274_v0, 1.0 }
  0xbb   : >> { %1781 = vmatprep.mubr.msk.f32.mxu1 %vm363_vm2, %v291_v23  ;;  %v356_v17 = vsel %vm282_vm1, %v340_v37, %v324_v32  ;;  %v355_v44 = vsel %vm282_vm1, %v339_v19, %v323_v41  ;;  %v336_v23 = vsel %vm217_vm0, %v304_v61, 1.0  ;;  %v335_v32 = vsel %vm217_vm0, %v303_v21, 1.0 }
  0xbc   : >> { %v2278_v29 = vpop.xlane.xlu1 %237  ;;  %v2295_v34 = vpop.xlane.xlu0 %240  ;;  %v301_v41 = vmul.f32 -2.0, %v2190_v52  ;;  %v276_v21 = vsel %vm217_vm0, %v2141_v27, %v2254_v22 }
  0xbd   : >> { %1744 = vmatpush3.xpose.msk.msra.mxu0 %vm363_vm2, %v359_v59  ;;  %1812 = vmatpush3.xpose.msk.msra.mxu1 %vm363_vm2, %v359_v59  ;;  %v322_v48 = vadd.f32 1.0, %v2295_v34  ;;  %v321_v59 = vadd.f32 1.0, %v2278_v29 }
  0xbe   : >> { %1745 = vmatprep.subr.msk.mxu0 %vm363_vm2, %v358_v20  ;;  %1797 = vmatprep.subr.msk.mxu1 %vm363_vm2, %v358_v20  ;;  %v333_v49 = vsel %vm217_vm0, %v301_v41, 1.0 }
  0xbf   : >> { %v354_v55 = vsel %vm282_vm1, %v338_v50, %v322_v48  ;;  %v353_v0 = vsel %vm282_vm1, %v337_v62, %v321_v59  ;;  %v300_v48 = vmul.f32 -2.0, %v2199_v57  ;;  %v299_v59 = vmul.f32 -2.0, %v2202_v58 }
  0xc0   : >> { %v2288_v38 = vpop.xlane.xlu1 %231  ;;  %v2318_v63 = vpop.xlane.xlu0 %234 }
  0xc1   : >> { %1746 = vmatpush3.xpose.msk.msra.mxu0 %vm363_vm2, %v358_v20  ;;  %1813 = vmatpush3.xpose.msk.msra.mxu1 %vm363_vm2, %v358_v20  ;;  %v320_v20 = vadd.f32 1.0, %v2318_v63  ;;  %v319_v26 = vadd.f32 1.0, %v2288_v38 }
  0xc2   : >> { %1747 = vmatprep.subr.msk.mxu0 %vm363_vm2, %v357_v30  ;;  %1798 = vmatprep.subr.msk.mxu1 %vm363_vm2, %v357_v30 }
  0xc3   : >> { %v352_v24 = vsel %vm282_vm1, %v336_v23, %v320_v20  ;;  %v351_v37 = vsel %vm282_vm1, %v335_v32, %v319_v26 }
  0xc4   : >> { %v2299_v43 = vpop.xlane.xlu1 %225  ;;  %v229_v35 = vpop.xlane.xlu0 %228 }
  0xc5   : >> { %1748 = vmatpush3.xpose.msk.msra.mxu0 %vm363_vm2, %v357_v30  ;;  %1814 = vmatpush3.xpose.msk.msra.mxu1 %vm363_vm2, %v357_v30  ;;  %v302_v30 = vmul.f32 -2.0, %v2187_v51  ;;  %v268_v23 = vsel %vm217_vm0, %v2190_v52, %v2299_v43  ;;  %v269_v27 = vsel %vm217_vm0, %v2187_v51, %v229_v35  ;;  %v270_v52 = vsel %vm217_vm0, %v2178_v46, %v2288_v38 }
  0xc6   : >> { %1749 = vmatprep.subr.msk.mxu0 %vm363_vm2, %v356_v17  ;;  %1799 = vmatprep.subr.msk.mxu1 %vm363_vm2, %v356_v17  ;;  %v285_v22 = vsel %vm282_vm1, %v268_v23, 1.0  ;;  %v271_v51 = vsel %vm217_vm0, %v2175_v45, %v2318_v63  ;;  %v272_v46 = vsel %vm217_vm0, %v2166_v40, %v2278_v29  ;;  %v273_v45 = vsel %vm217_vm0, %v2163_v39, %v2295_v34 }
  0xc7   : >> { %v334_v42 = vsel %vm217_vm0, %v302_v30, 1.0  ;;  %v288_v38 = vsel %vm282_vm1, %v271_v51, 1.0  ;;  %v290_v40 = vsel %vm282_vm1, %v273_v45, 1.0 }
  0xc8   : >> { %v220_v18 = vpop.xlane.xlu1 %219  ;;  %v223_v50 = vpop.xlane.xlu0 %222 }
  0xc9   : >> { %1750 = vmatpush3.xpose.msk.msra.mxu0 %vm363_vm2, %v356_v17  ;;  %1815 = vmatpush3.xpose.msk.msra.mxu1 %vm363_vm2, %v356_v17  ;;  %v266_v54 = vsel %vm217_vm0, %v2202_v58, %v220_v18  ;;  %v318_v17 = vadd.f32 1.0, %v229_v35  ;;  %v315_v62 = vadd.f32 1.0, %v220_v18  ;;  %v275_v18 = vsel %vm217_vm0, %v2151_v33, %v2273_v28 }
  0xca   : >> { %1751 = vmatprep.subr.msk.mxu0 %vm363_vm2, %v355_v44  ;;  %1800 = vmatprep.subr.msk.mxu1 %vm363_vm2, %v355_v44  ;;  %v283_v60 = vsel %vm282_vm1, %v266_v54, 1.0  ;;  %v267_v20 = vsel %vm217_vm0, %v2199_v57, %v223_v50  ;;  %v277_v33 = vsel %vm217_vm0, %v2137_v25, %v2250_v56  ;;  %v293_v57 = vsel %vm282_vm1, %v276_v21, 1.0 }
  0xcb   : >> { %1769 = vmatprep.mubr.msk.f32.mxu0 %vm363_vm2, %v283_v60  ;;  %v350_v19 = vsel %vm282_vm1, %v334_v42, %v318_v17  ;;  %v332_v60 = vsel %vm217_vm0, %v300_v48, 1.0  ;;  %v284_v26 = vsel %vm282_vm1, %v267_v20, 1.0  ;;  %v294_v25 = vsel %vm282_vm1, %v277_v33, 1.0 }
  0xcc   : >> { %v286_v56 = vsel %vm282_vm1, %v269_v27, 1.0  ;;  %v287_v28 = vsel %vm282_vm1, %v270_v52, 1.0 }
  0xcd   : >> { %1752 = vmatpush3.xpose.msk.msra.mxu0 %vm363_vm2, %v355_v44  ;;  %1816 = vmatpush3.xpose.msk.msra.mxu1 %vm363_vm2, %v355_v44  ;;  %v317_v44 = vadd.f32 1.0, %v2299_v43  ;;  %v289_v43 = vsel %vm282_vm1, %v272_v46, 1.0 }
  0xce   : >> { %1753 = vmatprep.subr.msk.mxu0 %vm363_vm2, %v354_v55  ;;  %1801 = vmatprep.subr.msk.mxu1 %vm363_vm2, %v354_v55 }
  0xcf   : >> { %v349_v54 = vsel %vm282_vm1, %v333_v49, %v317_v44 }
  0xd1   : >> { %1754 = vmatpush3.xpose.msk.msra.mxu0 %vm363_vm2, %v354_v55  ;;  %1817 = vmatpush3.xpose.msk.msra.mxu1 %vm363_vm2, %v354_v55  ;;  %v316_v55 = vadd.f32 1.0, %v223_v50 }
  0xd2   : >> { %1755 = vmatprep.subr.msk.mxu0 %vm363_vm2, %v353_v0  ;;  %1802 = vmatprep.subr.msk.mxu1 %vm363_vm2, %v353_v0 }
  0xd3   : >> { %v348_v61 = vsel %vm282_vm1, %v332_v60, %v316_v55 }
  0xd5   : >> { %1756 = vmatpush3.xpose.msk.msra.mxu0 %vm363_vm2, %v353_v0  ;;  %1818 = vmatpush3.xpose.msk.msra.mxu1 %vm363_vm2, %v353_v0  ;;  %v331_v0 = vsel %vm217_vm0, %v299_v59, 1.0 }
  0xd6   : >> { %1757 = vmatprep.subr.msk.mxu0 %vm363_vm2, %v352_v24  ;;  %1803 = vmatprep.subr.msk.mxu1 %vm363_vm2, %v352_v24  ;;  %v347_v58 = vsel %vm282_vm1, %v331_v0, %v315_v62 }
  0xd9   : >> { %1758 = vmatpush3.xpose.msk.msra.mxu0 %vm363_vm2, %v352_v24  ;;  %1819 = vmatpush3.xpose.msk.msra.mxu1 %vm363_vm2, %v352_v24  ;;  %v292_v24 = vsel %vm282_vm1, %v275_v18, 1.0 }
  0xda   : >> { %1759 = vmatprep.subr.msk.mxu0 %vm363_vm2, %v351_v37  ;;  %1804 = vmatprep.subr.msk.mxu1 %vm363_vm2, %v351_v37 }
  0xdd   : >> { %1760 = vmatpush3.xpose.msk.msra.mxu0 %vm363_vm2, %v351_v37  ;;  %1820 = vmatpush3.xpose.msk.msra.mxu1 %vm363_vm2, %v351_v37 }
  0xde   : >> { %1761 = vmatprep.subr.msk.mxu0 %vm363_vm2, %v350_v19  ;;  %1805 = vmatprep.subr.msk.mxu1 %vm363_vm2, %v350_v19 }
  0xe1   : >> { %1762 = vmatpush3.xpose.msk.msra.mxu0 %vm363_vm2, %v350_v19  ;;  %1821 = vmatpush3.xpose.msk.msra.mxu1 %vm363_vm2, %v350_v19 }
  0xe2   : >> { %1763 = vmatprep.subr.msk.mxu0 %vm363_vm2, %v349_v54  ;;  %1806 = vmatprep.subr.msk.mxu1 %vm363_vm2, %v349_v54 }
  0xe5   : >> { %1764 = vmatpush3.xpose.msk.msra.mxu0 %vm363_vm2, %v349_v54  ;;  %1822 = vmatpush3.xpose.msk.msra.mxu1 %vm363_vm2, %v349_v54 }
  0xe6   : >> { %1765 = vmatprep.subr.msk.mxu0 %vm363_vm2, %v348_v61  ;;  %1807 = vmatprep.subr.msk.mxu1 %vm363_vm2, %v348_v61 }
  0xe9   : >> { %1766 = vmatpush3.xpose.msk.msra.mxu0 %vm363_vm2, %v348_v61  ;;  %1823 = vmatpush3.xpose.msk.msra.mxu1 %vm363_vm2, %v348_v61 }
  0xea   : >> { %1767 = vmatprep.subr.msk.mxu0 %vm363_vm2, %v347_v58  ;;  %1808 = vmatprep.subr.msk.mxu1 %vm363_vm2, %v347_v58 }
  0xed   : >> { %1768 = vmatpush3.xpose.msk.msra.mxu0 %vm363_vm2, %v347_v58  ;;  %1824 = vmatpush3.xpose.msk.msra.mxu1 %vm363_vm2, %v347_v58 }
  0xf0   : >> { %1770 = vmatmul.mubr.msk.f32.vlgmr.msra.gmra.mxu0 %vm363_vm2, %v284_v26  ;;  %1782 = vmatmul.mubr.msk.f32.vlgmr.msra.gmra.mxu1 %vm363_vm2, %v292_v24 }
  0xf1   : >> { %1772 = vmatprep.mubr.msk.f32.mxu0 %vm363_vm2, %v285_v22  ;;  %1784 = vmatprep.mubr.msk.f32.mxu1 %vm363_vm2, %v293_v57 }
  0xf4   : >> { %1773 = vmatmul.mubr.msk.f32.gmra.mxu0 %vm363_vm2, %v286_v56  ;;  %1785 = vmatmul.mubr.msk.f32.gmra.mxu1 %vm363_vm2, %v294_v25 }
  0xf5   : >> { %1775 = vmatprep.mubr.msk.f32.mxu0 %vm363_vm2, %v287_v28  ;;  %1787 = vmatprep.mubr.msk.f32.mxu1 %vm363_vm2, %v2244_v53 }
  0xf8   : >> { %1776 = vmatmul.mubr.msk.f32.gmra.mxu0 %vm363_vm2, %v288_v38  ;;  %1788 = vmatmul.mubr.msk.f32.gmra.mxu1 %vm363_vm2, %v2225_v36 }
  0xf9   : >> { %1778 = vmatprep.mubr.msk.f32.mxu0 %vm363_vm2, %v289_v43  ;;  %1790 = vmatprep.mubr.msk.f32.mxu1 %vm363_vm2, %v2237_v47 }
  0xfc   : >> { %1779 = vmatmul.mubr.msk.f32.gmra.mxu0 %vm363_vm2, %v290_v40  ;;  %1791 = vmatmul.mubr.msk.f32.gmra.mxu1 %vm363_vm2, %v2219_v31 }
 0x1b0   : >> { %v1771_v39 = vpop.f32.mrf.mxu0  ;;  %v2432_v53 = vpop.f32.mrf.mxu1 }
 0x1b1   : >> { %v622_v29 = vand.u32 4294967168, %v1771_v39  ;;  %v630_v45 = vand.u32 4294967168, %v2432_v53 }
 0x1b2   : >> { %v526_v34 = vpop.f32.mrf.mxu0  ;;  %v566_v63 = vpop.f32.mrf.mxu1 }
 0x1b3   : >> { %v2435_v36 = vor.u32 %v622_v29, %v2054_v2  ;;  %v621_v30 = vand.u32 4294967168, %v526_v34  ;;  %v629_v56 = vand.u32 4294967168, %v566_v63 }
 0x1b4   : >> { %v1774_v32 = vpop.f32.mrf.mxu0  ;;  %v2440_v37 = vpop.f32.mrf.mxu1 }
 0x1b5   : >> { %v2438_v47 = vor.u32 %v621_v30, %v2051_v1  ;;  %v624_v35 = vand.u32 4294967168, %v1774_v32  ;;  %vm674_vm3 = vcmp.gt.f32.partialorder %v2435_v36, 0.0  ;;  %v2470_v63 = vor.u32 %v629_v56, %v2075_v9 }
 0x1b6   : >> { %v536_v17 = vpop.f32.mrf.mxu0  ;;  %v675_v50 = vsel %vm674_vm3, %v2435_v36, 3e+38  ;;  %v576_v54 = vpop.f32.mrf.mxu1 }
 0x1b7   : >> { %vm669_vm4 = vcmp.gt.f32.partialorder %v2438_v47, 0.0  ;;  %v623_v31 = vand.u32 4294967168, %v536_v17  ;;  %v2446_v42 = vor.u32 %v624_v35, %v2060_v4  ;;  %v631_v39 = vand.u32 4294967168, %v576_v54 }
 0x1b8   : >> { %v670_v41 = vsel %vm669_vm4, %v2438_v47, 3e+38  ;;  %v1777_v19 = vpop.f32.mrf.mxu0  ;;  %v1789_v24 = vpop.f32.mrf.mxu1  ;;  %v632_v35 = vand.u32 4294967168, %v2440_v37  ;;  %vm709_vm11 = vcmp.gt.f32.partialorder %v2470_v63, 0.0  ;;  %vm763_vm4 = vcmask 1040384  }
 0x1b9   : >> { %v671_v44 = vmax.f32 %v670_v41, 3e+38  ;;  %v673_v48 = vmin.f32 %v670_v41, 3e+38  ;;  %v2449_v49 = vor.u32 %v623_v31, %v2057_v3  ;;  %v626_v55 = vand.u32 4294967168, %v1777_v19 }
 0x1ba   : >> { %v546_v59 = vpop.f32.mrf.mxu0  ;;  %vm684_vm5 = vcmp.gt.f32.partialorder %v2446_v42, 0.0  ;;  %v586_v46 = vpop.f32.mrf.mxu1  ;;  %v2478_v19 = vor.u32 %v630_v45, %v2083_v10 }
 0x1bb   : >> { %v672_v60 = vmin.f32 %v671_v44, 3e+38  ;;  %v676_v61 = vmax.f32 %v673_v48, %v675_v50  ;;  %v678_v62 = vmin.f32 %v673_v48, %v675_v50  ;;  %vm679_vm6 = vcmp.gt.f32.partialorder %v2449_v49, 0.0 }
 0x1bc   : >> { %v1780_v0 = vpop.f32.mrf.mxu0  ;;  %v680_v18 = vsel %vm679_vm6, %v2449_v49, 3e+38  ;;  %v2456_v23 = vor.u32 %v626_v55, %v2066_v6  ;;  %v625_v26 = vand.u32 4294967168, %v546_v59  ;;  %v685_v33 = vsel %vm684_vm5, %v2446_v42, 3e+38  ;;  %v1792_v31 = vpop.f32.mrf.mxu1 }
 0x1bd   : >> { %v677_v58 = vmin.f32 %v676_v61, %v672_v60  ;;  %v681_v20 = vmax.f32 %v678_v62, %v680_v18  ;;  %v683_v21 = vmin.f32 %v678_v62, %v680_v18  ;;  %v628_v57 = vand.u32 4294967168, %v1780_v0 }
 0x1be   : >> { %v556_v27 = vpop.f32.mrf.mxu0  ;;  %v2460_v25 = vor.u32 %v625_v26, %v2063_v5  ;;  %vm694_vm7 = vcmp.gt.f32.partialorder %v2456_v23, 0.0  ;;  %v2483_v44 = vor.u32 %v631_v39, %v2086_v11  ;;  %v633_v48 = vand.u32 4294967168, %v586_v46  ;;  %v596_v62 = vpop.f32.mrf.mxu1 }
 0x1bf   : >> { %v682_v22 = vmin.f32 %v681_v20, %v677_v58  ;;  %v686_v52 = vmax.f32 %v683_v21, %v685_v33  ;;  %v688_v51 = vmin.f32 %v683_v21, %v685_v33  ;;  %v627_v38 = vand.u32 4294967168, %v556_v27 }
 0x1c0   : >> { %vm689_vm8 = vcmp.gt.f32.partialorder %v2460_v25, 0.0  ;;  %v2467_v40 = vor.u32 %v628_v57, %v2072_v8  ;;  %v695_v30 = vsel %vm694_vm7, %v2456_v23, 3e+38  ;;  %v2488_v59 = vor.u32 %v632_v35, %v2089_v12 }
 0x1c1   : >> { %v687_v28 = vmin.f32 %v686_v52, %v682_v22  ;;  %v690_v43 = vsel %vm689_vm8, %v2460_v25, 3e+38  ;;  %v2474_v32 = vor.u32 %v627_v38, %v2069_v7  ;;  %v634_v60 = vand.u32 4294967168, %v1789_v24 }
 0x1c2   : >> { %v691_v29 = vmax.f32 %v688_v51, %v690_v43  ;;  %v693_v34 = vmin.f32 %v688_v51, %v690_v43  ;;  %vm704_vm9 = vcmp.gt.f32.partialorder %v2467_v40, 0.0  ;;  %vm714_vm12 = vcmp.gt.f32.partialorder %v2478_v19, 0.0 }
 0x1c3   : >> { %vm699_vm10 = vcmp.gt.f32.partialorder %v2474_v32, 0.0  ;;  %v705_v61 = vsel %vm704_vm9, %v2467_v40, 3e+38  ;;  %v710_v20 = vsel %vm709_vm11, %v2470_v63, 3e+38  ;;  %vm719_vm13 = vcmp.gt.f32.partialorder %v2483_v44, 0.0 }
 0x1c4   : >> { %v692_v17 = vmin.f32 %v691_v29, %v687_v28  ;;  %v696_v53 = vmax.f32 %v693_v34, %v695_v30  ;;  %v698_v41 = vmin.f32 %v693_v34, %v695_v30  ;;  %v700_v54 = vsel %vm699_vm10, %v2474_v32, 3e+38 }
 0x1c5   : >> { %v2495_v21 = vor.u32 %v633_v48, %v2092_v13  ;;  %v635_v27 = vand.u32 4294967168, %v596_v62  ;;  %v715_v24 = vsel %vm714_vm12, %v2478_v19, 3e+38  ;;  %vm724_vm14 = vcmp.gt.f32.partialorder %v2488_v59, 0.0 }
 0x1c6   : >> { %v697_v50 = vmin.f32 %v696_v53, %v692_v17  ;;  %v701_v37 = vmax.f32 %v698_v41, %v700_v54  ;;  %v703_v55 = vmin.f32 %v698_v41, %v700_v54  ;;  %v2500_v22 = vor.u32 %v634_v60, %v2095_v14 }
 0x1c7   : >> { %v636_v52 = vand.u32 4294967168, %v1792_v31  ;;  %v720_v46 = vsel %vm719_vm13, %v2483_v44, 3e+38  ;;  %vm729_vm15 = vcmp.gt.f32.partialorder %v2495_v21, 0.0  ;;  %v2505_v43 = vor.u32 %v635_v27, %v2098_v15 }
 0x1c8   : >> { %v702_v0 = vmin.f32 %v701_v37, %v697_v50  ;;  %v706_v58 = vmax.f32 %v703_v55, %v705_v61  ;;  %v708_v18 = vmin.f32 %v703_v55, %v705_v61  ;;  %v725_v29 = vsel %vm724_vm14, %v2488_v59, 3e+38 }
 0x1c9   : >> { %vm734_vm0 = vcmp.gt.f32.partialorder %v2500_v22, 0.0  ;;  %v2510_v34 = vor.u32 %v636_v52, %v2101_v16  ;;  %v730_v35 = vsel %vm729_vm15, %v2495_v21, 3e+38  ;;  %vm739_vm1 = vcmp.gt.f32.partialorder %v2505_v43, 0.0 }
 0x1ca   : >> { %v707_v26 = vmin.f32 %v706_v58, %v702_v0  ;;  %v711_v33 = vmax.f32 %v708_v18, %v710_v20  ;;  %v713_v57 = vmin.f32 %v708_v18, %v710_v20  ;;  %v735_v41 = vsel %vm734_vm0, %v2500_v22, 3e+38 }
 0x1cb   : >> { %vm744_vm2 = vcmp.gt.f32.partialorder %v2510_v34, 0.0  ;;  %v740_v37 = vsel %vm739_vm1, %v2505_v43, 3e+38 }
 0x1cc   : >> { %v712_v56 = vmin.f32 %v711_v33, %v707_v26  ;;  %v716_v51 = vmax.f32 %v713_v57, %v715_v24  ;;  %v718_v28 = vmin.f32 %v713_v57, %v715_v24  ;;  %v745_v60 = vsel %vm744_vm2, %v2510_v34, 3e+38 }
 0x1ce   : >> { %v717_v38 = vmin.f32 %v716_v51, %v712_v56  ;;  %v721_v45 = vmax.f32 %v718_v28, %v720_v46  ;;  %v723_v39 = vmin.f32 %v718_v28, %v720_v46 }
 0x1d0   : >> { %v728_v30 = vmin.f32 %v723_v39, %v725_v29  ;;  %v722_v17 = vmin.f32 %v721_v45, %v717_v38  ;;  %v726_v53 = vmax.f32 %v723_v39, %v725_v29 }
 0x1d2   : >> { %v733_v31 = vmin.f32 %v728_v30, %v730_v35  ;;  %v727_v50 = vmin.f32 %v726_v53, %v722_v17  ;;  %v731_v54 = vmax.f32 %v728_v30, %v730_v35 }
 0x1d4   : >> { %v738_v48 = vmin.f32 %v733_v31, %v735_v41  ;;  %v732_v62 = vmin.f32 %v731_v54, %v727_v50  ;;  %v736_v0 = vmax.f32 %v733_v31, %v735_v41 }
 0x1d6   : >> { %v743_v55 = vmin.f32 %v738_v48, %v740_v37  ;;  %v737_v20 = vmin.f32 %v736_v0, %v732_v62  ;;  %v741_v26 = vmax.f32 %v738_v48, %v740_v37 }
 0x1d8   : >> { %v748_v61 = vmin.f32 %v743_v55, %v745_v60  ;;  %v742_v27 = vmin.f32 %v741_v26, %v737_v20  ;;  %v746_v24 = vmax.f32 %v743_v55, %v745_v60 }
 0x1da   : >> { %v749_v58 = vrot.slane %v748_v61, 4  ;;  %v747_v51 = vmin.f32 %v746_v24, %v742_v27 }
 0x1dc   : >> { %v750_v18 = vmin.f32 %v748_v61, %v749_v58 }
 0x1de   : >> { %v751_v33 = vrot.slane %v750_v18, 2 }
 0x1e0   : >> { %v752_v57 = vmin.f32 %v750_v18, %v751_v33 }
 0x1e2   : >> { %v753_v52 = vrot.slane %v752_v57, 1 }
 0x1e4   : >> { %v754_v56 = vmin.f32 %v752_v57, %v753_v52 }
 0x1e6   : >> { %vm755_vm3 = vcmp.eq.f32.partialorder %v748_v61, %v754_v56 }
 0x1e7   : >> { %v756_v28 = vsel %vm755_vm3, %v747_v51, %v748_v61 }
 0x1e8   : >> { %v757_v46 = vrot.slane %v756_v28, 4 }
 0x1ea   : >> { %v758_v38 = vmin.f32 %v756_v28, %v757_v46 }
 0x1ec   : >> { %v759_v45 = vrot.slane %v758_v38, 2 }
 0x1ee   : >> { %v760_v39 = vmin.f32 %v758_v38, %v759_v45 }
 0x1f0   : >> { %v761_v29 = vrot.slane %v760_v39, 1 }
 0x1f2   : >> { %v2519_v30 = vmin.f32 %v760_v39, %v761_v29 }
 0x1f4   : >> { %v764_v35 = vsel %vm763_vm4, %v754_v56, %v2519_v30  ;;  %vm776_vm5 = vcmp.gt.f32.partialorder %v2438_v47, %v2519_v30  ;;  %vm781_vm6 = vcmp.gt.f32.partialorder %v2435_v36, %v2519_v30  ;;  %vm786_vm7 = vcmp.gt.f32.partialorder %v2449_v49, %v2519_v30 }
 0x1f5   : >> { %v766_v17 = vand.u32 127, %v764_v35  ;;  %v767_v53 = vand.u32 4294967168, %v764_v35  ;;  %v777_v31 = vsel %vm776_vm5, %v2438_v47, 3e+38  ;;  %v782_v54 = vsel %vm781_vm6, %v2435_v36, 3e+38 }
 0x1f6   : >> { %v778_v41 = vmax.f32 %v777_v31, 3e+38  ;;  %v780_v48 = vmin.f32 %v777_v31, 3e+38  ;;  %vm791_vm8 = vcmp.gt.f32.partialorder %v2446_v42, %v2519_v30  ;;  %v787_v62 = vsel %vm786_vm7, %v2449_v49, 3e+38 }
 0x1f7   : >> { %v1681_v50 = vadd.f32 -1.0, %v767_v53  ;;  %775 = vst [vmem:[%s2522_s6] sm:$0x3] %v766_v17  ;;  %vm796_vm9 = vcmp.gt.f32.partialorder %v2460_v25, %v2519_v30  ;;  %v792_v20 = vsel %vm791_vm8, %v2446_v42, 3e+38  ;;  %vm801_vm10 = vcmp.gt.f32.partialorder %v2456_v23, %v2519_v30 }
 0x1f8   : >> { %v779_v37 = vmin.f32 %v778_v41, 3e+38  ;;  %v783_v55 = vmax.f32 %v780_v48, %v782_v54  ;;  %v785_v60 = vmin.f32 %v780_v48, %v782_v54  ;;  %v797_v27 = vsel %vm796_vm9, %v2460_v25, 3e+38 }
 0x1f9   : >> { %v770_v61 = vmax.f32 %v1681_v50, 0.0  ;;  %vm806_vm11 = vcmp.gt.f32.partialorder %v2474_v32, %v2519_v30  ;;  %v802_v51 = vsel %vm801_vm10, %v2456_v23, 3e+38  ;;  %vm811_vm12 = vcmp.gt.f32.partialorder %v2467_v40, %v2519_v30 }
 0x1fa   : >> { %v784_v0 = vmin.f32 %v783_v55, %v779_v37  ;;  %v788_v58 = vmax.f32 %v785_v60, %v787_v62  ;;  %v790_v18 = vmin.f32 %v785_v60, %v787_v62  ;;  %v807_v45 = vsel %vm806_vm11, %v2474_v32, 3e+38 }
 0x1fb   : >> { %773 = vst [vmem:[%s2536_s7] sm:$0x3] %v770_v61  ;;  %vm816_vm13 = vcmp.gt.f32.partialorder %v2470_v63, %v2519_v30  ;;  %v812_v17 = vsel %vm811_vm12, %v2467_v40, 3e+38  ;;  %vm821_vm14 = vcmp.gt.f32.partialorder %v2478_v19, %v2519_v30  ;;  %vm826_vm15 = vcmp.gt.f32.partialorder %v2483_v44, %v2519_v30 }
 0x1fc   : >> { %v789_v26 = vmin.f32 %v788_v58, %v784_v0  ;;  %v793_v33 = vmax.f32 %v790_v18, %v792_v20  ;;  %v795_v57 = vmin.f32 %v790_v18, %v792_v20  ;;  %v817_v48 = vsel %vm816_vm13, %v2470_v63, 3e+38 }
 0x1fd   : >> { %v822_v55 = vsel %vm821_vm14, %v2478_v19, 3e+38  ;;  %vm831_vm0 = vcmp.gt.f32.partialorder %v2488_v59, %v2519_v30  ;;  %v827_v0 = vsel %vm826_vm15, %v2483_v44, 3e+38  ;;  %vm836_vm1 = vcmp.gt.f32.partialorder %v2495_v21, %v2519_v30 }
 0x1fe   : >> { %v794_v24 = vmin.f32 %v793_v33, %v789_v26  ;;  %v798_v52 = vmax.f32 %v795_v57, %v797_v27  ;;  %v800_v56 = vmin.f32 %v795_v57, %v797_v27  ;;  %v832_v26 = vsel %vm831_vm0, %v2488_v59, 3e+38 }
 0x1ff   : >> { %vm841_vm2 = vcmp.gt.f32.partialorder %v2500_v22, %v2519_v30  ;;  %vm846_vm3 = vcmp.gt.f32.partialorder %v2505_v43, %v2519_v30  ;;  %vm851_vm5 = vcmp.gt.f32.partialorder %v2510_v34, %v2519_v30 }
 0x200   : >> { %v799_v28 = vmin.f32 %v798_v52, %v794_v24  ;;  %v803_v46 = vmax.f32 %v800_v56, %v802_v51  ;;  %v805_v38 = vmin.f32 %v800_v56, %v802_v51  ;;  %v837_v24 = vsel %vm836_vm1, %v2495_v21, 3e+38 }
 0x201   : >> { %v842_v56 = vsel %vm841_vm2, %v2500_v22, 3e+38 }
 0x202   : >> { %v804_v39 = vmin.f32 %v803_v46, %v799_v28  ;;  %v808_v29 = vmax.f32 %v805_v38, %v807_v45  ;;  %v810_v35 = vmin.f32 %v805_v38, %v807_v45  ;;  %v847_v38 = vsel %vm846_vm3, %v2505_v43, 3e+38 }
 0x204   : >> { %v809_v53 = vmin.f32 %v808_v29, %v804_v39  ;;  %v813_v31 = vmax.f32 %v810_v35, %v812_v17  ;;  %v815_v41 = vmin.f32 %v810_v35, %v812_v17  ;;  %v852_v39 = vsel %vm851_vm5, %v2510_v34, 3e+38 }
 0x206   : >> { %v814_v50 = vmin.f32 %v813_v31, %v809_v53  ;;  %v818_v54 = vmax.f32 %v815_v41, %v817_v48  ;;  %v820_v37 = vmin.f32 %v815_v41, %v817_v48 }
 0x208   : >> { %v819_v60 = vmin.f32 %v818_v54, %v814_v50  ;;  %v823_v61 = vmax.f32 %v820_v37, %v822_v55  ;;  %v825_v62 = vmin.f32 %v820_v37, %v822_v55 }
 0x20a   : >> { %v824_v58 = vmin.f32 %v823_v61, %v819_v60  ;;  %v828_v18 = vmax.f32 %v825_v62, %v827_v0  ;;  %v830_v20 = vmin.f32 %v825_v62, %v827_v0 }
 0x20c   : >> { %v835_v33 = vmin.f32 %v830_v20, %v832_v26  ;;  %v829_v57 = vmin.f32 %v828_v18, %v824_v58  ;;  %v833_v27 = vmax.f32 %v830_v20, %v832_v26 }
 0x20e   : >> { %v840_v52 = vmin.f32 %v835_v33, %v837_v24  ;;  %v834_v28 = vmin.f32 %v833_v27, %v829_v57  ;;  %v838_v46 = vmax.f32 %v835_v33, %v837_v24 }
 0x210   : >> { %v845_v51 = vmin.f32 %v840_v52, %v842_v56  ;;  %v839_v35 = vmin.f32 %v838_v46, %v834_v28  ;;  %v843_v17 = vmax.f32 %v840_v52, %v842_v56 }
 0x212   : >> { %v850_v45 = vmin.f32 %v845_v51, %v847_v38  ;;  %v844_v41 = vmin.f32 %v843_v17, %v839_v35  ;;  %v848_v48 = vmax.f32 %v845_v51, %v847_v38 }
 0x214   : >> { %v855_v29 = vmin.f32 %v850_v45, %v852_v39  ;;  %v849_v37 = vmin.f32 %v848_v48, %v844_v41  ;;  %v853_v55 = vmax.f32 %v850_v45, %v852_v39 }
 0x216   : >> { %v856_v53 = vrot.slane %v855_v29, 4  ;;  %v854_v61 = vmin.f32 %v853_v55, %v849_v37 }
 0x218   : >> { %v857_v31 = vmin.f32 %v855_v29, %v856_v53 }
 0x21a   : >> { %v858_v50 = vrot.slane %v857_v31, 2 }
 0x21c   : >> { %v859_v54 = vmin.f32 %v857_v31, %v858_v50 }
 0x21e   : >> { %v860_v60 = vrot.slane %v859_v54, 1 }
 0x220   : >> { %v861_v30 = vmin.f32 %v859_v54, %v860_v60 }
 0x222   : >> { %vm862_vm6 = vcmp.eq.f32.partialorder %v855_v29, %v861_v30 }
 0x223   : >> { %v863_v62 = vsel %vm862_vm6, %v854_v61, %v855_v29 }
 0x224   : >> { %v864_v0 = vrot.slane %v863_v62, 4 }
 0x226   : >> { %v865_v58 = vmin.f32 %v863_v62, %v864_v0 }
 0x228   : >> { %v866_v18 = vrot.slane %v865_v58, 2 }
 0x22a   : >> { %v867_v20 = vmin.f32 %v865_v58, %v866_v18 }
 0x22c   : >> { %v868_v26 = vrot.slane %v867_v20, 1 }
 0x22e   : >> { %v2579_v33 = vmin.f32 %v867_v20, %v868_v26 }
 0x230   : >> { %v870_v57 = vsel %vm763_vm4, %v861_v30, %v2579_v33  ;;  %vm879_vm7 = vcmp.gt.f32.partialorder %v2438_v47, %v2579_v33  ;;  %vm884_vm8 = vcmp.gt.f32.partialorder %v2435_v36, %v2579_v33  ;;  %vm889_vm9 = vcmp.gt.f32.partialorder %v2449_v49, %v2579_v33 }
 0x231   : >> { %v872_v27 = vand.u32 127, %v870_v57  ;;  %v873_v24 = vand.u32 4294967168, %v870_v57  ;;  %v880_v52 = vsel %vm879_vm7, %v2438_v47, 3e+38  ;;  %v885_v46 = vsel %vm884_vm8, %v2435_v36, 3e+38 }
 0x232   : >> { %v881_v56 = vmax.f32 %v880_v52, 3e+38  ;;  %v883_v51 = vmin.f32 %v880_v52, 3e+38  ;;  %vm894_vm10 = vcmp.gt.f32.partialorder %v2446_v42, %v2579_v33  ;;  %v890_v35 = vsel %vm889_vm9, %v2449_v49, 3e+38 }
 0x233   : >> { %v1683_v28 = vadd.f32 -1.0, %v873_v24  ;;  %878 = vst [vmem:[%s2522_s6 + $0x2] sm:$0x3] %v872_v27  ;;  %vm899_vm11 = vcmp.gt.f32.partialorder %v2460_v25, %v2579_v33  ;;  %v895_v41 = vsel %vm894_vm10, %v2446_v42, 3e+38  ;;  %vm904_vm12 = vcmp.gt.f32.partialorder %v2456_v23, %v2579_v33 }
 0x234   : >> { %v882_v38 = vmin.f32 %v881_v56, 3e+38  ;;  %v886_v45 = vmax.f32 %v883_v51, %v885_v46  ;;  %v888_v39 = vmin.f32 %v883_v51, %v885_v46  ;;  %v900_v37 = vsel %vm899_vm11, %v2460_v25, 3e+38 }
 0x235   : >> { %v876_v29 = vmax.f32 %v1683_v28, 0.0  ;;  %vm909_vm13 = vcmp.gt.f32.partialorder %v2474_v32, %v2579_v33  ;;  %v905_v61 = vsel %vm904_vm12, %v2456_v23, 3e+38  ;;  %vm914_vm14 = vcmp.gt.f32.partialorder %v2467_v40, %v2579_v33 }
 0x236   : >> { %v887_v17 = vmin.f32 %v886_v45, %v882_v38  ;;  %v891_v53 = vmax.f32 %v888_v39, %v890_v35  ;;  %v893_v31 = vmin.f32 %v888_v39, %v890_v35  ;;  %v910_v18 = vsel %vm909_vm13, %v2474_v32, 3e+38 }
 0x237   : >> { %877 = vst [vmem:[%s2536_s7 + $0x2] sm:$0x3] %v876_v29  ;;  %vm919_vm15 = vcmp.gt.f32.partialorder %v2470_v63, %v2579_v33  ;;  %v915_v27 = vsel %vm914_vm14, %v2467_v40, 3e+38  ;;  %vm924_vm0 = vcmp.gt.f32.partialorder %v2478_v19, %v2579_v33  ;;  %vm929_vm1 = vcmp.gt.f32.partialorder %v2483_v44, %v2579_v33 }
 0x238   : >> { %v892_v48 = vmin.f32 %v891_v53, %v887_v17  ;;  %v896_v50 = vmax.f32 %v893_v31, %v895_v41  ;;  %v898_v54 = vmin.f32 %v893_v31, %v895_v41  ;;  %v920_v51 = vsel %vm919_vm15, %v2470_v63, 3e+38 }
 0x239   : >> { %v925_v45 = vsel %vm924_vm0, %v2478_v19, 3e+38  ;;  %vm934_vm2 = vcmp.gt.f32.partialorder %v2488_v59, %v2579_v33  ;;  %v930_v17 = vsel %vm929_vm1, %v2483_v44, 3e+38  ;;  %vm939_vm3 = vcmp.gt.f32.partialorder %v2495_v21, %v2579_v33 }
 0x23a   : >> { %v897_v55 = vmin.f32 %v896_v50, %v892_v48  ;;  %v901_v60 = vmax.f32 %v898_v54, %v900_v37  ;;  %v903_v30 = vmin.f32 %v898_v54, %v900_v37  ;;  %v935_v48 = vsel %vm934_vm2, %v2488_v59, 3e+38 }
 0x23b   : >> { %vm944_vm5 = vcmp.gt.f32.partialorder %v2500_v22, %v2579_v33  ;;  %vm949_vm6 = vcmp.gt.f32.partialorder %v2505_v43, %v2579_v33  ;;  %vm954_vm7 = vcmp.gt.f32.partialorder %v2510_v34, %v2579_v33 }
 0x23c   : >> { %v902_v62 = vmin.f32 %v901_v60, %v897_v55  ;;  %v906_v0 = vmax.f32 %v903_v30, %v905_v61  ;;  %v908_v58 = vmin.f32 %v903_v30, %v905_v61  ;;  %v940_v55 = vsel %vm939_vm3, %v2495_v21, 3e+38 }
 0x23d   : >> { %v945_v30 = vsel %vm944_vm5, %v2500_v22, 3e+38 }
 0x23e   : >> { %v907_v20 = vmin.f32 %v906_v0, %v902_v62  ;;  %v911_v26 = vmax.f32 %v908_v58, %v910_v18  ;;  %v913_v57 = vmin.f32 %v908_v58, %v910_v18  ;;  %v950_v58 = vsel %vm949_vm6, %v2505_v43, 3e+38 }
 0x240   : >> { %v912_v24 = vmin.f32 %v911_v26, %v907_v20  ;;  %v916_v52 = vmax.f32 %v913_v57, %v915_v27  ;;  %v918_v56 = vmin.f32 %v913_v57, %v915_v27  ;;  %v955_v20 = vsel %vm954_vm7, %v2510_v34, 3e+38 }
 0x242   : >> { %v917_v28 = vmin.f32 %v916_v52, %v912_v24  ;;  %v921_v46 = vmax.f32 %v918_v56, %v920_v51  ;;  %v923_v38 = vmin.f32 %v918_v56, %v920_v51 }
 0x244   : >> { %v922_v39 = vmin.f32 %v921_v46, %v917_v28  ;;  %v926_v29 = vmax.f32 %v923_v38, %v925_v45  ;;  %v928_v35 = vmin.f32 %v923_v38, %v925_v45 }
 0x246   : >> { %v927_v53 = vmin.f32 %v926_v29, %v922_v39  ;;  %v931_v31 = vmax.f32 %v928_v35, %v930_v17  ;;  %v933_v41 = vmin.f32 %v928_v35, %v930_v17 }
 0x248   : >> { %v938_v50 = vmin.f32 %v933_v41, %v935_v48  ;;  %v932_v54 = vmin.f32 %v931_v31, %v927_v53  ;;  %v936_v37 = vmax.f32 %v933_v41, %v935_v48 }
 0x24a   : >> { %v943_v60 = vmin.f32 %v938_v50, %v940_v55  ;;  %v937_v62 = vmin.f32 %v936_v37, %v932_v54  ;;  %v941_v0 = vmax.f32 %v938_v50, %v940_v55 }
 0x24c   : >> { %v948_v61 = vmin.f32 %v943_v60, %v945_v30  ;;  %v942_v57 = vmin.f32 %v941_v0, %v937_v62  ;;  %v946_v27 = vmax.f32 %v943_v60, %v945_v30 }
 0x24e   : >> { %v953_v18 = vmin.f32 %v948_v61, %v950_v58  ;;  %v947_v56 = vmin.f32 %v946_v27, %v942_v57  ;;  %v951_v51 = vmax.f32 %v948_v61, %v950_v58 }
 0x250   : >> { %v958_v26 = vmin.f32 %v953_v18, %v955_v20  ;;  %v952_v38 = vmin.f32 %v951_v51, %v947_v56  ;;  %v956_v45 = vmax.f32 %v953_v18, %v955_v20 }
 0x252   : >> { %v959_v24 = vrot.slane %v958_v26, 4  ;;  %v957_v29 = vmin.f32 %v956_v45, %v952_v38 }
 0x254   : >> { %v960_v52 = vmin.f32 %v958_v26, %v959_v24 }
 0x256   : >> { %v961_v28 = vrot.slane %v960_v52, 2 }
 0x258   : >> { %v962_v46 = vmin.f32 %v960_v52, %v961_v28 }
 0x25a   : >> { %v963_v39 = vrot.slane %v962_v46, 1 }
 0x25c   : >> { %v964_v33 = vmin.f32 %v962_v46, %v963_v39 }
 0x25e   : >> { %vm965_vm8 = vcmp.eq.f32.partialorder %v958_v26, %v964_v33 }
 0x25f   : >> { %v966_v35 = vsel %vm965_vm8, %v957_v29, %v958_v26 }
 0x260   : >> { %v967_v17 = vrot.slane %v966_v35, 4 }
 0x262   : >> { %v968_v53 = vmin.f32 %v966_v35, %v967_v17 }
 0x264   : >> { %v969_v31 = vrot.slane %v968_v53, 2 }
 0x266   : >> { %v970_v41 = vmin.f32 %v968_v53, %v969_v31 }
 0x268   : >> { %v971_v48 = vrot.slane %v970_v41, 1 }
 0x26a   : >> { %v2633_v50 = vmin.f32 %v970_v41, %v971_v48 }
 0x26c   : >> { %v973_v54 = vsel %vm763_vm4, %v964_v33, %v2633_v50  ;;  %vm982_vm9 = vcmp.gt.f32.partialorder %v2438_v47, %v2633_v50  ;;  %vm987_vm10 = vcmp.gt.f32.partialorder %v2435_v36, %v2633_v50  ;;  %vm992_vm11 = vcmp.gt.f32.partialorder %v2449_v49, %v2633_v50 }
 0x26d   : >> { %v975_v37 = vand.u32 127, %v973_v54  ;;  %v976_v55 = vand.u32 4294967168, %v973_v54  ;;  %v983_v60 = vsel %vm982_vm9, %v2438_v47, 3e+38  ;;  %v988_v0 = vsel %vm987_vm10, %v2435_v36, 3e+38 }
 0x26e   : >> { %v984_v30 = vmax.f32 %v983_v60, 3e+38  ;;  %v986_v61 = vmin.f32 %v983_v60, 3e+38  ;;  %vm997_vm12 = vcmp.gt.f32.partialorder %v2446_v42, %v2633_v50  ;;  %v993_v57 = vsel %vm992_vm11, %v2449_v49, 3e+38 }
 0x26f   : >> { %v1684_v62 = vadd.f32 -1.0, %v976_v55  ;;  %981 = vst [vmem:[%s2522_s6 + $0x4] sm:$0x3] %v975_v37  ;;  %vm1002_vm13 = vcmp.gt.f32.partialorder %v2460_v25, %v2633_v50  ;;  %v998_v56 = vsel %vm997_vm12, %v2446_v42, 3e+38  ;;  %vm1007_vm14 = vcmp.gt.f32.partialorder %v2456_v23, %v2633_v50 }
 0x270   : >> { %v985_v58 = vmin.f32 %v984_v30, 3e+38  ;;  %v989_v18 = vmax.f32 %v986_v61, %v988_v0  ;;  %v991_v20 = vmin.f32 %v986_v61, %v988_v0  ;;  %v1003_v38 = vsel %vm1002_vm13, %v2460_v25, 3e+38 }
 0x271   : >> { %v979_v26 = vmax.f32 %v1684_v62, 0.0  ;;  %vm1012_vm15 = vcmp.gt.f32.partialorder %v2474_v32, %v2633_v50  ;;  %v1008_v29 = vsel %vm1007_vm14, %v2456_v23, 3e+38  ;;  %vm1017_vm0 = vcmp.gt.f32.partialorder %v2467_v40, %v2633_v50 }
 0x272   : >> { %v990_v27 = vmin.f32 %v989_v18, %v985_v58  ;;  %v994_v24 = vmax.f32 %v991_v20, %v993_v57  ;;  %v996_v52 = vmin.f32 %v991_v20, %v993_v57  ;;  %v1013_v31 = vsel %vm1012_vm15, %v2474_v32, 3e+38 }
 0x273   : >> { %980 = vst [vmem:[%s2536_s7 + $0x4] sm:$0x3] %v979_v26  ;;  %vm1022_vm1 = vcmp.gt.f32.partialorder %v2470_v63, %v2633_v50  ;;  %v1018_v37 = vsel %vm1017_vm0, %v2467_v40, 3e+38  ;;  %vm1027_vm2 = vcmp.gt.f32.partialorder %v2478_v19, %v2633_v50  ;;  %vm1032_vm3 = vcmp.gt.f32.partialorder %v2483_v44, %v2633_v50 }
 0x274   : >> { %v995_v51 = vmin.f32 %v994_v24, %v990_v27  ;;  %v999_v28 = vmax.f32 %v996_v52, %v998_v56  ;;  %v1001_v46 = vmin.f32 %v996_v52, %v998_v56  ;;  %v1023_v61 = vsel %vm1022_vm1, %v2470_v63, 3e+38 }
 0x275   : >> { %v1028_v18 = vsel %vm1027_vm2, %v2478_v19, 3e+38  ;;  %vm1037_vm5 = vcmp.gt.f32.partialorder %v2488_v59, %v2633_v50  ;;  %v1033_v27 = vsel %vm1032_vm3, %v2483_v44, 3e+38  ;;  %vm1042_vm6 = vcmp.gt.f32.partialorder %v2495_v21, %v2633_v50 }
 0x276   : >> { %v1000_v45 = vmin.f32 %v999_v28, %v995_v51  ;;  %v1004_v39 = vmax.f32 %v1001_v46, %v1003_v38  ;;  %v1006_v33 = vmin.f32 %v1001_v46, %v1003_v38  ;;  %v1038_v51 = vsel %vm1037_vm5, %v2488_v59, 3e+38 }
 0x277   : >> { %vm1047_vm7 = vcmp.gt.f32.partialorder %v2500_v22, %v2633_v50  ;;  %vm1052_vm8 = vcmp.gt.f32.partialorder %v2505_v43, %v2633_v50  ;;  %vm1057_vm9 = vcmp.gt.f32.partialorder %v2510_v34, %v2633_v50 }
 0x278   : >> { %v1005_v35 = vmin.f32 %v1004_v39, %v1000_v45  ;;  %v1009_v17 = vmax.f32 %v1006_v33, %v1008_v29  ;;  %v1011_v53 = vmin.f32 %v1006_v33, %v1008_v29  ;;  %v1043_v45 = vsel %vm1042_vm6, %v2495_v21, 3e+38 }
 0x279   : >> { %v1048_v33 = vsel %vm1047_vm7, %v2500_v22, 3e+38 }
 0x27a   : >> { %v1010_v41 = vmin.f32 %v1009_v17, %v1005_v35  ;;  %v1014_v48 = vmax.f32 %v1011_v53, %v1013_v31  ;;  %v1016_v54 = vmin.f32 %v1011_v53, %v1013_v31  ;;  %v1053_v53 = vsel %vm1052_vm8, %v2505_v43, 3e+38 }
 0x27c   : >> { %v1015_v55 = vmin.f32 %v1014_v48, %v1010_v41  ;;  %v1019_v60 = vmax.f32 %v1016_v54, %v1018_v37  ;;  %v1021_v30 = vmin.f32 %v1016_v54, %v1018_v37  ;;  %v1058_v41 = vsel %vm1057_vm9, %v2510_v34, 3e+38 }
 0x27e   : >> { %v1020_v62 = vmin.f32 %v1019_v60, %v1015_v55  ;;  %v1024_v0 = vmax.f32 %v1021_v30, %v1023_v61  ;;  %v1026_v58 = vmin.f32 %v1021_v30, %v1023_v61 }
 0x280   : >> { %v1025_v20 = vmin.f32 %v1024_v0, %v1020_v62  ;;  %v1029_v26 = vmax.f32 %v1026_v58, %v1028_v18  ;;  %v1031_v57 = vmin.f32 %v1026_v58, %v1028_v18 }
 0x282   : >> { %v1030_v24 = vmin.f32 %v1029_v26, %v1025_v20  ;;  %v1034_v52 = vmax.f32 %v1031_v57, %v1033_v27  ;;  %v1036_v56 = vmin.f32 %v1031_v57, %v1033_v27 }
 0x284   : >> { %v1041_v28 = vmin.f32 %v1036_v56, %v1038_v51  ;;  %v1035_v46 = vmin.f32 %v1034_v52, %v1030_v24  ;;  %v1039_v38 = vmax.f32 %v1036_v56, %v1038_v51 }
 0x286   : >> { %v1046_v39 = vmin.f32 %v1041_v28, %v1043_v45  ;;  %v1040_v35 = vmin.f32 %v1039_v38, %v1035_v46  ;;  %v1044_v17 = vmax.f32 %v1041_v28, %v1043_v45 }
 0x288   : >> { %v1051_v29 = vmin.f32 %v1046_v39, %v1048_v33  ;;  %v1045_v54 = vmin.f32 %v1044_v17, %v1040_v35  ;;  %v1049_v37 = vmax.f32 %v1046_v39, %v1048_v33 }
 0x28a   : >> { %v1056_v31 = vmin.f32 %v1051_v29, %v1053_v53  ;;  %v1050_v30 = vmin.f32 %v1049_v37, %v1045_v54  ;;  %v1054_v61 = vmax.f32 %v1051_v29, %v1053_v53 }
 0x28c   : >> { %v1061_v48 = vmin.f32 %v1056_v31, %v1058_v41  ;;  %v1055_v58 = vmin.f32 %v1054_v61, %v1050_v30  ;;  %v1059_v18 = vmax.f32 %v1056_v31, %v1058_v41 }
 0x28e   : >> { %v1062_v55 = vrot.slane %v1061_v48, 4  ;;  %v1060_v26 = vmin.f32 %v1059_v18, %v1055_v58 }
 0x290   : >> { %v1063_v60 = vmin.f32 %v1061_v48, %v1062_v55 }
 0x292   : >> { %v1064_v62 = vrot.slane %v1063_v60, 2 }
 0x294   : >> { %v1065_v0 = vmin.f32 %v1063_v60, %v1064_v62 }
 0x296   : >> { %v1066_v20 = vrot.slane %v1065_v0, 1 }
 0x298   : >> { %v1067_v50 = vmin.f32 %v1065_v0, %v1066_v20 }
 0x29a   : >> { %vm1068_vm10 = vcmp.eq.f32.partialorder %v1061_v48, %v1067_v50 }
 0x29b   : >> { %v1069_v57 = vsel %vm1068_vm10, %v1060_v26, %v1061_v48 }
 0x29c   : >> { %v1070_v27 = vrot.slane %v1069_v57, 4 }
 0x29e   : >> { %v1071_v24 = vmin.f32 %v1069_v57, %v1070_v27 }
 0x2a0   : >> { %v1072_v52 = vrot.slane %v1071_v24, 2 }
 0x2a2   : >> { %v1073_v56 = vmin.f32 %v1071_v24, %v1072_v52 }
 0x2a4   : >> { %v1074_v51 = vrot.slane %v1073_v56, 1 }
 0x2a6   : >> { %v2687_v28 = vmin.f32 %v1073_v56, %v1074_v51 }
 0x2a8   : >> { %v1076_v46 = vsel %vm763_vm4, %v1067_v50, %v2687_v28  ;;  %vm1085_vm11 = vcmp.gt.f32.partialorder %v2438_v47, %v2687_v28  ;;  %vm1090_vm12 = vcmp.gt.f32.partialorder %v2435_v36, %v2687_v28  ;;  %vm1095_vm13 = vcmp.gt.f32.partialorder %v2449_v49, %v2687_v28 }
 0x2a9   : >> { %v1078_v38 = vand.u32 127, %v1076_v46  ;;  %v1079_v45 = vand.u32 4294967168, %v1076_v46  ;;  %v1086_v39 = vsel %vm1085_vm11, %v2438_v47, 3e+38  ;;  %v1091_v17 = vsel %vm1090_vm12, %v2435_v36, 3e+38 }
 0x2aa   : >> { %v1087_v33 = vmax.f32 %v1086_v39, 3e+38  ;;  %v1089_v29 = vmin.f32 %v1086_v39, 3e+38  ;;  %vm1100_vm14 = vcmp.gt.f32.partialorder %v2446_v42, %v2687_v28  ;;  %v1096_v54 = vsel %vm1095_vm13, %v2449_v49, 3e+38 }
 0x2ab   : >> { %v1685_v35 = vadd.f32 -1.0, %v1079_v45  ;;  %1084 = vst [vmem:[%s2522_s6 + $0x6] sm:$0x3] %v1078_v38  ;;  %vm1105_vm15 = vcmp.gt.f32.partialorder %v2460_v25, %v2687_v28  ;;  %v1101_v30 = vsel %vm1100_vm14, %v2446_v42, 3e+38  ;;  %vm1110_vm0 = vcmp.gt.f32.partialorder %v2456_v23, %v2687_v28 }
 0x2ac   : >> { %v1088_v53 = vmin.f32 %v1087_v33, 3e+38  ;;  %v1092_v31 = vmax.f32 %v1089_v29, %v1091_v17  ;;  %v1094_v41 = vmin.f32 %v1089_v29, %v1091_v17  ;;  %v1106_v58 = vsel %vm1105_vm15, %v2460_v25, 3e+38 }
 0x2ad   : >> { %v1082_v48 = vmax.f32 %v1685_v35, 0.0  ;;  %vm1115_vm1 = vcmp.gt.f32.partialorder %v2474_v32, %v2687_v28  ;;  %v1111_v26 = vsel %vm1110_vm0, %v2456_v23, 3e+38  ;;  %vm1120_vm2 = vcmp.gt.f32.partialorder %v2467_v40, %v2687_v28 }
 0x2ae   : >> { %v1093_v37 = vmin.f32 %v1092_v31, %v1088_v53  ;;  %v1097_v55 = vmax.f32 %v1094_v41, %v1096_v54  ;;  %v1099_v60 = vmin.f32 %v1094_v41, %v1096_v54  ;;  %v1116_v52 = vsel %vm1115_vm1, %v2474_v32, 3e+38 }
 0x2af   : >> { %1083 = vst [vmem:[%s2536_s7 + $0x6] sm:$0x3] %v1082_v48  ;;  %vm1125_vm3 = vcmp.gt.f32.partialorder %v2470_v63, %v2687_v28  ;;  %v1121_v38 = vsel %vm1120_vm2, %v2467_v40, 3e+38  ;;  %vm1130_vm5 = vcmp.gt.f32.partialorder %v2478_v19, %v2687_v28  ;;  %vm1135_vm6 = vcmp.gt.f32.partialorder %v2483_v44, %v2687_v28 }
 0x2b0   : >> { %v1098_v61 = vmin.f32 %v1097_v55, %v1093_v37  ;;  %v1102_v62 = vmax.f32 %v1099_v60, %v1101_v30  ;;  %v1104_v0 = vmin.f32 %v1099_v60, %v1101_v30  ;;  %v1126_v29 = vsel %vm1125_vm3, %v2470_v63, 3e+38 }
 0x2b1   : >> { %v1131_v31 = vsel %vm1130_vm5, %v2478_v19, 3e+38  ;;  %vm1140_vm7 = vcmp.gt.f32.partialorder %v2488_v59, %v2687_v28  ;;  %v1136_v37 = vsel %vm1135_vm6, %v2483_v44, 3e+38  ;;  %vm1145_vm8 = vcmp.gt.f32.partialorder %v2495_v21, %v2687_v28 }
 0x2b2   : >> { %v1103_v18 = vmin.f32 %v1102_v62, %v1098_v61  ;;  %v1107_v20 = vmax.f32 %v1104_v0, %v1106_v58  ;;  %v1109_v50 = vmin.f32 %v1104_v0, %v1106_v58  ;;  %v1141_v61 = vsel %vm1140_vm7, %v2488_v59, 3e+38 }
 0x2b3   : >> { %vm1150_vm9 = vcmp.gt.f32.partialorder %v2500_v22, %v2687_v28  ;;  %vm1155_vm10 = vcmp.gt.f32.partialorder %v2505_v43, %v2687_v28  ;;  %vm1160_vm11 = vcmp.gt.f32.partialorder %v2510_v34, %v2687_v28 }
 0x2b4   : >> { %v1108_v57 = vmin.f32 %v1107_v20, %v1103_v18  ;;  %v1112_v27 = vmax.f32 %v1109_v50, %v1111_v26  ;;  %v1114_v24 = vmin.f32 %v1109_v50, %v1111_v26  ;;  %v1146_v18 = vsel %vm1145_vm8, %v2495_v21, 3e+38 }
 0x2b5   : >> { %v1151_v50 = vsel %vm1150_vm9, %v2500_v22, 3e+38 }
 0x2b6   : >> { %v1113_v56 = vmin.f32 %v1112_v27, %v1108_v57  ;;  %v1117_v51 = vmax.f32 %v1114_v24, %v1116_v52  ;;  %v1119_v46 = vmin.f32 %v1114_v24, %v1116_v52  ;;  %v1156_v24 = vsel %vm1155_vm10, %v2505_v43, 3e+38 }
 0x2b8   : >> { %v1118_v45 = vmin.f32 %v1117_v51, %v1113_v56  ;;  %v1122_v39 = vmax.f32 %v1119_v46, %v1121_v38  ;;  %v1124_v33 = vmin.f32 %v1119_v46, %v1121_v38  ;;  %v1161_v56 = vsel %vm1160_vm11, %v2510_v34, 3e+38 }
 0x2ba   : >> { %v1123_v35 = vmin.f32 %v1122_v39, %v1118_v45  ;;  %v1127_v17 = vmax.f32 %v1124_v33, %v1126_v29  ;;  %v1129_v53 = vmin.f32 %v1124_v33, %v1126_v29 }
 0x2bc   : >> { %v1128_v41 = vmin.f32 %v1127_v17, %v1123_v35  ;;  %v1132_v48 = vmax.f32 %v1129_v53, %v1131_v31  ;;  %v1134_v54 = vmin.f32 %v1129_v53, %v1131_v31 }
 0x2be   : >> { %v1133_v55 = vmin.f32 %v1132_v48, %v1128_v41  ;;  %v1137_v60 = vmax.f32 %v1134_v54, %v1136_v37  ;;  %v1139_v30 = vmin.f32 %v1134_v54, %v1136_v37 }
 0x2c0   : >> { %v1144_v62 = vmin.f32 %v1139_v30, %v1141_v61  ;;  %v1138_v0 = vmin.f32 %v1137_v60, %v1133_v55  ;;  %v1142_v58 = vmax.f32 %v1139_v30, %v1141_v61 }
 0x2c2   : >> { %v1149_v20 = vmin.f32 %v1144_v62, %v1146_v18  ;;  %v1143_v57 = vmin.f32 %v1142_v58, %v1138_v0  ;;  %v1147_v27 = vmax.f32 %v1144_v62, %v1146_v18 }
 0x2c4   : >> { %v1154_v26 = vmin.f32 %v1149_v20, %v1151_v50  ;;  %v1148_v46 = vmin.f32 %v1147_v27, %v1143_v57  ;;  %v1152_v38 = vmax.f32 %v1149_v20, %v1151_v50 }
 0x2c6   : >> { %v1159_v52 = vmin.f32 %v1154_v26, %v1156_v24  ;;  %v1153_v33 = vmin.f32 %v1152_v38, %v1148_v46  ;;  %v1157_v29 = vmax.f32 %v1154_v26, %v1156_v24 }
 0x2c8   : >> { %v1164_v51 = vmin.f32 %v1159_v52, %v1161_v56  ;;  %v1158_v53 = vmin.f32 %v1157_v29, %v1153_v33  ;;  %v1162_v31 = vmax.f32 %v1159_v52, %v1161_v56 }
 0x2ca   : >> { %v1165_v45 = vrot.slane %v1164_v51, 4  ;;  %v1163_v48 = vmin.f32 %v1162_v31, %v1158_v53 }
 0x2cc   : >> { %v1166_v39 = vmin.f32 %v1164_v51, %v1165_v45 }
 0x2ce   : >> { %v1167_v35 = vrot.slane %v1166_v39, 2 }
 0x2d0   : >> { %v1168_v17 = vmin.f32 %v1166_v39, %v1167_v35 }
 0x2d2   : >> { %v1169_v41 = vrot.slane %v1168_v17, 1 }
 0x2d4   : >> { %v1170_v28 = vmin.f32 %v1168_v17, %v1169_v41 }
 0x2d6   : >> { %vm1171_vm12 = vcmp.eq.f32.partialorder %v1164_v51, %v1170_v28 }
 0x2d7   : >> { %v1172_v54 = vsel %vm1171_vm12, %v1163_v48, %v1164_v51 }
 0x2d8   : >> { %v1173_v37 = vrot.slane %v1172_v54, 4 }
 0x2da   : >> { %v1174_v55 = vmin.f32 %v1172_v54, %v1173_v37 }
 0x2dc   : >> { %v1175_v60 = vrot.slane %v1174_v55, 2 }
 0x2de   : >> { %v1176_v30 = vmin.f32 %v1174_v55, %v1175_v60 }
 0x2e0   : >> { %v1177_v61 = vrot.slane %v1176_v30, 1 }
 0x2e2   : >> { %v2741_v62 = vmin.f32 %v1176_v30, %v1177_v61 }
 0x2e4   : >> { %v1179_v0 = vsel %vm763_vm4, %v1170_v28, %v2741_v62  ;;  %vm1188_vm13 = vcmp.gt.f32.partialorder %v2438_v47, %v2741_v62  ;;  %vm1193_vm14 = vcmp.gt.f32.partialorder %v2435_v36, %v2741_v62  ;;  %vm1198_vm15 = vcmp.gt.f32.partialorder %v2449_v49, %v2741_v62 }
 0x2e5   : >> { %v1181_v58 = vand.u32 127, %v1179_v0  ;;  %v1182_v18 = vand.u32 4294967168, %v1179_v0  ;;  %v1189_v20 = vsel %vm1188_vm13, %v2438_v47, 3e+38  ;;  %v1194_v27 = vsel %vm1193_vm14, %v2435_v36, 3e+38 }
 0x2e6   : >> { %v1190_v50 = vmax.f32 %v1189_v20, 3e+38  ;;  %v1192_v26 = vmin.f32 %v1189_v20, 3e+38  ;;  %vm1203_vm0 = vcmp.gt.f32.partialorder %v2446_v42, %v2741_v62  ;;  %v1199_v46 = vsel %vm1198_vm15, %v2449_v49, 3e+38 }
 0x2e7   : >> { %v1686_v57 = vadd.f32 -1.0, %v1182_v18  ;;  %1187 = vst [vmem:[%s2522_s6 + $0x8] sm:$0x3] %v1181_v58  ;;  %vm1208_vm1 = vcmp.gt.f32.partialorder %v2460_v25, %v2741_v62  ;;  %v1204_v33 = vsel %vm1203_vm0, %v2446_v42, 3e+38  ;;  %vm1213_vm2 = vcmp.gt.f32.partialorder %v2456_v23, %v2741_v62 }
 0x2e8   : >> { %v1191_v24 = vmin.f32 %v1190_v50, 3e+38  ;;  %v1195_v52 = vmax.f32 %v1192_v26, %v1194_v27  ;;  %v1197_v56 = vmin.f32 %v1192_v26, %v1194_v27  ;;  %v1209_v53 = vsel %vm1208_vm1, %v2460_v25, 3e+38 }
 0x2e9   : >> { %v1185_v51 = vmax.f32 %v1686_v57, 0.0  ;;  %vm1218_vm3 = vcmp.gt.f32.partialorder %v2474_v32, %v2741_v62  ;;  %v1214_v48 = vsel %vm1213_vm2, %v2456_v23, 3e+38  ;;  %vm1223_vm5 = vcmp.gt.f32.partialorder %v2467_v40, %v2741_v62 }
 0x2ea   : >> { %v1196_v38 = vmin.f32 %v1195_v52, %v1191_v24  ;;  %v1200_v45 = vmax.f32 %v1197_v56, %v1199_v46  ;;  %v1202_v39 = vmin.f32 %v1197_v56, %v1199_v46  ;;  %v1219_v60 = vsel %vm1218_vm3, %v2474_v32, 3e+38 }
 0x2eb   : >> { %1186 = vst [vmem:[%s2536_s7 + $0x8] sm:$0x3] %v1185_v51  ;;  %vm1228_vm6 = vcmp.gt.f32.partialorder %v2470_v63, %v2741_v62  ;;  %v1224_v58 = vsel %vm1223_vm5, %v2467_v40, 3e+38  ;;  %vm1233_vm7 = vcmp.gt.f32.partialorder %v2478_v19, %v2741_v62  ;;  %vm1238_vm8 = vcmp.gt.f32.partialorder %v2483_v44, %v2741_v62 }
 0x2ec   : >> { %v1201_v29 = vmin.f32 %v1200_v45, %v1196_v38  ;;  %v1205_v35 = vmax.f32 %v1202_v39, %v1204_v33  ;;  %v1207_v17 = vmin.f32 %v1202_v39, %v1204_v33  ;;  %v1229_v26 = vsel %vm1228_vm6, %v2470_v63, 3e+38 }
 0x2ed   : >> { %v1234_v52 = vsel %vm1233_vm7, %v2478_v19, 3e+38  ;;  %vm1243_vm9 = vcmp.gt.f32.partialorder %v2488_v59, %v2741_v62  ;;  %v1239_v38 = vsel %vm1238_vm8, %v2483_v44, 3e+38  ;;  %vm1248_vm10 = vcmp.gt.f32.partialorder %v2495_v21, %v2741_v62 }
 0x2ee   : >> { %v1206_v31 = vmin.f32 %v1205_v35, %v1201_v29  ;;  %v1210_v41 = vmax.f32 %v1207_v17, %v1209_v53  ;;  %v1212_v28 = vmin.f32 %v1207_v17, %v1209_v53  ;;  %v1244_v29 = vsel %vm1243_vm9, %v2488_v59, 3e+38 }
 0x2ef   : >> { %vm1253_vm11 = vcmp.gt.f32.partialorder %v2500_v22, %v2741_v62  ;;  %vm1258_vm12 = vcmp.gt.f32.partialorder %v2505_v43, %v2741_v62  ;;  %vm1263_vm13 = vcmp.gt.f32.partialorder %v2510_v34, %v2741_v62 }
 0x2f0   : >> { %v1211_v54 = vmin.f32 %v1210_v41, %v1206_v31  ;;  %v1215_v37 = vmax.f32 %v1212_v28, %v1214_v48  ;;  %v1217_v55 = vmin.f32 %v1212_v28, %v1214_v48  ;;  %v1249_v31 = vsel %vm1248_vm10, %v2495_v21, 3e+38 }
 0x2f1   : >> { %v1254_v28 = vsel %vm1253_vm11, %v2500_v22, 3e+38 }
 0x2f2   : >> { %v1216_v30 = vmin.f32 %v1215_v37, %v1211_v54  ;;  %v1220_v61 = vmax.f32 %v1217_v55, %v1219_v60  ;;  %v1222_v0 = vmin.f32 %v1217_v55, %v1219_v60  ;;  %v1259_v55 = vsel %vm1258_vm12, %v2505_v43, 3e+38 }
 0x2f4   : >> { %v1221_v18 = vmin.f32 %v1220_v61, %v1216_v30  ;;  %v1225_v20 = vmax.f32 %v1222_v0, %v1224_v58  ;;  %v1227_v50 = vmin.f32 %v1222_v0, %v1224_v58  ;;  %v1264_v30 = vsel %vm1263_vm13, %v2510_v34, 3e+38 }
 0x2f6   : >> { %v1226_v57 = vmin.f32 %v1225_v20, %v1221_v18  ;;  %v1230_v27 = vmax.f32 %v1227_v50, %v1229_v26  ;;  %v1232_v24 = vmin.f32 %v1227_v50, %v1229_v26 }
 0x2f8   : >> { %v1231_v56 = vmin.f32 %v1230_v27, %v1226_v57  ;;  %v1235_v51 = vmax.f32 %v1232_v24, %v1234_v52  ;;  %v1237_v46 = vmin.f32 %v1232_v24, %v1234_v52 }
 0x2fa   : >> { %v1236_v45 = vmin.f32 %v1235_v51, %v1231_v56  ;;  %v1240_v39 = vmax.f32 %v1237_v46, %v1239_v38  ;;  %v1242_v33 = vmin.f32 %v1237_v46, %v1239_v38 }
 0x2fc   : >> { %v1247_v35 = vmin.f32 %v1242_v33, %v1244_v29  ;;  %v1241_v17 = vmin.f32 %v1240_v39, %v1236_v45  ;;  %v1245_v53 = vmax.f32 %v1242_v33, %v1244_v29 }
 0x2fe   : >> { %v1252_v41 = vmin.f32 %v1247_v35, %v1249_v31  ;;  %v1246_v54 = vmin.f32 %v1245_v53, %v1241_v17  ;;  %v1250_v37 = vmax.f32 %v1247_v35, %v1249_v31 }
 0x300   : >> { %v1257_v48 = vmin.f32 %v1252_v41, %v1254_v28  ;;  %v1251_v0 = vmin.f32 %v1250_v37, %v1246_v54  ;;  %v1255_v58 = vmax.f32 %v1252_v41, %v1254_v28 }
 0x302   : >> { %v1262_v60 = vmin.f32 %v1257_v48, %v1259_v55  ;;  %v1256_v50 = vmin.f32 %v1255_v58, %v1251_v0  ;;  %v1260_v26 = vmax.f32 %v1257_v48, %v1259_v55 }
 0x304   : >> { %v1267_v61 = vmin.f32 %v1262_v60, %v1264_v30  ;;  %v1261_v24 = vmin.f32 %v1260_v26, %v1256_v50  ;;  %v1265_v52 = vmax.f32 %v1262_v60, %v1264_v30 }
 0x306   : >> { %v1268_v18 = vrot.slane %v1267_v61, 4  ;;  %v1266_v51 = vmin.f32 %v1265_v52, %v1261_v24 }
 0x308   : >> { %v1269_v20 = vmin.f32 %v1267_v61, %v1268_v18 }
 0x30a   : >> { %v1270_v57 = vrot.slane %v1269_v20, 2 }
 0x30c   : >> { %v1271_v27 = vmin.f32 %v1269_v20, %v1270_v57 }
 0x30e   : >> { %v1272_v56 = vrot.slane %v1271_v27, 1 }
 0x310   : >> { %v1273_v62 = vmin.f32 %v1271_v27, %v1272_v56 }
 0x312   : >> { %vm1274_vm14 = vcmp.eq.f32.partialorder %v1267_v61, %v1273_v62 }
 0x313   : >> { %v1275_v46 = vsel %vm1274_vm14, %v1266_v51, %v1267_v61 }
 0x314   : >> { %v1276_v38 = vrot.slane %v1275_v46, 4 }
 0x316   : >> { %v1277_v45 = vmin.f32 %v1275_v46, %v1276_v38 }
 0x318   : >> { %v1278_v39 = vrot.slane %v1277_v45, 2 }
 0x31a   : >> { %v1279_v33 = vmin.f32 %v1277_v45, %v1278_v39 }
 0x31c   : >> { %v1280_v29 = vrot.slane %v1279_v33, 1 }
 0x31e   : >> { %v2795_v35 = vmin.f32 %v1279_v33, %v1280_v29 }
 0x320   : >> { %v1282_v17 = vsel %vm763_vm4, %v1273_v62, %v2795_v35  ;;  %vm1291_vm15 = vcmp.gt.f32.partialorder %v2438_v47, %v2795_v35  ;;  %vm1296_vm0 = vcmp.gt.f32.partialorder %v2435_v36, %v2795_v35  ;;  %vm1301_vm1 = vcmp.gt.f32.partialorder %v2449_v49, %v2795_v35 }
 0x321   : >> { %v1284_v53 = vand.u32 127, %v1282_v17  ;;  %v1285_v31 = vand.u32 4294967168, %v1282_v17  ;;  %v1292_v41 = vsel %vm1291_vm15, %v2438_v47, 3e+38  ;;  %v1297_v37 = vsel %vm1296_vm0, %v2435_v36, 3e+38 }
 0x322   : >> { %v1293_v28 = vmax.f32 %v1292_v41, 3e+38  ;;  %v1295_v48 = vmin.f32 %v1292_v41, 3e+38  ;;  %vm1306_vm2 = vcmp.gt.f32.partialorder %v2446_v42, %v2795_v35  ;;  %v1302_v0 = vsel %vm1301_vm1, %v2449_v49, 3e+38 }
 0x323   : >> { %v1687_v54 = vadd.f32 -1.0, %v1285_v31  ;;  %1290 = vst [vmem:[%s2522_s6 + $0xa] sm:$0x3] %v1284_v53  ;;  %vm1311_vm3 = vcmp.gt.f32.partialorder %v2460_v25, %v2795_v35  ;;  %v1307_v50 = vsel %vm1306_vm2, %v2446_v42, 3e+38  ;;  %vm1316_vm5 = vcmp.gt.f32.partialorder %v2456_v23, %v2795_v35 }
 0x324   : >> { %v1294_v55 = vmin.f32 %v1293_v28, 3e+38  ;;  %v1298_v60 = vmax.f32 %v1295_v48, %v1297_v37  ;;  %v1300_v30 = vmin.f32 %v1295_v48, %v1297_v37  ;;  %v1312_v24 = vsel %vm1311_vm3, %v2460_v25, 3e+38 }
 0x325   : >> { %v1288_v61 = vmax.f32 %v1687_v54, 0.0  ;;  %vm1321_vm6 = vcmp.gt.f32.partialorder %v2474_v32, %v2795_v35  ;;  %v1317_v51 = vsel %vm1316_vm5, %v2456_v23, 3e+38  ;;  %vm1326_vm7 = vcmp.gt.f32.partialorder %v2467_v40, %v2795_v35 }
 0x326   : >> { %v1299_v58 = vmin.f32 %v1298_v60, %v1294_v55  ;;  %v1303_v18 = vmax.f32 %v1300_v30, %v1302_v0  ;;  %v1305_v20 = vmin.f32 %v1300_v30, %v1302_v0  ;;  %v1322_v39 = vsel %vm1321_vm6, %v2474_v32, 3e+38 }
 0x327   : >> { %1289 = vst [vmem:[%s2536_s7 + $0xa] sm:$0x3] %v1288_v61  ;;  %vm1331_vm8 = vcmp.gt.f32.partialorder %v2470_v63, %v2795_v35  ;;  %v1327_v53 = vsel %vm1326_vm7, %v2467_v40, 3e+38  ;;  %vm1336_vm9 = vcmp.gt.f32.partialorder %v2478_v19, %v2795_v35  ;;  %vm1341_vm10 = vcmp.gt.f32.partialorder %v2483_v44, %v2795_v35 }
 0x328   : >> { %v1304_v26 = vmin.f32 %v1303_v18, %v1299_v58  ;;  %v1308_v57 = vmax.f32 %v1305_v20, %v1307_v50  ;;  %v1310_v27 = vmin.f32 %v1305_v20, %v1307_v50  ;;  %v1332_v48 = vsel %vm1331_vm8, %v2470_v63, 3e+38 }
 0x329   : >> { %v1337_v60 = vsel %vm1336_vm9, %v2478_v19, 3e+38  ;;  %vm1346_vm11 = vcmp.gt.f32.partialorder %v2488_v59, %v2795_v35  ;;  %v1342_v58 = vsel %vm1341_vm10, %v2483_v44, 3e+38  ;;  %vm1351_vm12 = vcmp.gt.f32.partialorder %v2495_v21, %v2795_v35 }
 0x32a   : >> { %v1309_v52 = vmin.f32 %v1308_v57, %v1304_v26  ;;  %v1313_v56 = vmax.f32 %v1310_v27, %v1312_v24  ;;  %v1315_v62 = vmin.f32 %v1310_v27, %v1312_v24  ;;  %v1347_v26 = vsel %vm1346_vm11, %v2488_v59, 3e+38 }
 0x32b   : >> { %vm1356_vm13 = vcmp.gt.f32.partialorder %v2500_v22, %v2795_v35  ;;  %vm1361_vm14 = vcmp.gt.f32.partialorder %v2505_v43, %v2795_v35  ;;  %vm1366_vm15 = vcmp.gt.f32.partialorder %v2510_v34, %v2795_v35 }
 0x32c   : >> { %v1314_v46 = vmin.f32 %v1313_v56, %v1309_v52  ;;  %v1318_v38 = vmax.f32 %v1315_v62, %v1317_v51  ;;  %v1320_v45 = vmin.f32 %v1315_v62, %v1317_v51  ;;  %v1352_v52 = vsel %vm1351_vm12, %v2495_v21, 3e+38 }
 0x32d   : >> { %v1357_v62 = vsel %vm1356_vm13, %v2500_v22, 3e+38 }
 0x32e   : >> { %v1319_v33 = vmin.f32 %v1318_v38, %v1314_v46  ;;  %v1323_v29 = vmax.f32 %v1320_v45, %v1322_v39  ;;  %v1325_v17 = vmin.f32 %v1320_v45, %v1322_v39  ;;  %v1362_v45 = vsel %vm1361_vm14, %v2505_v43, 3e+38 }
 0x330   : >> { %v1324_v31 = vmin.f32 %v1323_v29, %v1319_v33  ;;  %v1328_v41 = vmax.f32 %v1325_v17, %v1327_v53  ;;  %v1330_v28 = vmin.f32 %v1325_v17, %v1327_v53  ;;  %v1367_v33 = vsel %vm1366_vm15, %v2510_v34, 3e+38 }
 0x332   : >> { %v1329_v54 = vmin.f32 %v1328_v41, %v1324_v31  ;;  %v1333_v37 = vmax.f32 %v1330_v28, %v1332_v48  ;;  %v1335_v55 = vmin.f32 %v1330_v28, %v1332_v48 }
 0x334   : >> { %v1334_v30 = vmin.f32 %v1333_v37, %v1329_v54  ;;  %v1338_v61 = vmax.f32 %v1335_v55, %v1337_v60  ;;  %v1340_v0 = vmin.f32 %v1335_v55, %v1337_v60 }
 0x336   : >> { %v1339_v18 = vmin.f32 %v1338_v61, %v1334_v30  ;;  %v1343_v20 = vmax.f32 %v1340_v0, %v1342_v58  ;;  %v1345_v50 = vmin.f32 %v1340_v0, %v1342_v58 }
 0x338   : >> { %v1350_v57 = vmin.f32 %v1345_v50, %v1347_v26  ;;  %v1344_v27 = vmin.f32 %v1343_v20, %v1339_v18  ;;  %v1348_v24 = vmax.f32 %v1345_v50, %v1347_v26 }
 0x33a   : >> { %v1355_v56 = vmin.f32 %v1350_v57, %v1352_v52  ;;  %v1349_v46 = vmin.f32 %v1348_v24, %v1344_v27  ;;  %v1353_v38 = vmax.f32 %v1350_v57, %v1352_v52 }
 0x33c   : >> { %v1360_v51 = vmin.f32 %v1355_v56, %v1357_v62  ;;  %v1354_v17 = vmin.f32 %v1353_v38, %v1349_v46  ;;  %v1358_v53 = vmax.f32 %v1355_v56, %v1357_v62 }
 0x33e   : >> { %v1365_v39 = vmin.f32 %v1360_v51, %v1362_v45  ;;  %v1359_v28 = vmin.f32 %v1358_v53, %v1354_v17  ;;  %v1363_v48 = vmax.f32 %v1360_v51, %v1362_v45 }
 0x340   : >> { %v1370_v29 = vmin.f32 %v1365_v39, %v1367_v33  ;;  %v1364_v55 = vmin.f32 %v1363_v48, %v1359_v28  ;;  %v1368_v60 = vmax.f32 %v1365_v39, %v1367_v33 }
 0x342   : >> { %v1371_v31 = vrot.slane %v1370_v29, 4  ;;  %v1369_v61 = vmin.f32 %v1368_v60, %v1364_v55 }
 0x344   : >> { %v1372_v41 = vmin.f32 %v1370_v29, %v1371_v31 }
 0x346   : >> { %v1373_v54 = vrot.slane %v1372_v41, 2 }
 0x348   : >> { %v1374_v37 = vmin.f32 %v1372_v41, %v1373_v54 }
 0x34a   : >> { %v1375_v30 = vrot.slane %v1374_v37, 1 }
 0x34c   : >> { %v1376_v35 = vmin.f32 %v1374_v37, %v1375_v30 }
 0x34e   : >> { %vm1377_vm0 = vcmp.eq.f32.partialorder %v1370_v29, %v1376_v35 }
 0x34f   : >> { %v1378_v0 = vsel %vm1377_vm0, %v1369_v61, %v1370_v29 }
 0x350   : >> { %v1379_v58 = vrot.slane %v1378_v0, 4 }
 0x352   : >> { %v1380_v18 = vmin.f32 %v1378_v0, %v1379_v58 }
 0x354   : >> { %v1381_v20 = vrot.slane %v1380_v18, 2 }
 0x356   : >> { %v1382_v50 = vmin.f32 %v1380_v18, %v1381_v20 }
 0x358   : >> { %v1383_v26 = vrot.slane %v1382_v50, 1 }
 0x35a   : >> { %v2849_v57 = vmin.f32 %v1382_v50, %v1383_v26 }
 0x35c   : >> { %v1385_v27 = vsel %vm763_vm4, %v1376_v35, %v2849_v57  ;;  %vm1394_vm1 = vcmp.gt.f32.partialorder %v2438_v47, %v2849_v57  ;;  %vm1399_vm2 = vcmp.gt.f32.partialorder %v2435_v36, %v2849_v57  ;;  %vm1404_vm3 = vcmp.gt.f32.partialorder %v2449_v49, %v2849_v57 }
 0x35d   : >> { %v1387_v24 = vand.u32 127, %v1385_v27  ;;  %v1388_v52 = vand.u32 4294967168, %v1385_v27  ;;  %v1395_v56 = vsel %vm1394_vm1, %v2438_v47, 3e+38  ;;  %v1400_v38 = vsel %vm1399_vm2, %v2435_v36, 3e+38 }
 0x35e   : >> { %v1396_v62 = vmax.f32 %v1395_v56, 3e+38  ;;  %v1398_v51 = vmin.f32 %v1395_v56, 3e+38  ;;  %vm1409_vm5 = vcmp.gt.f32.partialorder %v2446_v42, %v2849_v57  ;;  %v1405_v17 = vsel %vm1404_vm3, %v2449_v49, 3e+38 }
 0x35f   : >> { %v1688_v46 = vadd.f32 -1.0, %v1388_v52  ;;  %1393 = vst [vmem:[%s2522_s6 + $0xc] sm:$0x3] %v1387_v24  ;;  %vm1414_vm6 = vcmp.gt.f32.partialorder %v2460_v25, %v2849_v57  ;;  %v1410_v41 = vsel %vm1409_vm5, %v2446_v42, 3e+38  ;;  %vm1419_vm7 = vcmp.gt.f32.partialorder %v2456_v23, %v2849_v57 }
 0x360   : >> { %v1397_v45 = vmin.f32 %v1396_v62, 3e+38  ;;  %v1401_v39 = vmax.f32 %v1398_v51, %v1400_v38  ;;  %v1403_v33 = vmin.f32 %v1398_v51, %v1400_v38  ;;  %v1415_v54 = vsel %vm1414_vm6, %v2460_v25, 3e+38 }
 0x361   : >> { %v1391_v29 = vmax.f32 %v1688_v46, 0.0  ;;  %vm1424_vm8 = vcmp.gt.f32.partialorder %v2474_v32, %v2849_v57  ;;  %v1420_v60 = vsel %vm1419_vm7, %v2456_v23, 3e+38  ;;  %vm1429_vm9 = vcmp.gt.f32.partialorder %v2467_v40, %v2849_v57 }
 0x362   : >> { %v1402_v47 = vmin.f32 %v1401_v39, %v1397_v45  ;;  %v1406_v53 = vmax.f32 %v1403_v33, %v1405_v17  ;;  %v1408_v31 = vmin.f32 %v1403_v33, %v1405_v17  ;;  %v1425_v42 = vsel %vm1424_vm8, %v2474_v32, 3e+38 }
 0x363   : >> { %1392 = vst [vmem:[%s2536_s7 + $0xc] sm:$0x3] %v1391_v29  ;;  %vm1434_vm10 = vcmp.gt.f32.partialorder %v2470_v63, %v2849_v57  ;;  %v1430_v25 = vsel %vm1429_vm9, %v2467_v40, 3e+38  ;;  %vm1439_vm11 = vcmp.gt.f32.partialorder %v2478_v19, %v2849_v57  ;;  %vm1444_vm12 = vcmp.gt.f32.partialorder %v2483_v44, %v2849_v57 }
 0x364   : >> { %v1407_v28 = vmin.f32 %v1406_v53, %v1402_v47  ;;  %v1411_v36 = vmax.f32 %v1408_v31, %v1410_v41  ;;  %v1413_v48 = vmin.f32 %v1408_v31, %v1410_v41  ;;  %v1435_v23 = vsel %vm1434_vm10, %v2470_v63, 3e+38 }
 0x365   : >> { %v1440_v32 = vsel %vm1439_vm11, %v2478_v19, 3e+38  ;;  %vm1449_vm13 = vcmp.gt.f32.partialorder %v2488_v59, %v2849_v57  ;;  %v1445_v40 = vsel %vm1444_vm12, %v2483_v44, 3e+38  ;;  %vm1454_vm14 = vcmp.gt.f32.partialorder %v2495_v21, %v2849_v57 }
 0x366   : >> { %v1412_v37 = vmin.f32 %v1411_v36, %v1407_v28  ;;  %v1416_v55 = vmax.f32 %v1413_v48, %v1415_v54  ;;  %v1418_v49 = vmin.f32 %v1413_v48, %v1415_v54  ;;  %v1450_v63 = vsel %vm1449_vm13, %v2488_v59, 3e+38 }
 0x367   : >> { %vm1459_vm15 = vcmp.gt.f32.partialorder %v2500_v22, %v2849_v57  ;;  %v1455_v29 = vsel %vm1454_vm14, %v2495_v21, 3e+38  ;;  %vm1464_vm0 = vcmp.gt.f32.partialorder %v2505_v43, %v2849_v57  ;;  %vm1469_vm1 = vcmp.gt.f32.partialorder %v2510_v34, %v2849_v57 }
 0x368   : >> { %v1417_v30 = vmin.f32 %v1416_v55, %v1412_v37  ;;  %v1421_v35 = vmax.f32 %v1418_v49, %v1420_v60  ;;  %v1423_v61 = vmin.f32 %v1418_v49, %v1420_v60  ;;  %v1460_v44 = vsel %vm1459_vm15, %v2500_v22, 3e+38 }
 0x369   : >> { %v1465_v31 = vsel %vm1464_vm0, %v2505_v43, 3e+38  ;;  %v1470_v28 = vsel %vm1469_vm1, %v2510_v34, 3e+38 }
 0x36a   : >> { %v1422_v0 = vmin.f32 %v1421_v35, %v1417_v30  ;;  %v1426_v58 = vmax.f32 %v1423_v61, %v1425_v42  ;;  %v1428_v18 = vmin.f32 %v1423_v61, %v1425_v42 }
 0x36c   : >> { %v1427_v20 = vmin.f32 %v1426_v58, %v1422_v0  ;;  %v1431_v50 = vmax.f32 %v1428_v18, %v1430_v25  ;;  %v1433_v26 = vmin.f32 %v1428_v18, %v1430_v25 }
 0x36e   : >> { %v1432_v27 = vmin.f32 %v1431_v50, %v1427_v20  ;;  %v1436_v24 = vmax.f32 %v1433_v26, %v1435_v23  ;;  %v1438_v52 = vmin.f32 %v1433_v26, %v1435_v23 }
 0x370   : >> { %v1437_v56 = vmin.f32 %v1436_v24, %v1432_v27  ;;  %v1441_v62 = vmax.f32 %v1438_v52, %v1440_v32  ;;  %v1443_v51 = vmin.f32 %v1438_v52, %v1440_v32 }
 0x372   : >> { %v1442_v46 = vmin.f32 %v1441_v62, %v1437_v56  ;;  %v1446_v38 = vmax.f32 %v1443_v51, %v1445_v40  ;;  %v1448_v45 = vmin.f32 %v1443_v51, %v1445_v40 }
 0x374   : >> { %v1453_v39 = vmin.f32 %v1448_v45, %v1450_v63  ;;  %v1447_v19 = vmin.f32 %v1446_v38, %v1442_v46  ;;  %v1451_v33 = vmax.f32 %v1448_v45, %v1450_v63 }
 0x376   : >> { %v1458_v17 = vmin.f32 %v1453_v39, %v1455_v29  ;;  %v1452_v53 = vmin.f32 %v1451_v33, %v1447_v19  ;;  %v1456_v59 = vmax.f32 %v1453_v39, %v1455_v29 }
 0x378   : >> { %v1463_v47 = vmin.f32 %v1458_v17, %v1460_v44  ;;  %v1457_v48 = vmin.f32 %v1456_v59, %v1452_v53  ;;  %v1461_v21 = vmax.f32 %v1458_v17, %v1460_v44 }
 0x37a   : >> { %v1468_v41 = vmin.f32 %v1463_v47, %v1465_v31  ;;  %v1462_v55 = vmin.f32 %v1461_v21, %v1457_v48  ;;  %v1466_v49 = vmax.f32 %v1463_v47, %v1465_v31 }
 0x37c   : >> { %v1473_v36 = vmin.f32 %v1468_v41, %v1470_v28  ;;  %v1467_v30 = vmin.f32 %v1466_v49, %v1462_v55  ;;  %v1471_v35 = vmax.f32 %v1468_v41, %v1470_v28 }
 0x37e   : >> { %v1474_v54 = vrot.slane %v1473_v36, 4  ;;  %v1472_v42 = vmin.f32 %v1471_v35, %v1467_v30 }
 0x380   : >> { %v1475_v37 = vmin.f32 %v1473_v36, %v1474_v54 }
 0x382   : >> { %v1476_v60 = vrot.slane %v1475_v37, 2 }
 0x384   : >> { %v1477_v22 = vmin.f32 %v1475_v37, %v1476_v60 }
 0x386   : >> { %v1478_v57 = vrot.slane %v1477_v22, 1 }
 0x388   : >> { %v1479_v61 = vmin.f32 %v1477_v22, %v1478_v57 }
 0x38a   : >> { %vm1480_vm2 = vcmp.eq.f32.partialorder %v1473_v36, %v1479_v61 }
 0x38b   : >> { %v1481_v43 = vsel %vm1480_vm2, %v1472_v42, %v1473_v36 }
 0x38c   : >> { %v1482_v0 = vrot.slane %v1481_v43, 4 }
 0x38e   : >> { %v1483_v34 = vmin.f32 %v1481_v43, %v1482_v0 }
 0x390   : >> { %v1484_v58 = vrot.slane %v1483_v34, 2 }
 0x392   : >> { %v1485_v18 = vmin.f32 %v1483_v34, %v1484_v58 }
 0x394   : >> { %v1486_v25 = vrot.slane %v1485_v18, 1 }
 0x396   : >> { %v1487_v20 = vmin.f32 %v1485_v18, %v1486_v25 }
 0x398   : >> { %v1488_v50 = vsel %vm763_vm4, %v1479_v61, %v1487_v20 }
 0x399   : >> { %v1490_v26 = vand.u32 127, %v1488_v50  ;;  %v1491_v23 = vand.u32 4294967168, %v1488_v50 }
 0x39b   : >> { %v1689_v27 = vadd.f32 -1.0, %v1491_v23  ;;  %1496 = vst [vmem:[%s2522_s6 + $0xe] sm:$0x3] %v1490_v26  ;;  %181 = sbr.rel (!%p179_p11) target bundleno = 29 (0x1d), region = 86 }
 0x39d   : >> { %v1494_v24 = vmax.f32 %v1689_v27, 0.0 }
 0x39f   : >> { %1495 = vst [vmem:[%s2536_s7 + $0xe] sm:$0x3] %v1494_v24 }
 0x3a0   : > { %1892 = shalt.err (!%p1889_p4)
}
 0x3a1   : > { %s1893_s28 = scalar_lea.hbm %s2915_s17, 1024  ;;  %s1897_s4 = scalar_lea.hbm %s2998_s1, 2048 }
 0x3a2   : > { %p1894_p7 = scmp.ne.s32.totalorder %s2915_s17, %s1893_s28  ;;  %p1898_p10 = scmp.lt.s32.totalorder %s2915_s17, %s2998_s1 }
 0x3a3   : > { %p1899_p11 = scmp.lt.s32.totalorder %s1897_s4, %s1893_s28 }
 0x3a4   : > { %p1895_p8 = pnand %p1894_p7, %p2036_p5 }
 0x3a5   : > { %p1900_p12 = por %p1899_p11, %p1898_p10 }
 0x3a6   : > { %p1896_p9 = pneg %p1895_p8 }
 0x3a8   : > { %p1901_p13 = pnand %p1900_p12, %p1896_p9 }
 0x3aa   : > { %1904 = shalt.err (!%p1901_p13)
}
 0x3ab   : > { %s1980_s7 = smov 128   ;;  %s1981_s14 = smov 8  }
 0x3ac   : > { %1825 = dma.vmem_to_hbm [thread:$0]  (%p2036_p5), %s2918_s22, 1024, %s2915_s17, %s1498_s23, %s1980_s7, %s1980_s7, %s1981_s14  }
 0x3ad   : > { %s2951_s25 = scalar_lea.hbm %s2999_s2, %s1702_s8  ;;  %s1534_s26 = sshll.u32 %s2105_s29, 4  ;;  %s2954_s26 = int_to_ptr.vmem [resolvable:$true] %s1534_s26 }
 0x3ae   : > { %s1503_s27 = scalar_lea.sflag [#allocation5], %s2047_s21  ;;  %s1905_s28 = scalar_lea.vmem %s2954_s26, 1024 }
 0x3af   : > { %p1906_p0 = scmp.ne.s32.totalorder %s2954_s26, %s1905_s28  ;;  %s1982_s30 = smov [#allocation4]  }
 0x3b0   : > { %s1909_s17 = sshll.u32 %s1982_s30, 4  ;;  %s1910_s17 = int_to_ptr.vmem [resolvable:$false] %s1909_s17 }
 0x3b1   : > { %p1907_p1 = pnand %p1906_p0, %p2036_p5  ;;  %s1911_s13 = scalar_lea.vmem %s1910_s17, 2048 }
 0x3b2   : > { %p1912_p3 = scmp.lt.s32.totalorder %s2954_s26, %s1910_s17  ;;  %p1913_p4 = scmp.lt.s32.totalorder %s1911_s13, %s1905_s28 }
 0x3b3   : > { %p1908_p2 = pneg %p1907_p1 }
 0x3b4   : > { %p1914_p7 = por %p1913_p4, %p1912_p3 }
 0x3b6   : > { %p1915_p8 = pnand %p1914_p7, %p1908_p2 }
 0x3b8   : > { %1918 = shalt.err (!%p1915_p8)
}
 0x3b9   : > { %s1919_s29 = scalar_lea.hbm %s2951_s25, 1024  ;;  %s1923_s22 = scalar_lea.hbm %s2999_s2, 2048 }
 0x3ba   : > { %p1920_p9 = scmp.ne.s32.totalorder %s2951_s25, %s1919_s29  ;;  %p1924_p12 = scmp.lt.s32.totalorder %s2951_s25, %s2999_s2 }
 0x3bb   : > { %p1925_p13 = scmp.lt.s32.totalorder %s1923_s22, %s1919_s29 }
 0x3bc   : > { %p1921_p10 = pnand %p1920_p9, %p2036_p5 }
 0x3bd   : > { %p1926_p0 = por %p1925_p13, %p1924_p12 }
 0x3be   : > { %p1922_p11 = pneg %p1921_p10 }
 0x3c0   : > { %p1927_p1 = pnand %p1926_p0, %p1922_p11 }
 0x3c2   : > { %1930 = shalt.err (!%p1927_p1)
}
 0x3c3   : > { %1826 = dma.vmem_to_hbm [thread:$0]  (%p2036_p5), %s2954_s26, 1024, %s2951_s25, %s1503_s27, %s1980_s7, %s1980_s7, %s1981_s14  }
 0x3c4 PF: > { %p1836_p2 = scmp.ge.s32.totalorder %s1973_s12, 2  ;;  %s1549_s4 = sand.u32 1, %s1961_s9  }
 0x3c5   : > { %s1550_s5 = scalar_lea.sflag [#allocation3], %s1549_s4 }
 0x3c6   : > { %p1830_p3 = pnand %p1836_p2, %p2040_p6 }
 0x3c8   : > { %p1831_p4 = pneg %p1830_p3 }
 0x3ca   : > { %1952 = dma.done.wait (%p1831_p4), %s1550_s5, 1024  }
 0x3cb   : > { %1954 = vsyncadd (%p1831_p4), %s1550_s5, 4294966272  ;;  %s1559_s6 = scalar_lea.sflag [#allocation5], %s1549_s4 }
 0x3cc   : > { %1956 = dma.done.wait (%p1831_p4), %s1559_s6, 1024  }
 0x3cd   : > { %1958 = vsyncadd (%p1831_p4), %s1559_s6, 4294966272  ;;  %p16_p5 = scmp.ge.s32.totalorder %s2023_s15, 4   ;;  %s3002_s9 = smov %s1965_s10 }
 0x3ce   : > { %s3003_s10 = smov %s1969_s11  ;;  %s3004_s11 = smov %s2034_s18 }
 0x3cf   : > { %s3005_s12 = smov %s2023_s15  ;;  %18 = sbr.rel (!%p16_p5) target bundleno = 5 (0x5), region = 97 }
 0x3d4   :  { %1564 = vsyncpa [#allocation3], 1 }
 0x3d5   :  { %1566 = vsyncpa [#allocation3 + $0x1], 1 }
 0x3d6   :  { %1567 = vsyncpa [#allocation5], 1 }
 0x3d7   :  { %1569 = vsyncpa [#allocation5 + $0x1], 1 }

</bundles_post_ra>
